<compile_context>
chip_gen: v6e
topology: v6e:2x2x1
jax: 0.10.0
libtpu: 0.0.40
codegen_flags: <defaults>
</compile_context>

<pallas_src>
import functools
import math

import jax
import jax.numpy as jnp
from jax.experimental import pallas as pl
from jax.experimental.pallas import tpu as pltpu


# ----------------------------------------------------------------------------
# Small in-kernel math helpers
# ----------------------------------------------------------------------------
def _softplus1(x):
    # PyTorch softplus (beta=1, threshold=20) + 1.0
    e = jnp.exp(jnp.minimum(x, 20.0))
    return jnp.where(x > 20.0, x, jnp.log(1.0 + e)) + 1.0


# ----------------------------------------------------------------------------
# Host-side constant matrices (shared across ensemble members & batch)
# ----------------------------------------------------------------------------
def _pool_select_matrix(H, W):
    """S (N, N/4): pooled[j] = m[sel_j] gather as a matmul."""
    N, W2 = H * W, W // 2
    j = jnp.arange((H // 2) * W2, dtype=jnp.int32)
    sel = 2 * (j // W2) * W + 2 * (j % W2)
    i = jnp.arange(N, dtype=jnp.int32)
    return (i[:, None] == sel[None, :]).astype(jnp.float32)


def _deconv_scatter_matrices(H, W):
    """(4, N, 4N): scatter phase-(py,px) results into the interleaved output."""
    N = H * W
    i = jnp.arange(N, dtype=jnp.int32)
    y, x = i // W, i % W
    j = jnp.arange(4 * N, dtype=jnp.int32)
    mats = []
    for py in range(2):
        for px in range(2):
            dst = (2 * y + py) * (2 * W) + (2 * x + px)
            mats.append((dst[:, None] == j[None, :]).astype(jnp.float32))
    return jnp.stack(mats, axis=0)


def _mean_filter_matrix(H, W, ksz):
    """K (N, N): blur = ent(1,N) @ K, zero padding, always /ksz^2."""
    r = ksz // 2
    i = jnp.arange(H * W, dtype=jnp.int32)
    yi, xi = i // W, i % W
    dy = jnp.abs(yi[:, None] - yi[None, :]) <= r
    dx = jnp.abs(xi[:, None] - xi[None, :]) <= r
    return (dy & dx).astype(jnp.float32) * (1.0 / float(ksz * ksz))


# ----------------------------------------------------------------------------
# Kernel 1: full AttUNet forward for one (ensemble member, batch element)
# ----------------------------------------------------------------------------
def _build_attunet_kernel(nd, nh, n_att, W):
    n_member = 2 + 2 * nd + 3 * n_att

    def kernel(*refs):
        x_ref = refs[0]
        mrefs = refs[1:1 + n_member]
        pool_refs = refs[1 + n_member:1 + n_member + nd]
        scat_refs = refs[1 + n_member + nd:1 + n_member + 2 * nd]
        o_ref = refs[-1]

        def masks(Wc, Nc):
            xi = jax.lax.broadcasted_iota(jnp.int32, (1, Nc), 1) % Wc
            ml = (xi != 0).astype(jnp.float32)          # valid when dx' = -1
            mr = (xi != (Wc - 1)).astype(jnp.float32)   # valid when dx' = +1
            return ml, mr

        def pad_flat(h, pad):
            Cc = h.shape[0]
            z = jnp.zeros((Cc, pad), jnp.float32)
            return jnp.concatenate([z, h, z], axis=1)

        def tap(hp, pad, dy, dx, Wc, Nc, ml, mr):
            off = pad + dy * Wc + dx
            s = hp[:, off:off + Nc]
            if dx == -1:
                s = s * ml
            elif dx == 1:
                s = s * mr
            return s

        def conv3x3(h, w_aug, Wc):
            # h (Cin, N), w_aug (Cout, 9*Cin+1) with BN scale folded, bias last col.
            Cin, Nc = h.shape
            pad = Wc + 1
            hp = pad_flat(h, pad)
            ml, mr = masks(Wc, Nc)
            slabs = [tap(hp, pad, dy, dx, Wc, Nc, ml, mr)
                     for dy in (-1, 0, 1) for dx in (-1, 0, 1)]
            slabs.append(jnp.ones((1, Nc), jnp.float32))          # bias row
            pat = jnp.concatenate(slabs, axis=0)                   # (9Cin+1, N)
            return jnp.dot(w_aug, pat, preferred_element_type=jnp.float32)

        def maxpool2(h, Wc, sel):
            Cc, Nc = h.shape
            hp = jnp.concatenate([h, jnp.zeros((Cc, Wc + 1), jnp.float32)], axis=1)
            m = jnp.maximum(jnp.maximum(hp[:, 0:Nc], hp[:, 1:Nc + 1]),
                            jnp.maximum(hp[:, Wc:Wc + Nc], hp[:, Wc + 1:Wc + 1 + Nc]))
            return jnp.dot(m, sel, preferred_element_type=jnp.float32)

        def deconv(h, w_ref, scat_ref, Wc):
            # ConvTranspose2d(k=4, s=2, p=1) as 4 polyphase 2x2 convs + scatter matmuls.
            Cin, Nc = h.shape
            pad = Wc + 1
            hp = pad_flat(h, pad)
            ml, mr = masks(Wc, Nc)
            ones = jnp.ones((1, Nc), jnp.float32)
            acc = None
            for p, (py, px) in enumerate(((0, 0), (0, 1), (1, 0), (1, 1))):
                slabs = [tap(hp, pad, py + a - 1, px + b - 1, Wc, Nc, ml, mr)
                         for a in (0, 1) for b in (0, 1)]
                slabs.append(ones)
                pat = jnp.concatenate(slabs, axis=0)               # (4Cin+1, N)
                ph = jnp.dot(w_ref[0, p], pat,
                             preferred_element_type=jnp.float32)   # (Cout, N)
                contrib = jnp.dot(ph, scat_ref[p],
                                  preferred_element_type=jnp.float32)  # (Cout, 4N)
                acc = contrib if acc is None else acc + contrib
            return jnp.tanh(acc)

        def attention(h, wqkv, wo, pos):
            Cc, Nl = h.shape
            dh = Cc // nh
            t = h + pos
            ones = jnp.ones((1, Nl), jnp.float32)
            qkv = jnp.dot(wqkv, jnp.concatenate([t, ones], axis=0),
                          preferred_element_type=jnp.float32)       # (3C, Nl)
            q = qkv[0:Cc].reshape(nh, dh, Nl)
            k = qkv[Cc:2 * Cc].reshape(nh, dh, Nl)
            v = qkv[2 * Cc:3 * Cc].reshape(nh, dh, Nl)
            qt = jnp.swapaxes(q, 1, 2)                              # (nh, Nl, dh)
            s = jnp.einsum('hnd,hdm->hnm', qt, k,
                           preferred_element_type=jnp.float32) * (1.0 / math.sqrt(dh))
            s = s - jnp.max(s, axis=-1, keepdims=True)
            p = jnp.exp(s)
            p = p * pl.reciprocal(jnp.sum(p, axis=-1, keepdims=True), approx=True)
            o = jnp.einsum('hnm,hdm->hnd', p, v,
                           preferred_element_type=jnp.float32)      # (nh, Nl, dh)
            o = jnp.swapaxes(o, 1, 2).reshape(Cc, Nl)
            out = jnp.dot(wo, jnp.concatenate([o, ones], axis=0),
                          preferred_element_type=jnp.float32)
            return t + out

        Wc = W
        h = conv3x3(x_ref[0].astype(jnp.float32), mrefs[0][0], Wc)   # ingest (identity)
        idx = 1
        skips = []
        for i in range(nd):                                          # down path
            h = jnp.tanh(conv3x3(h, mrefs[idx][0], Wc)); idx += 1
            h = maxpool2(h, Wc, pool_refs[i][...])
            Wc //= 2
            skips.append(h)
        for _ in range(n_att):                                       # attention
            h = attention(h, mrefs[idx][0], mrefs[idx + 1][0], mrefs[idx + 2][0])
            idx += 3
        for i in range(nd):                                          # up path
            h = deconv(h + skips[nd - 1 - i], mrefs[idx], scat_refs[i], Wc)
            idx += 1
            Wc *= 2
        y = conv3x3(h, mrefs[idx][0], Wc)                            # outgest (identity)
        o_ref[0, 0] = _softplus1(y)

    return kernel


# ----------------------------------------------------------------------------
# Kernel 2: ensemble vote + entropy + 11x11 mean filter (one matmul)
# ----------------------------------------------------------------------------
def _build_vote_kernel(E, oc):
    def kernel(y_ref, filt_ref, pred_ref, ent_ref):
        y = y_ref[...][:, 0]                                       # (E, 2*oc, N)
        g = (y[:, :oc, :] > y[:, oc:, :]).astype(jnp.float32)      # per-member vote
        gsum = jnp.sum(g, axis=0)                                  # (oc, N)
        pred_ref[0] = (gsum == float(E)).astype(jnp.float32)
        frac = gsum * (1.0 / E)
        ent = jnp.mean(4.0 * frac * (1.0 - frac), axis=0, keepdims=True)   # (1, N)
        ent_ref[0] = jnp.dot(ent, filt_ref[...], preferred_element_type=jnp.float32)

    return kernel


# ----------------------------------------------------------------------------
# Parameter initialization (deterministic, PyTorch-like) and kernel-ready prep
# ----------------------------------------------------------------------------
def _conv_raw(key, K, Cin, Cout):
    kw, kb = jax.random.split(key)
    bound = 1.0 / math.sqrt(K * K * Cin)
    return {"w": jax.random.uniform(kw, (K, K, Cin, Cout), jnp.float32, -bound, bound),
            "b": jax.random.uniform(kb, (Cout,), jnp.float32, -bound, bound)}


def _bn_raw(C):
    # PyTorch BatchNorm2d eval defaults: gamma=1, beta=0, mean=0, var=1, eps=1e-5
    eps = 1e-5
    return (jnp.ones((C,), jnp.float32) / jnp.sqrt(1.0 + eps),
            jnp.zeros((C,), jnp.float32))


def init_attunet(key, in_ch, out_ch, inner, n_att, ctx_len=256):
    k_ing, k_out, k_down, k_up, k_att = jax.random.split(key, 5)
    raw = {
        "ingest": {**_conv_raw(k_ing, 3, in_ch, inner[0]), "bn": _bn_raw(in_ch)},
        "outgest": {**_conv_raw(k_out, 3, inner[0], 2 * out_ch), "bn": _bn_raw(inner[0])},
        "downs": [], "ups": [], "att": [],
    }
    dkeys = jax.random.split(k_down, max(len(inner) - 1, 1))
    ukeys = jax.random.split(k_up, max(len(inner) - 1, 1))
    for i in range(len(inner) - 1):
        raw["downs"].append({**_conv_raw(dkeys[i], 3, inner[i], inner[i + 1]),
                             "bn": _bn_raw(inner[i])})
        raw["ups"].append({**_conv_raw(ukeys[i], 4, inner[-i - 1], inner[-i - 2]),
                           "bn": _bn_raw(inner[-i - 1])})
    C = inner[-1]
    bound = 1.0 / math.sqrt(C)
    akeys = jax.random.split(k_att, max(n_att, 1))
    for j in range(n_att):
        ks = jax.random.split(akeys[j], 9)
        raw["att"].append({
            "wq": jax.random.uniform(ks[0], (C, C), jnp.float32, -bound, bound),
            "wk": jax.random.uniform(ks[1], (C, C), jnp.float32, -bound, bound),
            "wv": jax.random.uniform(ks[2], (C, C), jnp.float32, -bound, bound),
            "wo": jax.random.uniform(ks[3], (C, C), jnp.float32, -bound, bound),
            "bq": jax.random.uniform(ks[4], (1, C), jnp.float32, -bound, bound),
            "bk": jax.random.uniform(ks[5], (1, C), jnp.float32, -bound, bound),
            "bv": jax.random.uniform(ks[6], (1, C), jnp.float32, -bound, bound),
            "bo": jax.random.uniform(ks[7], (1, C), jnp.float32, -bound, bound),
            "pos": 0.02 * jax.random.normal(ks[8], (ctx_len, C), jnp.float32),
        })
    return raw


def prepare_attunet(raw, in_ch, out_ch, inner, H, W):
    """Flatten one member's params into the exact kernel order, in the flipped
    (Cout, taps*Cin + 1) layout with the BN scale folded and bias appended."""
    nd = len(inner) - 1
    N_low = (H >> nd) * (W >> nd)
    flat = []

    def conv_aug(p, Cin, Cout, K=3):
        scale, _shift = p["bn"]                       # shift == 0 at init (dropped)
        w = p["w"] * scale[None, None, :, None]       # fold BN scale into weights
        w2 = w.reshape(K * K * Cin, Cout)
        w_aug = jnp.concatenate([w2, p["b"].reshape(1, Cout)], axis=0)
        flat.append(jnp.transpose(w_aug))             # (Cout, K*K*Cin + 1)

    def deconv_aug(p):
        scale, _shift = p["bn"]
        w = p["w"] * scale[None, None, :, None]       # (4, 4, Cin, Cout)
        Cout = w.shape[3]
        phases = []
        for py in range(2):
            for px in range(2):
                taps = [w[3 - py - 2 * a, 3 - px - 2 * b]
                        for a in range(2) for b in range(2)]          # (Cin, Cout)
                ph = jnp.concatenate(taps + [p["b"].reshape(1, Cout)], axis=0)
                phases.append(jnp.transpose(ph))                      # (Cout, 4Cin+1)
        flat.append(jnp.stack(phases, axis=0))                        # (4, Cout, 4Cin+1)

    conv_aug(raw["ingest"], in_ch, inner[0])
    for i, p in enumerate(raw["downs"]):
        conv_aug(p, inner[i], inner[i + 1])
    for p in raw["att"]:
        wqkv = jnp.concatenate([p["wq"], p["wk"], p["wv"]], axis=1)    # (C, 3C)
        bqkv = jnp.concatenate([p["bq"], p["bk"], p["bv"]], axis=1)    # (1, 3C)
        wqkv_aug = jnp.transpose(jnp.concatenate([wqkv, bqkv], axis=0))  # (3C, C+1)
        wo_aug = jnp.transpose(jnp.concatenate([p["wo"], p["bo"]], axis=0))  # (C, C+1)
        pos_t = jnp.transpose(p["pos"][:N_low])                        # (C, N_low)
        flat.extend([wqkv_aug, wo_aug, pos_t])
    for p in raw["ups"]:
        deconv_aug(p)
    conv_aug(raw["outgest"], inner[0], 2 * out_ch)
    return flat


# ----------------------------------------------------------------------------
# Ensemble forward
# ----------------------------------------------------------------------------
def ensemble_forward(stacked, x_nchw, *, out_ch, inner, nh, n_att,
                     training=False, mean_filter_size=11):
    E = stacked[0].shape[0]
    B, in_ch, H, W = x_nchw.shape
    nd = len(inner) - 1
    assert H % (1 << nd) == 0 and W % (1 << nd) == 0
    N0, C2 = H * W, 2 * out_ch

    x = x_nchw.reshape(B, in_ch, N0).astype(jnp.float32)     # NCHW -> (B, C, H*W) free

    pool_mats = [_pool_select_matrix(H >> i, W >> i) for i in range(nd)]
    scat_mats = [_deconv_scatter_matrices(H >> (nd - i), W >> (nd - i))
                 for i in range(nd)]

    def member_spec(a):
        rest = a.shape[1:]
        return pl.BlockSpec((1,) + rest,
                            lambda e, b, _z=(0,) * len(rest): (e,) + _z)

    def const_spec(a):
        return pl.BlockSpec(a.shape, lambda e, b, _z=(0,) * a.ndim: _z)

    y_all = pl.pallas_call(
        _build_attunet_kernel(nd, nh, n_att, W),
        out_shape=jax.ShapeDtypeStruct((E, B, C2, N0), jnp.float32),
        grid=(E, B),
        in_specs=[pl.BlockSpec((1, in_ch, N0), lambda e, b: (b, 0, 0))]
                 + [member_spec(a) for a in stacked]
                 + [const_spec(a) for a in pool_mats]
                 + [const_spec(a) for a in scat_mats],
        out_specs=pl.BlockSpec((1, 1, C2, N0), lambda e, b: (e, b, 0, 0)),
        compiler_params=pltpu.CompilerParams(
            dimension_semantics=("parallel", "parallel"),
            vmem_limit_bytes=32 * 1024 * 1024),
    )(x, *stacked, *pool_mats, *scat_mats)

    if training:
        y = jnp.stack([y_all[:, :, :out_ch, :], y_all[:, :, out_ch:, :]], axis=0)
        return y.reshape(2, E, B, out_ch, H, W)

    filt = _mean_filter_matrix(H, W, mean_filter_size)
    pred_f, ent = pl.pallas_call(
        _build_vote_kernel(E, out_ch),
        out_shape=[jax.ShapeDtypeStruct((B, out_ch, N0), jnp.float32),
                   jax.ShapeDtypeStruct((B, 1, N0), jnp.float32)],
        grid=(B,),
        in_specs=[pl.BlockSpec((E, 1, C2, N0), lambda b: (0, b, 0, 0)),
                  pl.BlockSpec((N0, N0), lambda b: (0, 0))],
        out_specs=[pl.BlockSpec((1, out_ch, N0), lambda b: (b, 0, 0)),
                   pl.BlockSpec((1, 1, N0), lambda b: (b, 0, 0))],
        compiler_params=pltpu.CompilerParams(
            dimension_semantics=("parallel",),
            vmem_limit_bytes=32 * 1024 * 1024),
    )(y_all, filt)

    prediction = pred_f.reshape(B, out_ch, H, W) > 0.5       # bool (B, oc, H, W)
    entropy = ent.reshape(B, 1, H, W)                        # (B, 1, H, W)
    return prediction, entropy


# ----------------------------------------------------------------------------
# Demo
# ----------------------------------------------------------------------------
if __name__ == "__main__":
    in_channels, out_channels = 3, 2
    inner_channels = [8, 16, 32]
    att_num_heads, num_att_module, num_ensemble = 4, 1, 2
    B, H, W = 2, 16, 16                      # divisible by quantize_size = 4

    key = jax.random.PRNGKey(0)
    k_x, k_p = jax.random.split(key)
    x = jax.random.normal(k_x, (B, in_channels, H, W), jnp.float32)   # NCHW input

    pkeys = jax.random.split(k_p, num_ensemble)
    members = [init_attunet(pkeys[i], in_channels, out_channels, inner_channels,
                            num_att_module) for i in range(num_ensemble)]
    flats = [prepare_attunet(m, in_channels, out_channels, inner_channels, H, W)
             for m in members]
    stacked = [jnp.stack(ws, axis=0) for ws in zip(*flats)]          # leading E axis

    fwd = jax.jit(functools.partial(
        ensemble_forward, out_ch=out_channels, inner=inner_channels,
        nh=att_num_heads, n_att=num_att_module,
        training=False, mean_filter_size=11))

    prediction, entropy = fwd(stacked, x)
    jax.block_until_ready((prediction, entropy))

    assert prediction.shape == (B, out_channels, H, W) and prediction.dtype == jnp.bool_
    assert entropy.shape == (B, 1, H, W) and entropy.dtype == jnp.float32
    print("KERNEL_OK")
</pallas_src>

<mosaic_0001>
module attributes {stable_mosaic.version = 11 : i64} {
  func.func @kernel(%arg0: i32, %arg1: memref<2x1x4x256xf32, #tpu.memory_space<vmem>>, %arg2: memref<256x256xf32, #tpu.memory_space<vmem>>, %arg3: memref<1x2x256xf32, #tpu.memory_space<vmem>>, %arg4: memref<1x1x256xf32, #tpu.memory_space<vmem>>) attributes {dimension_semantics = [#tpu.dimension_semantics<parallel>], iteration_bounds = array<i64: 2>, scalar_prefetch = 0 : i64, scratch_operands = 0 : i64, tpu.core_type = #tpu.core_type<tc>, window_params = [{transform_indices = @transform_0, window_bounds = array<i64: 2, 1, 4, 256>}, {pipeline_mode = #tpu.pipeline_mode<synchronous>, transform_indices = @transform_1, window_bounds = array<i64: 256, 256>}, {transform_indices = @transform_2, window_bounds = array<i64: 1, 2, 256>}, {transform_indices = @transform_3, window_bounds = array<i64: 1, 1, 256>}]} {
    %c0 = arith.constant 0 : index
    %c0_0 = arith.constant 0 : index
    %c0_1 = arith.constant 0 : index
    %c0_2 = arith.constant 0 : index
    %0 = vector.load %arg1[%c0, %c0_0, %c0_1, %c0_2] : memref<2x1x4x256xf32, #tpu.memory_space<vmem>>, vector<2x1x4x256xf32>
    %1 = vector.shape_cast %0 : vector<2x1x4x256xf32> to vector<2x4x256xf32>
    %2 = vector.extract_strided_slice %1 {offsets = [0, 0, 0], sizes = [2, 2, 256], strides = [1, 1, 1]} : vector<2x4x256xf32> to vector<2x2x256xf32>
    %3 = vector.extract_strided_slice %1 {offsets = [0, 2, 0], sizes = [2, 2, 256], strides = [1, 1, 1]} : vector<2x4x256xf32> to vector<2x2x256xf32>
    %4 = arith.cmpf ogt, %2, %3 : vector<2x2x256xf32>
    %5 = arith.extui %4 : vector<2x2x256xi1> to vector<2x2x256xi32>
    %6 = arith.sitofp %5 : vector<2x2x256xi32> to vector<2x2x256xf32>
    %cst = arith.constant dense<0.000000e+00> : vector<2x256xf32>
    %7 = vector.multi_reduction <add>, %6, %cst [0] : vector<2x2x256xf32> to vector<2x256xf32>
    %cst_3 = arith.constant 2.000000e+00 : f32
    %8 = vector.broadcast %cst_3 : f32 to vector<2x256xf32>
    %9 = arith.cmpf oeq, %7, %8 : vector<2x256xf32>
    %10 = arith.extui %9 : vector<2x256xi1> to vector<2x256xi32>
    %11 = arith.sitofp %10 : vector<2x256xi32> to vector<2x256xf32>
    %c0_4 = arith.constant 0 : index
    %c0_5 = arith.constant 0 : index
    %c0_6 = arith.constant 0 : index
    %12 = vector.load %arg3[%c0_4, %c0_5, %c0_6] : memref<1x2x256xf32, #tpu.memory_space<vmem>>, vector<1x2x256xf32>
    %13 = vector.shape_cast %12 : vector<1x2x256xf32> to vector<2x256xf32>
    %14 = vector.shape_cast %11 : vector<2x256xf32> to vector<1x2x256xf32>
    tpu.vector_store %arg3[%c0_4, %c0_5, %c0_6], %14 {strides = array<i32>} : memref<1x2x256xf32, #tpu.memory_space<vmem>>, vector<1x2x256xf32>,
    %cst_7 = arith.constant 5.000000e-01 : f32
    %15 = vector.broadcast %cst_7 : f32 to vector<2x256xf32>
    %16 = arith.mulf %7, %15 : vector<2x256xf32>
    %cst_8 = arith.constant 4.000000e+00 : f32
    %17 = vector.broadcast %cst_8 : f32 to vector<2x256xf32>
    %18 = arith.mulf %17, %16 : vector<2x256xf32>
    %cst_9 = arith.constant 1.000000e+00 : f32
    %19 = vector.broadcast %cst_9 : f32 to vector<2x256xf32>
    %20 = arith.subf %19, %16 : vector<2x256xf32>
    %21 = arith.mulf %18, %20 : vector<2x256xf32>
    %cst_10 = arith.constant dense<0.000000e+00> : vector<256xf32>
    %22 = vector.multi_reduction <add>, %21, %cst_10 [0] : vector<2x256xf32> to vector<256xf32>
    %23 = vector.shape_cast %22 : vector<256xf32> to vector<1x256xf32>
    %cst_11 = arith.constant 2.000000e+00 : f32
    %24 = vector.broadcast %cst_11 : f32 to vector<1x256xf32>
    %25 = arith.divf %23, %24 : vector<1x256xf32>
    %c0_12 = arith.constant 0 : index
    %c0_13 = arith.constant 0 : index
    %26 = vector.load %arg2[%c0_12, %c0_13] : memref<256x256xf32, #tpu.memory_space<vmem>>, vector<256x256xf32>
    %cst_14 = arith.constant dense<0.000000e+00> : vector<1x256xf32>
    %27 = tpu.matmul %25, %26, %cst_14 {dimension_numbers = #tpu.dot_dimension_numbers<[1], [0], [0], [1], [0, 0, 1, 1], [], []>} : vector<1x256xf32>, vector<256x256xf32>, vector<1x256xf32> -> vector<1x256xf32>
    %c0_15 = arith.constant 0 : index
    %c0_16 = arith.constant 0 : index
    %c0_17 = arith.constant 0 : index
    %28 = vector.load %arg4[%c0_15, %c0_16, %c0_17] : memref<1x1x256xf32, #tpu.memory_space<vmem>>, vector<1x1x256xf32>
    %29 = vector.shape_cast %28 : vector<1x1x256xf32> to vector<1x256xf32>
    %30 = vector.shape_cast %27 : vector<1x256xf32> to vector<1x1x256xf32>
    tpu.vector_store %arg4[%c0_15, %c0_16, %c0_17], %30 {strides = array<i32>} : memref<1x1x256xf32, #tpu.memory_space<vmem>>, vector<1x1x256xf32>,
    return
  }
  func.func @transform_0(%arg0: i32) -> (i32, i32, i32, i32) {
    %c0_i32 = arith.constant 0 : i32
    %c0_i32_0 = arith.constant 0 : i32
    %c0_i32_1 = arith.constant 0 : i32
    %c0_i32_2 = arith.constant 0 : i32
    return %c0_i32, %arg0, %c0_i32_0, %c0_i32_1 : i32, i32, i32, i32
  }
  func.func @transform_1(%arg0: i32) -> (i32, i32) {
    %c0_i32 = arith.constant 0 : i32
    %c0_i32_0 = arith.constant 0 : i32
    %c0_i32_1 = arith.constant 0 : i32
    return %c0_i32, %c0_i32_0 : i32, i32
  }
  func.func @transform_2(%arg0: i32) -> (i32, i32, i32) {
    %c0_i32 = arith.constant 0 : i32
    %c0_i32_0 = arith.constant 0 : i32
    %c0_i32_1 = arith.constant 0 : i32
    return %arg0, %c0_i32, %c0_i32_0 : i32, i32, i32
  }
  func.func @transform_3(%arg0: i32) -> (i32, i32, i32) {
    %c0_i32 = arith.constant 0 : i32
    %c0_i32_0 = arith.constant 0 : i32
    %c0_i32_1 = arith.constant 0 : i32
    return %arg0, %c0_i32, %c0_i32_0 : i32, i32, i32
  }
}

module attributes {stable_mosaic.version = 11 : i64} {
  func.func @kernel(%arg0: i32, %arg1: i32, %arg2: memref<1x3x256xf32, #tpu.memory_space<vmem>>, %arg3: memref<1x8x28xf32, #tpu.memory_space<vmem>>, %arg4: memref<1x16x73xf32, #tpu.memory_space<vmem>>, %arg5: memref<1x32x145xf32, #tpu.memory_space<vmem>>, %arg6: memref<1x96x33xf32, #tpu.memory_space<vmem>>, %arg7: memref<1x32x33xf32, #tpu.memory_space<vmem>>, %arg8: memref<1x32x16xf32, #tpu.memory_space<vmem>>, %arg9: memref<1x4x16x129xf32, #tpu.memory_space<vmem>>, %arg10: memref<1x4x8x65xf32, #tpu.memory_space<vmem>>, %arg11: memref<1x4x73xf32, #tpu.memory_space<vmem>>, %arg12: memref<256x64xf32, #tpu.memory_space<vmem>>, %arg13: memref<64x16xf32, #tpu.memory_space<vmem>>, %arg14: memref<4x16x64xf32, #tpu.memory_space<vmem>>, %arg15: memref<4x64x256xf32, #tpu.memory_space<vmem>>, %arg16: memref<1x1x4x256xf32, #tpu.memory_space<vmem>>) attributes {dimension_semantics = [#tpu.dimension_semantics<parallel>, #tpu.dimension_semantics<parallel>], iteration_bounds = array<i64: 2, 2>, scalar_prefetch = 0 : i64, scratch_operands = 0 : i64, tpu.core_type = #tpu.core_type<tc>, window_params = [{transform_indices = @transform_0, window_bounds = array<i64: 1, 3, 256>}, {transform_indices = @transform_1, window_bounds = array<i64: 1, 8, 28>}, {transform_indices = @transform_2, window_bounds = array<i64: 1, 16, 73>}, {transform_indices = @transform_3, window_bounds = array<i64: 1, 32, 145>}, {transform_indices = @transform_4, window_bounds = array<i64: 1, 96, 33>}, {transform_indices = @transform_5, window_bounds = array<i64: 1, 32, 33>}, {transform_indices = @transform_6, window_bounds = array<i64: 1, 32, 16>}, {transform_indices = @transform_7, window_bounds = array<i64: 1, 4, 16, 129>}, {transform_indices = @transform_8, window_bounds = array<i64: 1, 4, 8, 65>}, {transform_indices = @transform_9, window_bounds = array<i64: 1, 4, 73>}, {pipeline_mode = #tpu.pipeline_mode<synchronous>, transform_indices = @transform_10, window_bounds = array<i64: 256, 64>}, {pipeline_mode = #tpu.pipeline_mode<synchronous>, transform_indices = @transform_11, window_bounds = array<i64: 64, 16>}, {pipeline_mode = #tpu.pipeline_mode<synchronous>, transform_indices = @transform_12, window_bounds = array<i64: 4, 16, 64>}, {pipeline_mode = #tpu.pipeline_mode<synchronous>, transform_indices = @transform_13, window_bounds = array<i64: 4, 64, 256>}, {transform_indices = @transform_14, window_bounds = array<i64: 1, 1, 4, 256>}]} {
    %c0 = arith.constant 0 : index
    %c0_0 = arith.constant 0 : index
    %c0_1 = arith.constant 0 : index
    %0 = vector.load %arg2[%c0, %c0_0, %c0_1] : memref<1x3x256xf32, #tpu.memory_space<vmem>>, vector<1x3x256xf32>
    %1 = vector.shape_cast %0 : vector<1x3x256xf32> to vector<3x256xf32>
    %c0_2 = arith.constant 0 : index
    %c0_3 = arith.constant 0 : index
    %c0_4 = arith.constant 0 : index
    %2 = vector.load %arg3[%c0_2, %c0_3, %c0_4] : memref<1x8x28xf32, #tpu.memory_space<vmem>>, vector<1x8x28xf32>
    %3 = vector.shape_cast %2 : vector<1x8x28xf32> to vector<8x28xf32>
    %cst = arith.constant 0.000000e+00 : f32
    %4 = vector.broadcast %cst : f32 to vector<3x17xf32>
    %5 = tpu.concatenate %4, %1, %4 in 1 : vector<3x17xf32>, vector<3x256xf32>, vector<3x17xf32> -> vector<3x290xf32>
    %6 = tpu.iota {dimensions = array<i32: 1>} : vector<1x256xi32>
    %c16_i32 = arith.constant 16 : i32
    %c0_i32 = arith.constant 0 : i32
    %7 = arith.cmpi eq, %c16_i32, %c0_i32 : i32
    %c1_i32 = arith.constant 1 : i32
    %8 = arith.select %7, %c1_i32, %c16_i32 : i32
    %9 = vector.broadcast %8 : i32 to vector<1x256xi32>
    %10 = arith.remsi %6, %9 : vector<1x256xi32>
    %c0_i32_5 = arith.constant 0 : i32
    %11 = vector.broadcast %c0_i32_5 : i32 to vector<1x256xi32>
    %12 = arith.cmpi ne, %10, %11 : vector<1x256xi32>
    %c0_i32_6 = arith.constant 0 : i32
    %13 = vector.broadcast %c0_i32_6 : i32 to vector<1x256xi32>
    %14 = arith.cmpi slt, %10, %13 : vector<1x256xi32>
    %c0_i32_7 = arith.constant 0 : i32
    %15 = arith.cmpi slt, %8, %c0_i32_7 : i32
    %16 = vector.broadcast %15 : i1 to vector<1x256xi1>
    %17 = vector.broadcast %16 : vector<1x256xi1> to vector<1x256xi1>
    %18 = arith.xori %14, %17 : vector<1x256xi1>
    %19 = arith.andi %18, %12 : vector<1x256xi1>
    %20 = vector.broadcast %8 : i32 to vector<1x256xi32>
    %21 = arith.addi %10, %20 : vector<1x256xi32>
    %22 = arith.select %19, %21, %10 : vector<1x256xi1>, vector<1x256xi32>
    %c0_i32_8 = arith.constant 0 : i32
    %23 = vector.broadcast %c0_i32_8 : i32 to vector<1x256xi32>
    %24 = arith.cmpi ne, %22, %23 : vector<1x256xi32>
    %25 = arith.extui %24 : vector<1x256xi1> to vector<1x256xi32>
    %26 = arith.sitofp %25 : vector<1x256xi32> to vector<1x256xf32>
    %c15_i32 = arith.constant 15 : i32
    %27 = vector.broadcast %c15_i32 : i32 to vector<1x256xi32>
    %28 = arith.cmpi ne, %22, %27 : vector<1x256xi32>
    %29 = arith.extui %28 : vector<1x256xi1> to vector<1x256xi32>
    %30 = arith.sitofp %29 : vector<1x256xi32> to vector<1x256xf32>
    %31 = vector.extract_strided_slice %5 {offsets = [0, 0], sizes = [3, 256], strides = [1, 1]} : vector<3x290xf32> to vector<3x256xf32>
    %32 = vector.broadcast %26 : vector<1x256xf32> to vector<3x256xf32>
    %33 = arith.mulf %31, %32 : vector<3x256xf32>
    %34 = vector.extract_strided_slice %5 {offsets = [0, 1], sizes = [3, 256], strides = [1, 1]} : vector<3x290xf32> to vector<3x256xf32>
    %35 = vector.extract_strided_slice %5 {offsets = [0, 2], sizes = [3, 256], strides = [1, 1]} : vector<3x290xf32> to vector<3x256xf32>
    %36 = vector.broadcast %30 : vector<1x256xf32> to vector<3x256xf32>
    %37 = arith.mulf %35, %36 : vector<3x256xf32>
    %38 = vector.extract_strided_slice %5 {offsets = [0, 16], sizes = [3, 256], strides = [1, 1]} : vector<3x290xf32> to vector<3x256xf32>
    %39 = vector.broadcast %26 : vector<1x256xf32> to vector<3x256xf32>
    %40 = arith.mulf %38, %39 : vector<3x256xf32>
    %41 = vector.extract_strided_slice %5 {offsets = [0, 17], sizes = [3, 256], strides = [1, 1]} : vector<3x290xf32> to vector<3x256xf32>
    %42 = vector.extract_strided_slice %5 {offsets = [0, 18], sizes = [3, 256], strides = [1, 1]} : vector<3x290xf32> to vector<3x256xf32>
    %43 = vector.broadcast %30 : vector<1x256xf32> to vector<3x256xf32>
    %44 = arith.mulf %42, %43 : vector<3x256xf32>
    %45 = vector.extract_strided_slice %5 {offsets = [0, 32], sizes = [3, 256], strides = [1, 1]} : vector<3x290xf32> to vector<3x256xf32>
    %46 = vector.broadcast %26 : vector<1x256xf32> to vector<3x256xf32>
    %47 = arith.mulf %45, %46 : vector<3x256xf32>
    %48 = vector.extract_strided_slice %5 {offsets = [0, 33], sizes = [3, 256], strides = [1, 1]} : vector<3x290xf32> to vector<3x256xf32>
    %49 = vector.extract_strided_slice %5 {offsets = [0, 34], sizes = [3, 256], strides = [1, 1]} : vector<3x290xf32> to vector<3x256xf32>
    %50 = vector.broadcast %30 : vector<1x256xf32> to vector<3x256xf32>
    %51 = arith.mulf %49, %50 : vector<3x256xf32>
    %cst_9 = arith.constant 1.000000e+00 : f32
    %52 = vector.broadcast %cst_9 : f32 to vector<1x256xf32>
    %53 = tpu.concatenate %33, %34, %37, %40, %41, %44, %47, %48, %51, %52 in 0 : vector<3x256xf32>, vector<3x256xf32>, vector<3x256xf32>, vector<3x256xf32>, vector<3x256xf32>, vector<3x256xf32>, vector<3x256xf32>, vector<3x256xf32>, vector<3x256xf32>, vector<1x256xf32> -> vector<28x256xf32>
    %cst_10 = arith.constant dense<0.000000e+00> : vector<8x256xf32>
    %54 = tpu.matmul %3, %53, %cst_10 {dimension_numbers = #tpu.dot_dimension_numbers<[1], [0], [0], [1], [0, 0, 1, 1], [], []>} : vector<8x28xf32>, vector<28x256xf32>, vector<8x256xf32> -> vector<8x256xf32>
    %c0_11 = arith.constant 0 : index
    %c0_12 = arith.constant 0 : index
    %c0_13 = arith.constant 0 : index
    %55 = vector.load %arg4[%c0_11, %c0_12, %c0_13] : memref<1x16x73xf32, #tpu.memory_space<vmem>>, vector<1x16x73xf32>
    %56 = vector.shape_cast %55 : vector<1x16x73xf32> to vector<16x73xf32>
    %cst_14 = arith.constant 0.000000e+00 : f32
    %57 = vector.broadcast %cst_14 : f32 to vector<8x17xf32>
    %58 = tpu.concatenate %57, %54, %57 in 1 : vector<8x17xf32>, vector<8x256xf32>, vector<8x17xf32> -> vector<8x290xf32>
    %59 = tpu.iota {dimensions = array<i32: 1>} : vector<1x256xi32>
    %c16_i32_15 = arith.constant 16 : i32
    %c0_i32_16 = arith.constant 0 : i32
    %60 = arith.cmpi eq, %c16_i32_15, %c0_i32_16 : i32
    %c1_i32_17 = arith.constant 1 : i32
    %61 = arith.select %60, %c1_i32_17, %c16_i32_15 : i32
    %62 = vector.broadcast %61 : i32 to vector<1x256xi32>
    %63 = arith.remsi %59, %62 : vector<1x256xi32>
    %c0_i32_18 = arith.constant 0 : i32
    %64 = vector.broadcast %c0_i32_18 : i32 to vector<1x256xi32>
    %65 = arith.cmpi ne, %63, %64 : vector<1x256xi32>
    %c0_i32_19 = arith.constant 0 : i32
    %66 = vector.broadcast %c0_i32_19 : i32 to vector<1x256xi32>
    %67 = arith.cmpi slt, %63, %66 : vector<1x256xi32>
    %c0_i32_20 = arith.constant 0 : i32
    %68 = arith.cmpi slt, %61, %c0_i32_20 : i32
    %69 = vector.broadcast %68 : i1 to vector<1x256xi1>
    %70 = vector.broadcast %69 : vector<1x256xi1> to vector<1x256xi1>
    %71 = arith.xori %67, %70 : vector<1x256xi1>
    %72 = arith.andi %71, %65 : vector<1x256xi1>
    %73 = vector.broadcast %61 : i32 to vector<1x256xi32>
    %74 = arith.addi %63, %73 : vector<1x256xi32>
    %75 = arith.select %72, %74, %63 : vector<1x256xi1>, vector<1x256xi32>
    %c0_i32_21 = arith.constant 0 : i32
    %76 = vector.broadcast %c0_i32_21 : i32 to vector<1x256xi32>
    %77 = arith.cmpi ne, %75, %76 : vector<1x256xi32>
    %78 = arith.extui %77 : vector<1x256xi1> to vector<1x256xi32>
    %79 = arith.sitofp %78 : vector<1x256xi32> to vector<1x256xf32>
    %c15_i32_22 = arith.constant 15 : i32
    %80 = vector.broadcast %c15_i32_22 : i32 to vector<1x256xi32>
    %81 = arith.cmpi ne, %75, %80 : vector<1x256xi32>
    %82 = arith.extui %81 : vector<1x256xi1> to vector<1x256xi32>
    %83 = arith.sitofp %82 : vector<1x256xi32> to vector<1x256xf32>
    %84 = vector.extract_strided_slice %58 {offsets = [0, 0], sizes = [8, 256], strides = [1, 1]} : vector<8x290xf32> to vector<8x256xf32>
    %85 = vector.broadcast %79 : vector<1x256xf32> to vector<8x256xf32>
    %86 = arith.mulf %84, %85 : vector<8x256xf32>
    %87 = vector.extract_strided_slice %58 {offsets = [0, 1], sizes = [8, 256], strides = [1, 1]} : vector<8x290xf32> to vector<8x256xf32>
    %88 = vector.extract_strided_slice %58 {offsets = [0, 2], sizes = [8, 256], strides = [1, 1]} : vector<8x290xf32> to vector<8x256xf32>
    %89 = vector.broadcast %83 : vector<1x256xf32> to vector<8x256xf32>
    %90 = arith.mulf %88, %89 : vector<8x256xf32>
    %91 = vector.extract_strided_slice %58 {offsets = [0, 16], sizes = [8, 256], strides = [1, 1]} : vector<8x290xf32> to vector<8x256xf32>
    %92 = vector.broadcast %79 : vector<1x256xf32> to vector<8x256xf32>
    %93 = arith.mulf %91, %92 : vector<8x256xf32>
    %94 = vector.extract_strided_slice %58 {offsets = [0, 17], sizes = [8, 256], strides = [1, 1]} : vector<8x290xf32> to vector<8x256xf32>
    %95 = vector.extract_strided_slice %58 {offsets = [0, 18], sizes = [8, 256], strides = [1, 1]} : vector<8x290xf32> to vector<8x256xf32>
    %96 = vector.broadcast %83 : vector<1x256xf32> to vector<8x256xf32>
    %97 = arith.mulf %95, %96 : vector<8x256xf32>
    %98 = vector.extract_strided_slice %58 {offsets = [0, 32], sizes = [8, 256], strides = [1, 1]} : vector<8x290xf32> to vector<8x256xf32>
    %99 = vector.broadcast %79 : vector<1x256xf32> to vector<8x256xf32>
    %100 = arith.mulf %98, %99 : vector<8x256xf32>
    %101 = vector.extract_strided_slice %58 {offsets = [0, 33], sizes = [8, 256], strides = [1, 1]} : vector<8x290xf32> to vector<8x256xf32>
    %102 = vector.extract_strided_slice %58 {offsets = [0, 34], sizes = [8, 256], strides = [1, 1]} : vector<8x290xf32> to vector<8x256xf32>
    %103 = vector.broadcast %83 : vector<1x256xf32> to vector<8x256xf32>
    %104 = arith.mulf %102, %103 : vector<8x256xf32>
    %cst_23 = arith.constant 1.000000e+00 : f32
    %105 = vector.broadcast %cst_23 : f32 to vector<1x256xf32>
    %106 = tpu.concatenate %86, %87, %90, %93, %94, %97, %100, %101, %104, %105 in 0 : vector<8x256xf32>, vector<8x256xf32>, vector<8x256xf32>, vector<8x256xf32>, vector<8x256xf32>, vector<8x256xf32>, vector<8x256xf32>, vector<8x256xf32>, vector<8x256xf32>, vector<1x256xf32> -> vector<73x256xf32>
    %cst_24 = arith.constant dense<0.000000e+00> : vector<16x256xf32>
    %107 = tpu.matmul %56, %106, %cst_24 {dimension_numbers = #tpu.dot_dimension_numbers<[1], [0], [0], [1], [0, 0, 1, 1], [], []>} : vector<16x73xf32>, vector<73x256xf32>, vector<16x256xf32> -> vector<16x256xf32>
    %108 = math.tanh %107 : vector<16x256xf32>
    %c0_25 = arith.constant 0 : index
    %c0_26 = arith.constant 0 : index
    %109 = vector.load %arg12[%c0_25, %c0_26] : memref<256x64xf32, #tpu.memory_space<vmem>>, vector<256x64xf32>
    %cst_27 = arith.constant 0.000000e+00 : f32
    %110 = vector.broadcast %cst_27 : f32 to vector<16x17xf32>
    %111 = tpu.concatenate %108, %110 in 1 : vector<16x256xf32>, vector<16x17xf32> -> vector<16x273xf32>
    %112 = vector.extract_strided_slice %111 {offsets = [0, 0], sizes = [16, 256], strides = [1, 1]} : vector<16x273xf32> to vector<16x256xf32>
    %113 = vector.extract_strided_slice %111 {offsets = [0, 1], sizes = [16, 256], strides = [1, 1]} : vector<16x273xf32> to vector<16x256xf32>
    %114 = arith.maximumf %112, %113 : vector<16x256xf32>
    %115 = vector.extract_strided_slice %111 {offsets = [0, 16], sizes = [16, 256], strides = [1, 1]} : vector<16x273xf32> to vector<16x256xf32>
    %116 = vector.extract_strided_slice %111 {offsets = [0, 17], sizes = [16, 256], strides = [1, 1]} : vector<16x273xf32> to vector<16x256xf32>
    %117 = arith.maximumf %115, %116 : vector<16x256xf32>
    %118 = arith.maximumf %114, %117 : vector<16x256xf32>
    %cst_28 = arith.constant dense<0.000000e+00> : vector<16x64xf32>
    %119 = tpu.matmul %118, %109, %cst_28 {dimension_numbers = #tpu.dot_dimension_numbers<[1], [0], [0], [1], [0, 0, 1, 1], [], []>} : vector<16x256xf32>, vector<256x64xf32>, vector<16x64xf32> -> vector<16x64xf32>
    %c0_29 = arith.constant 0 : index
    %c0_30 = arith.constant 0 : index
    %c0_31 = arith.constant 0 : index
    %120 = vector.load %arg5[%c0_29, %c0_30, %c0_31] : memref<1x32x145xf32, #tpu.memory_space<vmem>>, vector<1x32x145xf32>
    %121 = vector.shape_cast %120 : vector<1x32x145xf32> to vector<32x145xf32>
    %cst_32 = arith.constant 0.000000e+00 : f32
    %122 = vector.broadcast %cst_32 : f32 to vector<16x9xf32>
    %123 = tpu.concatenate %122, %119, %122 in 1 : vector<16x9xf32>, vector<16x64xf32>, vector<16x9xf32> -> vector<16x82xf32>
    %124 = tpu.iota {dimensions = array<i32: 1>} : vector<1x64xi32>
    %c8_i32 = arith.constant 8 : i32
    %c0_i32_33 = arith.constant 0 : i32
    %125 = arith.cmpi eq, %c8_i32, %c0_i32_33 : i32
    %c1_i32_34 = arith.constant 1 : i32
    %126 = arith.select %125, %c1_i32_34, %c8_i32 : i32
    %127 = vector.broadcast %126 : i32 to vector<1x64xi32>
    %128 = arith.remsi %124, %127 : vector<1x64xi32>
    %c0_i32_35 = arith.constant 0 : i32
    %129 = vector.broadcast %c0_i32_35 : i32 to vector<1x64xi32>
    %130 = arith.cmpi ne, %128, %129 : vector<1x64xi32>
    %c0_i32_36 = arith.constant 0 : i32
    %131 = vector.broadcast %c0_i32_36 : i32 to vector<1x64xi32>
    %132 = arith.cmpi slt, %128, %131 : vector<1x64xi32>
    %c0_i32_37 = arith.constant 0 : i32
    %133 = arith.cmpi slt, %126, %c0_i32_37 : i32
    %134 = vector.broadcast %133 : i1 to vector<1x64xi1>
    %135 = vector.broadcast %134 : vector<1x64xi1> to vector<1x64xi1>
    %136 = arith.xori %132, %135 : vector<1x64xi1>
    %137 = arith.andi %136, %130 : vector<1x64xi1>
    %138 = vector.broadcast %126 : i32 to vector<1x64xi32>
    %139 = arith.addi %128, %138 : vector<1x64xi32>
    %140 = arith.select %137, %139, %128 : vector<1x64xi1>, vector<1x64xi32>
    %c0_i32_38 = arith.constant 0 : i32
    %141 = vector.broadcast %c0_i32_38 : i32 to vector<1x64xi32>
    %142 = arith.cmpi ne, %140, %141 : vector<1x64xi32>
    %143 = arith.extui %142 : vector<1x64xi1> to vector<1x64xi32>
    %144 = arith.sitofp %143 : vector<1x64xi32> to vector<1x64xf32>
    %c7_i32 = arith.constant 7 : i32
    %145 = vector.broadcast %c7_i32 : i32 to vector<1x64xi32>
    %146 = arith.cmpi ne, %140, %145 : vector<1x64xi32>
    %147 = arith.extui %146 : vector<1x64xi1> to vector<1x64xi32>
    %148 = arith.sitofp %147 : vector<1x64xi32> to vector<1x64xf32>
    %149 = vector.extract_strided_slice %123 {offsets = [0, 0], sizes = [16, 64], strides = [1, 1]} : vector<16x82xf32> to vector<16x64xf32>
    %150 = vector.broadcast %144 : vector<1x64xf32> to vector<16x64xf32>
    %151 = arith.mulf %149, %150 : vector<16x64xf32>
    %152 = vector.extract_strided_slice %123 {offsets = [0, 1], sizes = [16, 64], strides = [1, 1]} : vector<16x82xf32> to vector<16x64xf32>
    %153 = vector.extract_strided_slice %123 {offsets = [0, 2], sizes = [16, 64], strides = [1, 1]} : vector<16x82xf32> to vector<16x64xf32>
    %154 = vector.broadcast %148 : vector<1x64xf32> to vector<16x64xf32>
    %155 = arith.mulf %153, %154 : vector<16x64xf32>
    %156 = vector.extract_strided_slice %123 {offsets = [0, 8], sizes = [16, 64], strides = [1, 1]} : vector<16x82xf32> to vector<16x64xf32>
    %157 = vector.broadcast %144 : vector<1x64xf32> to vector<16x64xf32>
    %158 = arith.mulf %156, %157 : vector<16x64xf32>
    %159 = vector.extract_strided_slice %123 {offsets = [0, 9], sizes = [16, 64], strides = [1, 1]} : vector<16x82xf32> to vector<16x64xf32>
    %160 = vector.extract_strided_slice %123 {offsets = [0, 10], sizes = [16, 64], strides = [1, 1]} : vector<16x82xf32> to vector<16x64xf32>
    %161 = vector.broadcast %148 : vector<1x64xf32> to vector<16x64xf32>
    %162 = arith.mulf %160, %161 : vector<16x64xf32>
    %163 = vector.extract_strided_slice %123 {offsets = [0, 16], sizes = [16, 64], strides = [1, 1]} : vector<16x82xf32> to vector<16x64xf32>
    %164 = vector.broadcast %144 : vector<1x64xf32> to vector<16x64xf32>
    %165 = arith.mulf %163, %164 : vector<16x64xf32>
    %166 = vector.extract_strided_slice %123 {offsets = [0, 17], sizes = [16, 64], strides = [1, 1]} : vector<16x82xf32> to vector<16x64xf32>
    %167 = vector.extract_strided_slice %123 {offsets = [0, 18], sizes = [16, 64], strides = [1, 1]} : vector<16x82xf32> to vector<16x64xf32>
    %168 = vector.broadcast %148 : vector<1x64xf32> to vector<16x64xf32>
    %169 = arith.mulf %167, %168 : vector<16x64xf32>
    %cst_39 = arith.constant 1.000000e+00 : f32
    %170 = vector.broadcast %cst_39 : f32 to vector<1x64xf32>
    %171 = tpu.concatenate %151, %152, %155, %158, %159, %162, %165, %166, %169, %170 in 0 : vector<16x64xf32>, vector<16x64xf32>, vector<16x64xf32>, vector<16x64xf32>, vector<16x64xf32>, vector<16x64xf32>, vector<16x64xf32>, vector<16x64xf32>, vector<16x64xf32>, vector<1x64xf32> -> vector<145x64xf32>
    %cst_40 = arith.constant dense<0.000000e+00> : vector<32x64xf32>
    %172 = tpu.matmul %121, %171, %cst_40 {dimension_numbers = #tpu.dot_dimension_numbers<[1], [0], [0], [1], [0, 0, 1, 1], [], []>} : vector<32x145xf32>, vector<145x64xf32>, vector<32x64xf32> -> vector<32x64xf32>
    %173 = math.tanh %172 : vector<32x64xf32>
    %c0_41 = arith.constant 0 : index
    %c0_42 = arith.constant 0 : index
    %174 = vector.load %arg13[%c0_41, %c0_42] : memref<64x16xf32, #tpu.memory_space<vmem>>, vector<64x16xf32>
    %cst_43 = arith.constant 0.000000e+00 : f32
    %175 = vector.broadcast %cst_43 : f32 to vector<32x9xf32>
    %176 = tpu.concatenate %173, %175 in 1 : vector<32x64xf32>, vector<32x9xf32> -> vector<32x73xf32>
    %177 = vector.extract_strided_slice %176 {offsets = [0, 0], sizes = [32, 64], strides = [1, 1]} : vector<32x73xf32> to vector<32x64xf32>
    %178 = vector.extract_strided_slice %176 {offsets = [0, 1], sizes = [32, 64], strides = [1, 1]} : vector<32x73xf32> to vector<32x64xf32>
    %179 = arith.maximumf %177, %178 : vector<32x64xf32>
    %180 = vector.extract_strided_slice %176 {offsets = [0, 8], sizes = [32, 64], strides = [1, 1]} : vector<32x73xf32> to vector<32x64xf32>
    %181 = vector.extract_strided_slice %176 {offsets = [0, 9], sizes = [32, 64], strides = [1, 1]} : vector<32x73xf32> to vector<32x64xf32>
    %182 = arith.maximumf %180, %181 : vector<32x64xf32>
    %183 = arith.maximumf %179, %182 : vector<32x64xf32>
    %cst_44 = arith.constant dense<0.000000e+00> : vector<32x16xf32>
    %184 = tpu.matmul %183, %174, %cst_44 {dimension_numbers = #tpu.dot_dimension_numbers<[1], [0], [0], [1], [0, 0, 1, 1], [], []>} : vector<32x64xf32>, vector<64x16xf32>, vector<32x16xf32> -> vector<32x16xf32>
    %c0_45 = arith.constant 0 : index
    %c0_46 = arith.constant 0 : index
    %c0_47 = arith.constant 0 : index
    %185 = vector.load %arg6[%c0_45, %c0_46, %c0_47] : memref<1x96x33xf32, #tpu.memory_space<vmem>>, vector<1x96x33xf32>
    %186 = vector.shape_cast %185 : vector<1x96x33xf32> to vector<96x33xf32>
    %c0_48 = arith.constant 0 : index
    %c0_49 = arith.constant 0 : index
    %c0_50 = arith.constant 0 : index
    %187 = vector.load %arg7[%c0_48, %c0_49, %c0_50] : memref<1x32x33xf32, #tpu.memory_space<vmem>>, vector<1x32x33xf32>
    %188 = vector.shape_cast %187 : vector<1x32x33xf32> to vector<32x33xf32>
    %c0_51 = arith.constant 0 : index
    %c0_52 = arith.constant 0 : index
    %c0_53 = arith.constant 0 : index
    %189 = vector.load %arg8[%c0_51, %c0_52, %c0_53] : memref<1x32x16xf32, #tpu.memory_space<vmem>>, vector<1x32x16xf32>
    %190 = vector.shape_cast %189 : vector<1x32x16xf32> to vector<32x16xf32>
    %191 = arith.addf %184, %190 : vector<32x16xf32>
    %cst_54 = arith.constant 1.000000e+00 : f32
    %192 = vector.broadcast %cst_54 : f32 to vector<1x16xf32>
    %193 = tpu.concatenate %191, %192 in 0 : vector<32x16xf32>, vector<1x16xf32> -> vector<33x16xf32>
    %cst_55 = arith.constant dense<0.000000e+00> : vector<96x16xf32>
    %194 = tpu.matmul %186, %193, %cst_55 {dimension_numbers = #tpu.dot_dimension_numbers<[1], [0], [0], [1], [0, 0, 1, 1], [], []>} : vector<96x33xf32>, vector<33x16xf32>, vector<96x16xf32> -> vector<96x16xf32>
    %195 = vector.extract_strided_slice %194 {offsets = [0, 0], sizes = [32, 16], strides = [1, 1]} : vector<96x16xf32> to vector<32x16xf32>
    %196 = vector.shape_cast %195 : vector<32x16xf32> to vector<4x8x16xf32>
    %197 = vector.extract_strided_slice %194 {offsets = [32, 0], sizes = [32, 16], strides = [1, 1]} : vector<96x16xf32> to vector<32x16xf32>
    %198 = vector.shape_cast %197 : vector<32x16xf32> to vector<4x8x16xf32>
    %199 = vector.extract_strided_slice %194 {offsets = [64, 0], sizes = [32, 16], strides = [1, 1]} : vector<96x16xf32> to vector<32x16xf32>
    %200 = vector.shape_cast %199 : vector<32x16xf32> to vector<4x8x16xf32>
    %201 = tpu.transpose %196, [0, 2, 1] : vector<4x8x16xf32> -> vector<4x16x8xf32>
    "tpu.trace_start"() <{level = 10 : i32, message = "hnd,hdm->hnm"}> : () -> ()
    %cst_56 = arith.constant dense<0.000000e+00> : vector<4x16x16xf32>
    %202 = tpu.matmul %201, %198, %cst_56 {dimension_numbers = #tpu.dot_dimension_numbers<[2], [1], [1], [2], [0, 0, 0, 1, 1, 2], [0], [0]>} : vector<4x16x8xf32>, vector<4x8x16xf32>, vector<4x16x16xf32> -> vector<4x16x16xf32>
    "tpu.trace_stop"() : () -> ()
    %cst_57 = arith.constant 0.353553385 : f32
    %203 = vector.broadcast %cst_57 : f32 to vector<4x16x16xf32>
    %204 = arith.mulf %202, %203 : vector<4x16x16xf32>
    %cst_58 = arith.constant dense<0xFF800000> : vector<4x16xf32>
    %205 = vector.multi_reduction <maximumf>, %204, %cst_58 [2] : vector<4x16x16xf32> to vector<4x16xf32>
    %206 = vector.shape_cast %205 : vector<4x16xf32> to vector<4x16x1xf32>
    %207 = vector.broadcast %206 : vector<4x16x1xf32> to vector<4x16x16xf32>
    %208 = arith.subf %204, %207 : vector<4x16x16xf32>
    %209 = math.exp %208 : vector<4x16x16xf32>
    %cst_59 = arith.constant dense<0.000000e+00> : vector<4x16xf32>
    %210 = vector.multi_reduction <add>, %209, %cst_59 [2] : vector<4x16x16xf32> to vector<4x16xf32>
    %211 = vector.shape_cast %210 : vector<4x16xf32> to vector<4x16x1xf32>
    %212 = tpu.reciprocal %211 {approx = true} : vector<4x16x1xf32> -> vector<4x16x1xf32>
    %213 = vector.broadcast %212 : vector<4x16x1xf32> to vector<4x16x16xf32>
    %214 = arith.mulf %209, %213 : vector<4x16x16xf32>
    "tpu.trace_start"() <{level = 10 : i32, message = "hnm,hdm->hnd"}> : () -> ()
    %cst_60 = arith.constant dense<0.000000e+00> : vector<4x16x8xf32>
    %215 = tpu.matmul %214, %200, %cst_60 {dimension_numbers = #tpu.dot_dimension_numbers<[2], [2], [1], [1], [0, 0, 0, 1, 1, 1], [0], [0]>} : vector<4x16x16xf32>, vector<4x8x16xf32>, vector<4x16x8xf32> -> vector<4x16x8xf32>
    "tpu.trace_stop"() : () -> ()
    %216 = tpu.transpose %215, [0, 2, 1] : vector<4x16x8xf32> -> vector<4x8x16xf32>
    %217 = vector.shape_cast %216 : vector<4x8x16xf32> to vector<32x16xf32>
    %218 = tpu.concatenate %217, %192 in 0 : vector<32x16xf32>, vector<1x16xf32> -> vector<33x16xf32>
    %cst_61 = arith.constant dense<0.000000e+00> : vector<32x16xf32>
    %219 = tpu.matmul %188, %218, %cst_61 {dimension_numbers = #tpu.dot_dimension_numbers<[1], [0], [0], [1], [0, 0, 1, 1], [], []>} : vector<32x33xf32>, vector<33x16xf32>, vector<32x16xf32> -> vector<32x16xf32>
    %220 = arith.addf %191, %219 : vector<32x16xf32>
    %221 = arith.addf %220, %184 : vector<32x16xf32>
    %cst_62 = arith.constant 0.000000e+00 : f32
    %222 = vector.broadcast %cst_62 : f32 to vector<32x5xf32>
    %223 = tpu.concatenate %222, %221, %222 in 1 : vector<32x5xf32>, vector<32x16xf32>, vector<32x5xf32> -> vector<32x26xf32>
    %224 = tpu.iota {dimensions = array<i32: 1>} : vector<1x16xi32>
    %c4_i32 = arith.constant 4 : i32
    %c0_i32_63 = arith.constant 0 : i32
    %225 = arith.cmpi eq, %c4_i32, %c0_i32_63 : i32
    %c1_i32_64 = arith.constant 1 : i32
    %226 = arith.select %225, %c1_i32_64, %c4_i32 : i32
    %227 = vector.broadcast %226 : i32 to vector<1x16xi32>
    %228 = arith.remsi %224, %227 : vector<1x16xi32>
    %c0_i32_65 = arith.constant 0 : i32
    %229 = vector.broadcast %c0_i32_65 : i32 to vector<1x16xi32>
    %230 = arith.cmpi ne, %228, %229 : vector<1x16xi32>
    %c0_i32_66 = arith.constant 0 : i32
    %231 = vector.broadcast %c0_i32_66 : i32 to vector<1x16xi32>
    %232 = arith.cmpi slt, %228, %231 : vector<1x16xi32>
    %c0_i32_67 = arith.constant 0 : i32
    %233 = arith.cmpi slt, %226, %c0_i32_67 : i32
    %234 = vector.broadcast %233 : i1 to vector<1x16xi1>
    %235 = vector.broadcast %234 : vector<1x16xi1> to vector<1x16xi1>
    %236 = arith.xori %232, %235 : vector<1x16xi1>
    %237 = arith.andi %236, %230 : vector<1x16xi1>
    %238 = vector.broadcast %226 : i32 to vector<1x16xi32>
    %239 = arith.addi %228, %238 : vector<1x16xi32>
    %240 = arith.select %237, %239, %228 : vector<1x16xi1>, vector<1x16xi32>
    %c0_i32_68 = arith.constant 0 : i32
    %241 = vector.broadcast %c0_i32_68 : i32 to vector<1x16xi32>
    %242 = arith.cmpi ne, %240, %241 : vector<1x16xi32>
    %243 = arith.extui %242 : vector<1x16xi1> to vector<1x16xi32>
    %244 = arith.sitofp %243 : vector<1x16xi32> to vector<1x16xf32>
    %c3_i32 = arith.constant 3 : i32
    %245 = vector.broadcast %c3_i32 : i32 to vector<1x16xi32>
    %246 = arith.cmpi ne, %240, %245 : vector<1x16xi32>
    %247 = arith.extui %246 : vector<1x16xi1> to vector<1x16xi32>
    %248 = arith.sitofp %247 : vector<1x16xi32> to vector<1x16xf32>
    %cst_69 = arith.constant 1.000000e+00 : f32
    %249 = vector.broadcast %cst_69 : f32 to vector<1x16xf32>
    %250 = vector.extract_strided_slice %223 {offsets = [0, 0], sizes = [32, 16], strides = [1, 1]} : vector<32x26xf32> to vector<32x16xf32>
    %251 = vector.broadcast %244 : vector<1x16xf32> to vector<32x16xf32>
    %252 = arith.mulf %250, %251 : vector<32x16xf32>
    %253 = vector.extract_strided_slice %223 {offsets = [0, 1], sizes = [32, 16], strides = [1, 1]} : vector<32x26xf32> to vector<32x16xf32>
    %254 = vector.extract_strided_slice %223 {offsets = [0, 4], sizes = [32, 16], strides = [1, 1]} : vector<32x26xf32> to vector<32x16xf32>
    %255 = vector.broadcast %244 : vector<1x16xf32> to vector<32x16xf32>
    %256 = arith.mulf %254, %255 : vector<32x16xf32>
    %257 = vector.extract_strided_slice %223 {offsets = [0, 5], sizes = [32, 16], strides = [1, 1]} : vector<32x26xf32> to vector<32x16xf32>
    %258 = tpu.concatenate %252, %253, %256, %257, %249 in 0 : vector<32x16xf32>, vector<32x16xf32>, vector<32x16xf32>, vector<32x16xf32>, vector<1x16xf32> -> vector<129x16xf32>
    %c0_70 = arith.constant 0 : index
    %c0_71 = arith.constant 0 : index
    %c0_72 = arith.constant 0 : index
    %c0_73 = arith.constant 0 : index
    %259 = vector.load %arg9[%c0_70, %c0_71, %c0_72, %c0_73] : memref<1x4x16x129xf32, #tpu.memory_space<vmem>>, vector<1x1x16x129xf32>
    %260 = vector.shape_cast %259 : vector<1x1x16x129xf32> to vector<16x129xf32>
    %cst_74 = arith.constant dense<0.000000e+00> : vector<16x16xf32>
    %261 = tpu.matmul %260, %258, %cst_74 {dimension_numbers = #tpu.dot_dimension_numbers<[1], [0], [0], [1], [0, 0, 1, 1], [], []>} : vector<16x129xf32>, vector<129x16xf32>, vector<16x16xf32> -> vector<16x16xf32>
    %c0_75 = arith.constant 0 : index
    %c0_76 = arith.constant 0 : index
    %c0_77 = arith.constant 0 : index
    %262 = vector.load %arg14[%c0_75, %c0_76, %c0_77] : memref<4x16x64xf32, #tpu.memory_space<vmem>>, vector<1x16x64xf32>
    %263 = vector.shape_cast %262 : vector<1x16x64xf32> to vector<16x64xf32>
    %cst_78 = arith.constant dense<0.000000e+00> : vector<16x64xf32>
    %264 = tpu.matmul %261, %263, %cst_78 {dimension_numbers = #tpu.dot_dimension_numbers<[1], [0], [0], [1], [0, 0, 1, 1], [], []>} : vector<16x16xf32>, vector<16x64xf32>, vector<16x64xf32> -> vector<16x64xf32>
    %265 = vector.extract_strided_slice %223 {offsets = [0, 1], sizes = [32, 16], strides = [1, 1]} : vector<32x26xf32> to vector<32x16xf32>
    %266 = vector.extract_strided_slice %223 {offsets = [0, 2], sizes = [32, 16], strides = [1, 1]} : vector<32x26xf32> to vector<32x16xf32>
    %267 = vector.broadcast %248 : vector<1x16xf32> to vector<32x16xf32>
    %268 = arith.mulf %266, %267 : vector<32x16xf32>
    %269 = vector.extract_strided_slice %223 {offsets = [0, 5], sizes = [32, 16], strides = [1, 1]} : vector<32x26xf32> to vector<32x16xf32>
    %270 = vector.extract_strided_slice %223 {offsets = [0, 6], sizes = [32, 16], strides = [1, 1]} : vector<32x26xf32> to vector<32x16xf32>
    %271 = vector.broadcast %248 : vector<1x16xf32> to vector<32x16xf32>
    %272 = arith.mulf %270, %271 : vector<32x16xf32>
    %273 = tpu.concatenate %265, %268, %269, %272, %249 in 0 : vector<32x16xf32>, vector<32x16xf32>, vector<32x16xf32>, vector<32x16xf32>, vector<1x16xf32> -> vector<129x16xf32>
    %c0_79 = arith.constant 0 : index
    %c1 = arith.constant 1 : index
    %c0_80 = arith.constant 0 : index
    %c0_81 = arith.constant 0 : index
    %274 = vector.load %arg9[%c0_79, %c1, %c0_80, %c0_81] : memref<1x4x16x129xf32, #tpu.memory_space<vmem>>, vector<1x1x16x129xf32>
    %275 = vector.shape_cast %274 : vector<1x1x16x129xf32> to vector<16x129xf32>
    %cst_82 = arith.constant dense<0.000000e+00> : vector<16x16xf32>
    %276 = tpu.matmul %275, %273, %cst_82 {dimension_numbers = #tpu.dot_dimension_numbers<[1], [0], [0], [1], [0, 0, 1, 1], [], []>} : vector<16x129xf32>, vector<129x16xf32>, vector<16x16xf32> -> vector<16x16xf32>
    %c1_83 = arith.constant 1 : index
    %c0_84 = arith.constant 0 : index
    %c0_85 = arith.constant 0 : index
    %277 = vector.load %arg14[%c1_83, %c0_84, %c0_85] : memref<4x16x64xf32, #tpu.memory_space<vmem>>, vector<1x16x64xf32>
    %278 = vector.shape_cast %277 : vector<1x16x64xf32> to vector<16x64xf32>
    %cst_86 = arith.constant dense<0.000000e+00> : vector<16x64xf32>
    %279 = tpu.matmul %276, %278, %cst_86 {dimension_numbers = #tpu.dot_dimension_numbers<[1], [0], [0], [1], [0, 0, 1, 1], [], []>} : vector<16x16xf32>, vector<16x64xf32>, vector<16x64xf32> -> vector<16x64xf32>
    %280 = arith.addf %264, %279 : vector<16x64xf32>
    %281 = vector.extract_strided_slice %223 {offsets = [0, 4], sizes = [32, 16], strides = [1, 1]} : vector<32x26xf32> to vector<32x16xf32>
    %282 = vector.broadcast %244 : vector<1x16xf32> to vector<32x16xf32>
    %283 = arith.mulf %281, %282 : vector<32x16xf32>
    %284 = vector.extract_strided_slice %223 {offsets = [0, 5], sizes = [32, 16], strides = [1, 1]} : vector<32x26xf32> to vector<32x16xf32>
    %285 = vector.extract_strided_slice %223 {offsets = [0, 8], sizes = [32, 16], strides = [1, 1]} : vector<32x26xf32> to vector<32x16xf32>
    %286 = vector.broadcast %244 : vector<1x16xf32> to vector<32x16xf32>
    %287 = arith.mulf %285, %286 : vector<32x16xf32>
    %288 = vector.extract_strided_slice %223 {offsets = [0, 9], sizes = [32, 16], strides = [1, 1]} : vector<32x26xf32> to vector<32x16xf32>
    %289 = tpu.concatenate %283, %284, %287, %288, %249 in 0 : vector<32x16xf32>, vector<32x16xf32>, vector<32x16xf32>, vector<32x16xf32>, vector<1x16xf32> -> vector<129x16xf32>
    %c0_87 = arith.constant 0 : index
    %c2 = arith.constant 2 : index
    %c0_88 = arith.constant 0 : index
    %c0_89 = arith.constant 0 : index
    %290 = vector.load %arg9[%c0_87, %c2, %c0_88, %c0_89] : memref<1x4x16x129xf32, #tpu.memory_space<vmem>>, vector<1x1x16x129xf32>
    %291 = vector.shape_cast %290 : vector<1x1x16x129xf32> to vector<16x129xf32>
    %cst_90 = arith.constant dense<0.000000e+00> : vector<16x16xf32>
    %292 = tpu.matmul %291, %289, %cst_90 {dimension_numbers = #tpu.dot_dimension_numbers<[1], [0], [0], [1], [0, 0, 1, 1], [], []>} : vector<16x129xf32>, vector<129x16xf32>, vector<16x16xf32> -> vector<16x16xf32>
    %c2_91 = arith.constant 2 : index
    %c0_92 = arith.constant 0 : index
    %c0_93 = arith.constant 0 : index
    %293 = vector.load %arg14[%c2_91, %c0_92, %c0_93] : memref<4x16x64xf32, #tpu.memory_space<vmem>>, vector<1x16x64xf32>
    %294 = vector.shape_cast %293 : vector<1x16x64xf32> to vector<16x64xf32>
    %cst_94 = arith.constant dense<0.000000e+00> : vector<16x64xf32>
    %295 = tpu.matmul %292, %294, %cst_94 {dimension_numbers = #tpu.dot_dimension_numbers<[1], [0], [0], [1], [0, 0, 1, 1], [], []>} : vector<16x16xf32>, vector<16x64xf32>, vector<16x64xf32> -> vector<16x64xf32>
    %296 = arith.addf %280, %295 : vector<16x64xf32>
    %297 = vector.extract_strided_slice %223 {offsets = [0, 5], sizes = [32, 16], strides = [1, 1]} : vector<32x26xf32> to vector<32x16xf32>
    %298 = vector.extract_strided_slice %223 {offsets = [0, 6], sizes = [32, 16], strides = [1, 1]} : vector<32x26xf32> to vector<32x16xf32>
    %299 = vector.broadcast %248 : vector<1x16xf32> to vector<32x16xf32>
    %300 = arith.mulf %298, %299 : vector<32x16xf32>
    %301 = vector.extract_strided_slice %223 {offsets = [0, 9], sizes = [32, 16], strides = [1, 1]} : vector<32x26xf32> to vector<32x16xf32>
    %302 = vector.extract_strided_slice %223 {offsets = [0, 10], sizes = [32, 16], strides = [1, 1]} : vector<32x26xf32> to vector<32x16xf32>
    %303 = vector.broadcast %248 : vector<1x16xf32> to vector<32x16xf32>
    %304 = arith.mulf %302, %303 : vector<32x16xf32>
    %305 = tpu.concatenate %297, %300, %301, %304, %249 in 0 : vector<32x16xf32>, vector<32x16xf32>, vector<32x16xf32>, vector<32x16xf32>, vector<1x16xf32> -> vector<129x16xf32>
    %c0_95 = arith.constant 0 : index
    %c3 = arith.constant 3 : index
    %c0_96 = arith.constant 0 : index
    %c0_97 = arith.constant 0 : index
    %306 = vector.load %arg9[%c0_95, %c3, %c0_96, %c0_97] : memref<1x4x16x129xf32, #tpu.memory_space<vmem>>, vector<1x1x16x129xf32>
    %307 = vector.shape_cast %306 : vector<1x1x16x129xf32> to vector<16x129xf32>
    %cst_98 = arith.constant dense<0.000000e+00> : vector<16x16xf32>
    %308 = tpu.matmul %307, %305, %cst_98 {dimension_numbers = #tpu.dot_dimension_numbers<[1], [0], [0], [1], [0, 0, 1, 1], [], []>} : vector<16x129xf32>, vector<129x16xf32>, vector<16x16xf32> -> vector<16x16xf32>
    %c3_99 = arith.constant 3 : index
    %c0_100 = arith.constant 0 : index
    %c0_101 = arith.constant 0 : index
    %309 = vector.load %arg14[%c3_99, %c0_100, %c0_101] : memref<4x16x64xf32, #tpu.memory_space<vmem>>, vector<1x16x64xf32>
    %310 = vector.shape_cast %309 : vector<1x16x64xf32> to vector<16x64xf32>
    %cst_102 = arith.constant dense<0.000000e+00> : vector<16x64xf32>
    %311 = tpu.matmul %308, %310, %cst_102 {dimension_numbers = #tpu.dot_dimension_numbers<[1], [0], [0], [1], [0, 0, 1, 1], [], []>} : vector<16x16xf32>, vector<16x64xf32>, vector<16x64xf32> -> vector<16x64xf32>
    %312 = arith.addf %296, %311 : vector<16x64xf32>
    %313 = math.tanh %312 : vector<16x64xf32>
    %314 = arith.addf %313, %119 : vector<16x64xf32>
    %cst_103 = arith.constant 0.000000e+00 : f32
    %315 = vector.broadcast %cst_103 : f32 to vector<16x9xf32>
    %316 = tpu.concatenate %315, %314, %315 in 1 : vector<16x9xf32>, vector<16x64xf32>, vector<16x9xf32> -> vector<16x82xf32>
    %317 = tpu.iota {dimensions = array<i32: 1>} : vector<1x64xi32>
    %c8_i32_104 = arith.constant 8 : i32
    %c0_i32_105 = arith.constant 0 : i32
    %318 = arith.cmpi eq, %c8_i32_104, %c0_i32_105 : i32
    %c1_i32_106 = arith.constant 1 : i32
    %319 = arith.select %318, %c1_i32_106, %c8_i32_104 : i32
    %320 = vector.broadcast %319 : i32 to vector<1x64xi32>
    %321 = arith.remsi %317, %320 : vector<1x64xi32>
    %c0_i32_107 = arith.constant 0 : i32
    %322 = vector.broadcast %c0_i32_107 : i32 to vector<1x64xi32>
    %323 = arith.cmpi ne, %321, %322 : vector<1x64xi32>
    %c0_i32_108 = arith.constant 0 : i32
    %324 = vector.broadcast %c0_i32_108 : i32 to vector<1x64xi32>
    %325 = arith.cmpi slt, %321, %324 : vector<1x64xi32>
    %c0_i32_109 = arith.constant 0 : i32
    %326 = arith.cmpi slt, %319, %c0_i32_109 : i32
    %327 = vector.broadcast %326 : i1 to vector<1x64xi1>
    %328 = vector.broadcast %327 : vector<1x64xi1> to vector<1x64xi1>
    %329 = arith.xori %325, %328 : vector<1x64xi1>
    %330 = arith.andi %329, %323 : vector<1x64xi1>
    %331 = vector.broadcast %319 : i32 to vector<1x64xi32>
    %332 = arith.addi %321, %331 : vector<1x64xi32>
    %333 = arith.select %330, %332, %321 : vector<1x64xi1>, vector<1x64xi32>
    %c0_i32_110 = arith.constant 0 : i32
    %334 = vector.broadcast %c0_i32_110 : i32 to vector<1x64xi32>
    %335 = arith.cmpi ne, %333, %334 : vector<1x64xi32>
    %336 = arith.extui %335 : vector<1x64xi1> to vector<1x64xi32>
    %337 = arith.sitofp %336 : vector<1x64xi32> to vector<1x64xf32>
    %c7_i32_111 = arith.constant 7 : i32
    %338 = vector.broadcast %c7_i32_111 : i32 to vector<1x64xi32>
    %339 = arith.cmpi ne, %333, %338 : vector<1x64xi32>
    %340 = arith.extui %339 : vector<1x64xi1> to vector<1x64xi32>
    %341 = arith.sitofp %340 : vector<1x64xi32> to vector<1x64xf32>
    %cst_112 = arith.constant 1.000000e+00 : f32
    %342 = vector.broadcast %cst_112 : f32 to vector<1x64xf32>
    %343 = vector.extract_strided_slice %316 {offsets = [0, 0], sizes = [16, 64], strides = [1, 1]} : vector<16x82xf32> to vector<16x64xf32>
    %344 = vector.broadcast %337 : vector<1x64xf32> to vector<16x64xf32>
    %345 = arith.mulf %343, %344 : vector<16x64xf32>
    %346 = vector.extract_strided_slice %316 {offsets = [0, 1], sizes = [16, 64], strides = [1, 1]} : vector<16x82xf32> to vector<16x64xf32>
    %347 = vector.extract_strided_slice %316 {offsets = [0, 8], sizes = [16, 64], strides = [1, 1]} : vector<16x82xf32> to vector<16x64xf32>
    %348 = vector.broadcast %337 : vector<1x64xf32> to vector<16x64xf32>
    %349 = arith.mulf %347, %348 : vector<16x64xf32>
    %350 = vector.extract_strided_slice %316 {offsets = [0, 9], sizes = [16, 64], strides = [1, 1]} : vector<16x82xf32> to vector<16x64xf32>
    %351 = tpu.concatenate %345, %346, %349, %350, %342 in 0 : vector<16x64xf32>, vector<16x64xf32>, vector<16x64xf32>, vector<16x64xf32>, vector<1x64xf32> -> vector<65x64xf32>
    %c0_113 = arith.constant 0 : index
    %c0_114 = arith.constant 0 : index
    %c0_115 = arith.constant 0 : index
    %c0_116 = arith.constant 0 : index
    %352 = vector.load %arg10[%c0_113, %c0_114, %c0_115, %c0_116] : memref<1x4x8x65xf32, #tpu.memory_space<vmem>>, vector<1x1x8x65xf32>
    %353 = vector.shape_cast %352 : vector<1x1x8x65xf32> to vector<8x65xf32>
    %cst_117 = arith.constant dense<0.000000e+00> : vector<8x64xf32>
    %354 = tpu.matmul %353, %351, %cst_117 {dimension_numbers = #tpu.dot_dimension_numbers<[1], [0], [0], [1], [0, 0, 1, 1], [], []>} : vector<8x65xf32>, vector<65x64xf32>, vector<8x64xf32> -> vector<8x64xf32>
    %c0_118 = arith.constant 0 : index
    %c0_119 = arith.constant 0 : index
    %c0_120 = arith.constant 0 : index
    %355 = vector.load %arg15[%c0_118, %c0_119, %c0_120] : memref<4x64x256xf32, #tpu.memory_space<vmem>>, vector<1x64x256xf32>
    %356 = vector.shape_cast %355 : vector<1x64x256xf32> to vector<64x256xf32>
    %cst_121 = arith.constant dense<0.000000e+00> : vector<8x256xf32>
    %357 = tpu.matmul %354, %356, %cst_121 {dimension_numbers = #tpu.dot_dimension_numbers<[1], [0], [0], [1], [0, 0, 1, 1], [], []>} : vector<8x64xf32>, vector<64x256xf32>, vector<8x256xf32> -> vector<8x256xf32>
    %358 = vector.extract_strided_slice %316 {offsets = [0, 1], sizes = [16, 64], strides = [1, 1]} : vector<16x82xf32> to vector<16x64xf32>
    %359 = vector.extract_strided_slice %316 {offsets = [0, 2], sizes = [16, 64], strides = [1, 1]} : vector<16x82xf32> to vector<16x64xf32>
    %360 = vector.broadcast %341 : vector<1x64xf32> to vector<16x64xf32>
    %361 = arith.mulf %359, %360 : vector<16x64xf32>
    %362 = vector.extract_strided_slice %316 {offsets = [0, 9], sizes = [16, 64], strides = [1, 1]} : vector<16x82xf32> to vector<16x64xf32>
    %363 = vector.extract_strided_slice %316 {offsets = [0, 10], sizes = [16, 64], strides = [1, 1]} : vector<16x82xf32> to vector<16x64xf32>
    %364 = vector.broadcast %341 : vector<1x64xf32> to vector<16x64xf32>
    %365 = arith.mulf %363, %364 : vector<16x64xf32>
    %366 = tpu.concatenate %358, %361, %362, %365, %342 in 0 : vector<16x64xf32>, vector<16x64xf32>, vector<16x64xf32>, vector<16x64xf32>, vector<1x64xf32> -> vector<65x64xf32>
    %c0_122 = arith.constant 0 : index
    %c1_123 = arith.constant 1 : index
    %c0_124 = arith.constant 0 : index
    %c0_125 = arith.constant 0 : index
    %367 = vector.load %arg10[%c0_122, %c1_123, %c0_124, %c0_125] : memref<1x4x8x65xf32, #tpu.memory_space<vmem>>, vector<1x1x8x65xf32>
    %368 = vector.shape_cast %367 : vector<1x1x8x65xf32> to vector<8x65xf32>
    %cst_126 = arith.constant dense<0.000000e+00> : vector<8x64xf32>
    %369 = tpu.matmul %368, %366, %cst_126 {dimension_numbers = #tpu.dot_dimension_numbers<[1], [0], [0], [1], [0, 0, 1, 1], [], []>} : vector<8x65xf32>, vector<65x64xf32>, vector<8x64xf32> -> vector<8x64xf32>
    %c1_127 = arith.constant 1 : index
    %c0_128 = arith.constant 0 : index
    %c0_129 = arith.constant 0 : index
    %370 = vector.load %arg15[%c1_127, %c0_128, %c0_129] : memref<4x64x256xf32, #tpu.memory_space<vmem>>, vector<1x64x256xf32>
    %371 = vector.shape_cast %370 : vector<1x64x256xf32> to vector<64x256xf32>
    %cst_130 = arith.constant dense<0.000000e+00> : vector<8x256xf32>
    %372 = tpu.matmul %369, %371, %cst_130 {dimension_numbers = #tpu.dot_dimension_numbers<[1], [0], [0], [1], [0, 0, 1, 1], [], []>} : vector<8x64xf32>, vector<64x256xf32>, vector<8x256xf32> -> vector<8x256xf32>
    %373 = arith.addf %357, %372 : vector<8x256xf32>
    %374 = vector.extract_strided_slice %316 {offsets = [0, 8], sizes = [16, 64], strides = [1, 1]} : vector<16x82xf32> to vector<16x64xf32>
    %375 = vector.broadcast %337 : vector<1x64xf32> to vector<16x64xf32>
    %376 = arith.mulf %374, %375 : vector<16x64xf32>
    %377 = vector.extract_strided_slice %316 {offsets = [0, 9], sizes = [16, 64], strides = [1, 1]} : vector<16x82xf32> to vector<16x64xf32>
    %378 = vector.extract_strided_slice %316 {offsets = [0, 16], sizes = [16, 64], strides = [1, 1]} : vector<16x82xf32> to vector<16x64xf32>
    %379 = vector.broadcast %337 : vector<1x64xf32> to vector<16x64xf32>
    %380 = arith.mulf %378, %379 : vector<16x64xf32>
    %381 = vector.extract_strided_slice %316 {offsets = [0, 17], sizes = [16, 64], strides = [1, 1]} : vector<16x82xf32> to vector<16x64xf32>
    %382 = tpu.concatenate %376, %377, %380, %381, %342 in 0 : vector<16x64xf32>, vector<16x64xf32>, vector<16x64xf32>, vector<16x64xf32>, vector<1x64xf32> -> vector<65x64xf32>
    %c0_131 = arith.constant 0 : index
    %c2_132 = arith.constant 2 : index
    %c0_133 = arith.constant 0 : index
    %c0_134 = arith.constant 0 : index
    %383 = vector.load %arg10[%c0_131, %c2_132, %c0_133, %c0_134] : memref<1x4x8x65xf32, #tpu.memory_space<vmem>>, vector<1x1x8x65xf32>
    %384 = vector.shape_cast %383 : vector<1x1x8x65xf32> to vector<8x65xf32>
    %cst_135 = arith.constant dense<0.000000e+00> : vector<8x64xf32>
    %385 = tpu.matmul %384, %382, %cst_135 {dimension_numbers = #tpu.dot_dimension_numbers<[1], [0], [0], [1], [0, 0, 1, 1], [], []>} : vector<8x65xf32>, vector<65x64xf32>, vector<8x64xf32> -> vector<8x64xf32>
    %c2_136 = arith.constant 2 : index
    %c0_137 = arith.constant 0 : index
    %c0_138 = arith.constant 0 : index
    %386 = vector.load %arg15[%c2_136, %c0_137, %c0_138] : memref<4x64x256xf32, #tpu.memory_space<vmem>>, vector<1x64x256xf32>
    %387 = vector.shape_cast %386 : vector<1x64x256xf32> to vector<64x256xf32>
    %cst_139 = arith.constant dense<0.000000e+00> : vector<8x256xf32>
    %388 = tpu.matmul %385, %387, %cst_139 {dimension_numbers = #tpu.dot_dimension_numbers<[1], [0], [0], [1], [0, 0, 1, 1], [], []>} : vector<8x64xf32>, vector<64x256xf32>, vector<8x256xf32> -> vector<8x256xf32>
    %389 = arith.addf %373, %388 : vector<8x256xf32>
    %390 = vector.extract_strided_slice %316 {offsets = [0, 9], sizes = [16, 64], strides = [1, 1]} : vector<16x82xf32> to vector<16x64xf32>
    %391 = vector.extract_strided_slice %316 {offsets = [0, 10], sizes = [16, 64], strides = [1, 1]} : vector<16x82xf32> to vector<16x64xf32>
    %392 = vector.broadcast %341 : vector<1x64xf32> to vector<16x64xf32>
    %393 = arith.mulf %391, %392 : vector<16x64xf32>
    %394 = vector.extract_strided_slice %316 {offsets = [0, 17], sizes = [16, 64], strides = [1, 1]} : vector<16x82xf32> to vector<16x64xf32>
    %395 = vector.extract_strided_slice %316 {offsets = [0, 18], sizes = [16, 64], strides = [1, 1]} : vector<16x82xf32> to vector<16x64xf32>
    %396 = vector.broadcast %341 : vector<1x64xf32> to vector<16x64xf32>
    %397 = arith.mulf %395, %396 : vector<16x64xf32>
    %398 = tpu.concatenate %390, %393, %394, %397, %342 in 0 : vector<16x64xf32>, vector<16x64xf32>, vector<16x64xf32>, vector<16x64xf32>, vector<1x64xf32> -> vector<65x64xf32>
    %c0_140 = arith.constant 0 : index
    %c3_141 = arith.constant 3 : index
    %c0_142 = arith.constant 0 : index
    %c0_143 = arith.constant 0 : index
    %399 = vector.load %arg10[%c0_140, %c3_141, %c0_142, %c0_143] : memref<1x4x8x65xf32, #tpu.memory_space<vmem>>, vector<1x1x8x65xf32>
    %400 = vector.shape_cast %399 : vector<1x1x8x65xf32> to vector<8x65xf32>
    %cst_144 = arith.constant dense<0.000000e+00> : vector<8x64xf32>
    %401 = tpu.matmul %400, %398, %cst_144 {dimension_numbers = #tpu.dot_dimension_numbers<[1], [0], [0], [1], [0, 0, 1, 1], [], []>} : vector<8x65xf32>, vector<65x64xf32>, vector<8x64xf32> -> vector<8x64xf32>
    %c3_145 = arith.constant 3 : index
    %c0_146 = arith.constant 0 : index
    %c0_147 = arith.constant 0 : index
    %402 = vector.load %arg15[%c3_145, %c0_146, %c0_147] : memref<4x64x256xf32, #tpu.memory_space<vmem>>, vector<1x64x256xf32>
    %403 = vector.shape_cast %402 : vector<1x64x256xf32> to vector<64x256xf32>
    %cst_148 = arith.constant dense<0.000000e+00> : vector<8x256xf32>
    %404 = tpu.matmul %401, %403, %cst_148 {dimension_numbers = #tpu.dot_dimension_numbers<[1], [0], [0], [1], [0, 0, 1, 1], [], []>} : vector<8x64xf32>, vector<64x256xf32>, vector<8x256xf32> -> vector<8x256xf32>
    %405 = arith.addf %389, %404 : vector<8x256xf32>
    %406 = math.tanh %405 : vector<8x256xf32>
    %c0_149 = arith.constant 0 : index
    %c0_150 = arith.constant 0 : index
    %c0_151 = arith.constant 0 : index
    %407 = vector.load %arg11[%c0_149, %c0_150, %c0_151] : memref<1x4x73xf32, #tpu.memory_space<vmem>>, vector<1x4x73xf32>
    %408 = vector.shape_cast %407 : vector<1x4x73xf32> to vector<4x73xf32>
    %cst_152 = arith.constant 0.000000e+00 : f32
    %409 = vector.broadcast %cst_152 : f32 to vector<8x17xf32>
    %410 = tpu.concatenate %409, %406, %409 in 1 : vector<8x17xf32>, vector<8x256xf32>, vector<8x17xf32> -> vector<8x290xf32>
    %411 = tpu.iota {dimensions = array<i32: 1>} : vector<1x256xi32>
    %c16_i32_153 = arith.constant 16 : i32
    %c0_i32_154 = arith.constant 0 : i32
    %412 = arith.cmpi eq, %c16_i32_153, %c0_i32_154 : i32
    %c1_i32_155 = arith.constant 1 : i32
    %413 = arith.select %412, %c1_i32_155, %c16_i32_153 : i32
    %414 = vector.broadcast %413 : i32 to vector<1x256xi32>
    %415 = arith.remsi %411, %414 : vector<1x256xi32>
    %c0_i32_156 = arith.constant 0 : i32
    %416 = vector.broadcast %c0_i32_156 : i32 to vector<1x256xi32>
    %417 = arith.cmpi ne, %415, %416 : vector<1x256xi32>
    %c0_i32_157 = arith.constant 0 : i32
    %418 = vector.broadcast %c0_i32_157 : i32 to vector<1x256xi32>
    %419 = arith.cmpi slt, %415, %418 : vector<1x256xi32>
    %c0_i32_158 = arith.constant 0 : i32
    %420 = arith.cmpi slt, %413, %c0_i32_158 : i32
    %421 = vector.broadcast %420 : i1 to vector<1x256xi1>
    %422 = vector.broadcast %421 : vector<1x256xi1> to vector<1x256xi1>
    %423 = arith.xori %419, %422 : vector<1x256xi1>
    %424 = arith.andi %423, %417 : vector<1x256xi1>
    %425 = vector.broadcast %413 : i32 to vector<1x256xi32>
    %426 = arith.addi %415, %425 : vector<1x256xi32>
    %427 = arith.select %424, %426, %415 : vector<1x256xi1>, vector<1x256xi32>
    %c0_i32_159 = arith.constant 0 : i32
    %428 = vector.broadcast %c0_i32_159 : i32 to vector<1x256xi32>
    %429 = arith.cmpi ne, %427, %428 : vector<1x256xi32>
    %430 = arith.extui %429 : vector<1x256xi1> to vector<1x256xi32>
    %431 = arith.sitofp %430 : vector<1x256xi32> to vector<1x256xf32>
    %c15_i32_160 = arith.constant 15 : i32
    %432 = vector.broadcast %c15_i32_160 : i32 to vector<1x256xi32>
    %433 = arith.cmpi ne, %427, %432 : vector<1x256xi32>
    %434 = arith.extui %433 : vector<1x256xi1> to vector<1x256xi32>
    %435 = arith.sitofp %434 : vector<1x256xi32> to vector<1x256xf32>
    %436 = vector.extract_strided_slice %410 {offsets = [0, 0], sizes = [8, 256], strides = [1, 1]} : vector<8x290xf32> to vector<8x256xf32>
    %437 = vector.broadcast %431 : vector<1x256xf32> to vector<8x256xf32>
    %438 = arith.mulf %436, %437 : vector<8x256xf32>
    %439 = vector.extract_strided_slice %410 {offsets = [0, 1], sizes = [8, 256], strides = [1, 1]} : vector<8x290xf32> to vector<8x256xf32>
    %440 = vector.extract_strided_slice %410 {offsets = [0, 2], sizes = [8, 256], strides = [1, 1]} : vector<8x290xf32> to vector<8x256xf32>
    %441 = vector.broadcast %435 : vector<1x256xf32> to vector<8x256xf32>
    %442 = arith.mulf %440, %441 : vector<8x256xf32>
    %443 = vector.extract_strided_slice %410 {offsets = [0, 16], sizes = [8, 256], strides = [1, 1]} : vector<8x290xf32> to vector<8x256xf32>
    %444 = vector.broadcast %431 : vector<1x256xf32> to vector<8x256xf32>
    %445 = arith.mulf %443, %444 : vector<8x256xf32>
    %446 = vector.extract_strided_slice %410 {offsets = [0, 17], sizes = [8, 256], strides = [1, 1]} : vector<8x290xf32> to vector<8x256xf32>
    %447 = vector.extract_strided_slice %410 {offsets = [0, 18], sizes = [8, 256], strides = [1, 1]} : vector<8x290xf32> to vector<8x256xf32>
    %448 = vector.broadcast %435 : vector<1x256xf32> to vector<8x256xf32>
    %449 = arith.mulf %447, %448 : vector<8x256xf32>
    %450 = vector.extract_strided_slice %410 {offsets = [0, 32], sizes = [8, 256], strides = [1, 1]} : vector<8x290xf32> to vector<8x256xf32>
    %451 = vector.broadcast %431 : vector<1x256xf32> to vector<8x256xf32>
    %452 = arith.mulf %450, %451 : vector<8x256xf32>
    %453 = vector.extract_strided_slice %410 {offsets = [0, 33], sizes = [8, 256], strides = [1, 1]} : vector<8x290xf32> to vector<8x256xf32>
    %454 = vector.extract_strided_slice %410 {offsets = [0, 34], sizes = [8, 256], strides = [1, 1]} : vector<8x290xf32> to vector<8x256xf32>
    %455 = vector.broadcast %435 : vector<1x256xf32> to vector<8x256xf32>
    %456 = arith.mulf %454, %455 : vector<8x256xf32>
    %cst_161 = arith.constant 1.000000e+00 : f32
    %457 = vector.broadcast %cst_161 : f32 to vector<1x256xf32>
    %458 = tpu.concatenate %438, %439, %442, %445, %446, %449, %452, %453, %456, %457 in 0 : vector<8x256xf32>, vector<8x256xf32>, vector<8x256xf32>, vector<8x256xf32>, vector<8x256xf32>, vector<8x256xf32>, vector<8x256xf32>, vector<8x256xf32>, vector<8x256xf32>, vector<1x256xf32> -> vector<73x256xf32>
    %cst_162 = arith.constant dense<0.000000e+00> : vector<4x256xf32>
    %459 = tpu.matmul %408, %458, %cst_162 {dimension_numbers = #tpu.dot_dimension_numbers<[1], [0], [0], [1], [0, 0, 1, 1], [], []>} : vector<4x73xf32>, vector<73x256xf32>, vector<4x256xf32> -> vector<4x256xf32>
    %cst_163 = arith.constant 2.000000e+01 : f32
    %460 = vector.broadcast %cst_163 : f32 to vector<4x256xf32>
    %461 = arith.minimumf %459, %460 : vector<4x256xf32>
    %462 = math.exp %461 : vector<4x256xf32>
    %cst_164 = arith.constant 2.000000e+01 : f32
    %463 = vector.broadcast %cst_164 : f32 to vector<4x256xf32>
    %464 = arith.cmpf ogt, %459, %463 : vector<4x256xf32>
    %cst_165 = arith.constant 1.000000e+00 : f32
    %465 = vector.broadcast %cst_165 : f32 to vector<4x256xf32>
    %466 = arith.addf %465, %462 : vector<4x256xf32>
    %467 = math.log %466 : vector<4x256xf32>
    %468 = arith.select %464, %459, %467 : vector<4x256xi1>, vector<4x256xf32>
    %cst_166 = arith.constant 1.000000e+00 : f32
    %469 = vector.broadcast %cst_166 : f32 to vector<4x256xf32>
    %470 = arith.addf %468, %469 : vector<4x256xf32>
    %c0_167 = arith.constant 0 : index
    %c0_168 = arith.constant 0 : index
    %c0_169 = arith.constant 0 : index
    %c0_170 = arith.constant 0 : index
    %471 = vector.load %arg16[%c0_167, %c0_168, %c0_169, %c0_170] : memref<1x1x4x256xf32, #tpu.memory_space<vmem>>, vector<1x1x4x256xf32>
    %472 = vector.shape_cast %471 : vector<1x1x4x256xf32> to vector<4x256xf32>
    %473 = vector.shape_cast %470 : vector<4x256xf32> to vector<1x1x4x256xf32>
    tpu.vector_store %arg16[%c0_167, %c0_168, %c0_169, %c0_170], %473 {strides = array<i32>} : memref<1x1x4x256xf32, #tpu.memory_space<vmem>>, vector<1x1x4x256xf32>,
    return
  }
  func.func @transform_0(%arg0: i32, %arg1: i32) -> (i32, i32, i32) {
    %c0_i32 = arith.constant 0 : i32
    %c0_i32_0 = arith.constant 0 : i32
    %c0_i32_1 = arith.constant 0 : i32
    return %arg1, %c0_i32, %c0_i32_0 : i32, i32, i32
  }
  func.func @transform_1(%arg0: i32, %arg1: i32) -> (i32, i32, i32) {
    %c0_i32 = arith.constant 0 : i32
    %c0_i32_0 = arith.constant 0 : i32
    %c0_i32_1 = arith.constant 0 : i32
    return %arg0, %c0_i32, %c0_i32_0 : i32, i32, i32
  }
  func.func @transform_2(%arg0: i32, %arg1: i32) -> (i32, i32, i32) {
    %c0_i32 = arith.constant 0 : i32
    %c0_i32_0 = arith.constant 0 : i32
    %c0_i32_1 = arith.constant 0 : i32
    return %arg0, %c0_i32, %c0_i32_0 : i32, i32, i32
  }
  func.func @transform_3(%arg0: i32, %arg1: i32) -> (i32, i32, i32) {
    %c0_i32 = arith.constant 0 : i32
    %c0_i32_0 = arith.constant 0 : i32
    %c0_i32_1 = arith.constant 0 : i32
    return %arg0, %c0_i32, %c0_i32_0 : i32, i32, i32
  }
  func.func @transform_4(%arg0: i32, %arg1: i32) -> (i32, i32, i32) {
    %c0_i32 = arith.constant 0 : i32
    %c0_i32_0 = arith.constant 0 : i32
    %c0_i32_1 = arith.constant 0 : i32
    return %arg0, %c0_i32, %c0_i32_0 : i32, i32, i32
  }
  func.func @transform_5(%arg0: i32, %arg1: i32) -> (i32, i32, i32) {
    %c0_i32 = arith.constant 0 : i32
    %c0_i32_0 = arith.constant 0 : i32
    %c0_i32_1 = arith.constant 0 : i32
    return %arg0, %c0_i32, %c0_i32_0 : i32, i32, i32
  }
  func.func @transform_6(%arg0: i32, %arg1: i32) -> (i32, i32, i32) {
    %c0_i32 = arith.constant 0 : i32
    %c0_i32_0 = arith.constant 0 : i32
    %c0_i32_1 = arith.constant 0 : i32
    return %arg0, %c0_i32, %c0_i32_0 : i32, i32, i32
  }
  func.func @transform_7(%arg0: i32, %arg1: i32) -> (i32, i32, i32, i32) {
    %c0_i32 = arith.constant 0 : i32
    %c0_i32_0 = arith.constant 0 : i32
    %c0_i32_1 = arith.constant 0 : i32
    %c0_i32_2 = arith.constant 0 : i32
    return %arg0, %c0_i32, %c0_i32_0, %c0_i32_1 : i32, i32, i32, i32
  }
  func.func @transform_8(%arg0: i32, %arg1: i32) -> (i32, i32, i32, i32) {
    %c0_i32 = arith.constant 0 : i32
    %c0_i32_0 = arith.constant 0 : i32
    %c0_i32_1 = arith.constant 0 : i32
    %c0_i32_2 = arith.constant 0 : i32
    return %arg0, %c0_i32, %c0_i32_0, %c0_i32_1 : i32, i32, i32, i32
  }
  func.func @transform_9(%arg0: i32, %arg1: i32) -> (i32, i32, i32) {
    %c0_i32 = arith.constant 0 : i32
    %c0_i32_0 = arith.constant 0 : i32
    %c0_i32_1 = arith.constant 0 : i32
    return %arg0, %c0_i32, %c0_i32_0 : i32, i32, i32
  }
  func.func @transform_10(%arg0: i32, %arg1: i32) -> (i32, i32) {
    %c0_i32 = arith.constant 0 : i32
    %c0_i32_0 = arith.constant 0 : i32
    %c0_i32_1 = arith.constant 0 : i32
    return %c0_i32, %c0_i32_0 : i32, i32
  }
  func.func @transform_11(%arg0: i32, %arg1: i32) -> (i32, i32) {
    %c0_i32 = arith.constant 0 : i32
    %c0_i32_0 = arith.constant 0 : i32
    %c0_i32_1 = arith.constant 0 : i32
    return %c0_i32, %c0_i32_0 : i32, i32
  }
  func.func @transform_12(%arg0: i32, %arg1: i32) -> (i32, i32, i32) {
    %c0_i32 = arith.constant 0 : i32
    %c0_i32_0 = arith.constant 0 : i32
    %c0_i32_1 = arith.constant 0 : i32
    %c0_i32_2 = arith.constant 0 : i32
    return %c0_i32, %c0_i32_0, %c0_i32_1 : i32, i32, i32
  }
  func.func @transform_13(%arg0: i32, %arg1: i32) -> (i32, i32, i32) {
    %c0_i32 = arith.constant 0 : i32
    %c0_i32_0 = arith.constant 0 : i32
    %c0_i32_1 = arith.constant 0 : i32
    %c0_i32_2 = arith.constant 0 : i32
    return %c0_i32, %c0_i32_0, %c0_i32_1 : i32, i32, i32
  }
  func.func @transform_14(%arg0: i32, %arg1: i32) -> (i32, i32, i32, i32) {
    %c0_i32 = arith.constant 0 : i32
    %c0_i32_0 = arith.constant 0 : i32
    %c0_i32_1 = arith.constant 0 : i32
    return %arg0, %arg1, %c0_i32, %c0_i32_0 : i32, i32, i32, i32
  }
}

</mosaic_0001>

<bundles_post_ra>
// kernel: ensemble_forward.3
= control target key start
LH: loop header
LB: loop body
LE: loop exit
PB: predicated region body
PF: predicated region fallthrough
CT: control target
= control target key end

     0   :  { %s639_s12 = smov 0   ;;  %s641_s13 = smov 0   ;;  %s903_s0 = inlined_call_operand.vmem [shape: f32[2,2,4,256], index: 0, kind: input, shape index: {}]   ;;  %s904_s1 = inlined_call_operand.vmem [shape: f32[256,256], index: 1, kind: input, shape index: {}]   ;;  %s905_s2 = inlined_call_operand.vmem [shape: f32[2,2,256], index: 2, kind: output, shape index: {0}]   ;;  %s906_s3 = inlined_call_operand.vmem [shape: f32[2,1,256], index: 3, kind: output, shape index: {1}]  }
   0x1   :  { %s643_s14 = smov 0  }
   0x2 LB: > { %s544_s15 = sadd.s32 4294967295, %s615_s14   ;;  %s656_s16 = sadd.s32 1, %s615_s14   ;;  %s615_s14 = sphi %s643_s14, %s909_s14   ;;  %s611_s13 = sphi %s641_s13, %s908_s13   ;;  %s607_s12 = sphi %s639_s12, %s907_s12  }
   0x3   : > { %s18_s17 = ssub.s32 %s615_s14, %s656_s16  ;;  %s21_s18 = sadd.s32 1, %s611_s13 }
   0x4   : > { %p19_p0 = scmp.eq.s32.totalorder %s18_s17, 0  ;;  %p28_p1 = scmp.ne.s32.totalorder %s611_s13, %s607_s12 }
   0x5   : > { %p29_p2 = scmp.eq.s32.totalorder %s615_s14, 0  ;;  %p547_p4 = scmp.ge.s32.totalorder %s615_s14, 2 }
   0x6   : > { %s665_s19 = scalar_select %p19_p0, %s611_s13, %s21_s18  }
   0x7   : > { %p30_p3 = por %p29_p2, %p28_p1  ;;  %130 = sbr.rel (%p547_p4) target bundleno = 17 (0x11), region = 20 }
   0xc   : > { %133 = sbr.rel (!%p30_p3) target bundleno = 17 (0x11), region = 24  ;;  %s135_s20 = sand.u32 (%p30_p3), 1, %s611_s13  }
   0xd   : > { %s565_s21 = sshll.u32 (%p30_p3), %s615_s14, 3  ;;  %s548_s22 = sshll.u32 (%p30_p3), %s135_s20, 4 }
   0xe   : > { %s140_s25 = scalar_lea.vmem (%p30_p3), %s903_s0, %s565_s21  ;;  %s137_s26 = scalar_lea.vmem (%p30_p3), [#allocation2], %s548_s22 }
   0xf   : > { %v171_v0 = vld [vmem:[%s140_s25] sm:$0xff] (%p30_p3)  ;;  %v173_v1 = vld [vmem:[%s140_s25 + $0x10] sm:$0xff] (%p30_p3) }
  0x10   : > { %172 = vst [vmem:[%s137_s26] sm:$0xff] (%p30_p3), %v171_v0  ;;  %174 = vst [vmem:[%s137_s26 + $0x8] sm:$0xff] (%p30_p3), %v173_v1 }
  0x11 PF: > { %p551_p5 = scmp.ge.s32.totalorder %s615_s14, 1  ;;  %p179_p6 = scmp.lt.s32.totalorder %s615_s14, 3 }
  0x13   : > { %p180_p7 = pnand %p551_p5, %p179_p6 }
  0x14   : > { %s186_s9 = sand.u32 (!%p180_p7), 1, %s607_s12   ;;  %p213_p8 = scmp.lt.s32.totalorder (!%p180_p7), %s544_s15, 1 }
  0x15   : > { %183 = sbr.rel (%p180_p7) target bundleno = 293 (0x125), region = 62  ;;  %s552_s22 = sshll.u32 (!%p180_p7), %s186_s9, 4 }
  0x16   : > { %s188_s7 = scalar_lea.vmem (!%p180_p7), [#allocation2], %s552_s22 }
  0x1a   : > { %v325_v2 = vld [vmem:[%s904_s1 + $0xf8] sm:$0xff]  ;;  %v324_v3 = vld [vmem:[%s904_s1 + $0xf0] sm:$0xff]  ;;  %v323_v4 = vld [vmem:[%s904_s1 + $0xe8] sm:$0xff]  ;;  %vm244_vm0 = vcmask 1041408   ;;  %v617_v34 = vmov 0.0   ;;  %s911_s15 = smov (!%p213_p8, %s544_s15), 1 }
  0x1b   : > { %358 = vmatprep.subr.mxu0 %v325_v2  ;;  %v322_v5 = vld [vmem:[%s904_s1 + $0xe0] sm:$0xff]  ;;  %v321_v6 = vld [vmem:[%s904_s1 + $0xd8] sm:$0xff]  ;;  %v320_v7 = vld [vmem:[%s904_s1 + $0xd0] sm:$0xff]  ;;  %s566_s27 = sshll.u32 %s911_s15, 2  ;;  %s555_s4 = sshll.u32 %s911_s15, 1 }
  0x1c   : > { %359 = vmatpush1.msra.mxu0 %v324_v3  ;;  %v319_v8 = vld [vmem:[%s904_s1 + $0xc8] sm:$0xff]  ;;  %v318_v9 = vld [vmem:[%s904_s1 + $0xc0] sm:$0xff]  ;;  %v317_v10 = vld [vmem:[%s904_s1 + $0xb8] sm:$0xff]  ;;  %s217_s30 = scalar_lea.vmem %s905_s2, %s566_s27  ;;  %s221_s6 = scalar_lea.vmem %s906_s3, %s555_s4 }
  0x1d   : > { %360 = vmatprep.subr.mxu0 %v323_v4  ;;  %v316_v11 = vld [vmem:[%s904_s1 + $0xb0] sm:$0xff]  ;;  %v315_v12 = vld [vmem:[%s904_s1 + $0xa8] sm:$0xff]  ;;  %v314_v13 = vld [vmem:[%s904_s1 + $0xa0] sm:$0xff] }
  0x1e   : > { %361 = vmatpush1.msra.mxu0 %v322_v5  ;;  %v313_v14 = vld [vmem:[%s904_s1 + $0x98] sm:$0xff]  ;;  %v312_v15 = vld [vmem:[%s904_s1 + $0x90] sm:$0xff]  ;;  %v311_v16 = vld [vmem:[%s904_s1 + $0x88] sm:$0xff] }
  0x1f   : > { %362 = vmatprep.subr.mxu0 %v321_v6  ;;  %v310_v17 = vld [vmem:[%s904_s1 + $0x80] sm:$0xff]  ;;  %v309_v18 = vld [vmem:[%s904_s1 + $0x78] sm:$0xff]  ;;  %v308_v19 = vld [vmem:[%s904_s1 + $0x70] sm:$0xff] }
  0x20   : > { %363 = vmatpush1.msra.mxu0 %v320_v7  ;;  %v307_v20 = vld [vmem:[%s904_s1 + $0x68] sm:$0xff]  ;;  %v306_v21 = vld [vmem:[%s904_s1 + $0x60] sm:$0xff]  ;;  %v305_v22 = vld [vmem:[%s904_s1 + $0x58] sm:$0xff] }
  0x21   : > { %364 = vmatprep.subr.mxu0 %v319_v8  ;;  %v304_v23 = vld [vmem:[%s904_s1 + $0x50] sm:$0xff]  ;;  %v303_v24 = vld [vmem:[%s904_s1 + $0x48] sm:$0xff]  ;;  %v302_v25 = vld [vmem:[%s904_s1 + $0x40] sm:$0xff] }
  0x22   : > { %365 = vmatpush1.msra.mxu0 %v318_v9  ;;  %v222_v26 = vld [vmem:[%s188_s7] sm:$0xff]  ;;  %v223_v27 = vld [vmem:[%s188_s7 + $0x8] sm:$0xff] }
  0x23   : > { %366 = vmatprep.subr.mxu0 %v317_v10  ;;  %v301_v28 = vld [vmem:[%s904_s1 + $0x38] sm:$0xff]  ;;  %v556_v29 = vrot.slane %v222_v26, 10  ;;  %v557_v30 = vrot.slane %v223_v27, 10  ;;  %v300_v31 = vld [vmem:[%s904_s1 + $0x30] sm:$0xff]  ;;  %v299_v32 = vld [vmem:[%s904_s1 + $0x28] sm:$0xff] }
  0x24   : > { %367 = vmatpush1.msra.mxu0 %v316_v11  ;;  %v298_v33 = vld [vmem:[%s904_s1 + $0x20] sm:$0xff]  ;;  %v297_v37 = vld [vmem:[%s904_s1 + $0x18] sm:$0xff]  ;;  %v296_v42 = vld [vmem:[%s904_s1 + $0x10] sm:$0xff] }
  0x25   : > { %368 = vmatprep.subr.mxu0 %v315_v12  ;;  %vm232_vm1 = vcmp.gt.f32.partialorder %v222_v26, %v556_v29  ;;  %vm233_vm2 = vcmp.gt.f32.partialorder %v223_v27, %v557_v30  ;;  %v295_v44 = vld [vmem:[%s904_s1 + $0x8] sm:$0xff]  ;;  %v294_v47 = vld [vmem:[%s904_s1] sm:$0xff]  ;;  %v357_v50 = vld [vmem:[%s904_s1 + $0x1f8] sm:$0xff] }
  0x26   : > { %369 = vmatpush1.msra.mxu0 %v314_v13  ;;  %v558_v35 = vsel %vm232_vm1, 1.0, %v617_v34  ;;  %v559_v36 = vsel %vm233_vm2, 1.0, %v617_v34  ;;  %v356_v52 = vld [vmem:[%s904_s1 + $0x1f0] sm:$0xff]  ;;  %v355_v56 = vld [vmem:[%s904_s1 + $0x1e8] sm:$0xff]  ;;  %v354_v58 = vld [vmem:[%s904_s1 + $0x1e0] sm:$0xff] }
  0x27   : > { %370 = vmatprep.subr.mxu0 %v313_v14  ;;  %v240_v38 = vcombine.high %v558_v35, %v558_v35  ;;  %v241_v39 = vcombine.high %v559_v36, %v559_v36  ;;  %v245_v40 = vsel %vm244_vm0, %v558_v35, 0.0  ;;  %v246_v41 = vsel %vm244_vm0, %v559_v36, 0.0  ;;  %v353_v63 = vld [vmem:[%s904_s1 + $0x1d8] sm:$0xff]  ;;  %v352_v0 = vld [vmem:[%s904_s1 + $0x1d0] sm:$0xff]  ;;  %v351_v3 = vld [vmem:[%s904_s1 + $0x1c8] sm:$0xff] }
  0x28   : > { %371 = vmatpush1.msra.mxu0 %v312_v15  ;;  %v247_v43 = vadd.f32 %v246_v41, %v245_v40  ;;  %v350_v4 = vld [vmem:[%s904_s1 + $0x1c0] sm:$0xff]  ;;  %v349_v7 = vld [vmem:[%s904_s1 + $0x1b8] sm:$0xff]  ;;  %v348_v9 = vld [vmem:[%s904_s1 + $0x1b0] sm:$0xff] }
  0x29   : > { %372 = vmatprep.subr.mxu0 %v311_v16  ;;  %v248_v45 = vsel %vm244_vm0, %v240_v38, 0.0  ;;  %v249_v46 = vsel %vm244_vm0, %v241_v39, 0.0  ;;  %v347_v10 = vld [vmem:[%s904_s1 + $0x1a8] sm:$0xff]  ;;  %v346_v12 = vld [vmem:[%s904_s1 + $0x1a0] sm:$0xff]  ;;  %v345_v14 = vld [vmem:[%s904_s1 + $0x198] sm:$0xff] }
  0x2a   : > { %373 = vmatpush1.msra.mxu0 %v310_v17  ;;  %v250_v48 = vadd.f32 %v249_v46, %v248_v45  ;;  %vm251_vm3 = vcmp.eq.f32.partialorder %v247_v43, 2.0  ;;  %v269_v49 = vmul.f32 0.5, %v247_v43  ;;  %v344_v16 = vld [vmem:[%s904_s1 + $0x190] sm:$0xff]  ;;  %v343_v17 = vld [vmem:[%s904_s1 + $0x188] sm:$0xff]  ;;  %v338_v26 = vld [vmem:[%s904_s1 + $0x160] sm:$0xff]  ;;  %v435_v46 = vlaneseq }
  0x2b   : > { %374 = vmatprep.subr.mxu0 %v309_v18  ;;  %v779_v51 = vsel %vm251_vm3, 1.0, %v617_v34  ;;  %v336_v30 = vld [vmem:[%s904_s1 + $0x150] sm:$0xff]  ;;  %v331_v36 = vld [vmem:[%s904_s1 + $0x128] sm:$0xff]  ;;  %v329_v39 = vld [vmem:[%s904_s1 + $0x118] sm:$0xff] }
  0x2c   : > { %375 = vmatpush1.msra.mxu0 %v308_v19  ;;  %vm252_vm4 = vcmp.eq.f32.partialorder %v250_v48, 2.0  ;;  %v270_v53 = vmul.f32 0.5, %v250_v48  ;;  %v271_v54 = vmul.f32 4.0, %v269_v49  ;;  %v273_v55 = vsub.f32 1.0, %v269_v49  ;;  %v342_v19 = vld [vmem:[%s904_s1 + $0x180] sm:$0xff]  ;;  %v332_v35 = vld [vmem:[%s904_s1 + $0x130] sm:$0xff] }
  0x2d   : > { %376 = vmatprep.subr.mxu0 %v307_v20  ;;  %v787_v57 = vsel %vm252_vm4, 1.0, %v617_v34  ;;  %v333_v34 = vld [vmem:[%s904_s1 + $0x138] sm:$0xff]  ;;  %v328_v40 = vld [vmem:[%s904_s1 + $0x110] sm:$0xff]  ;;  %v327_v41 = vld [vmem:[%s904_s1 + $0x108] sm:$0xff]  ;;  %v436_v48 = vshrl.u32 %v435_v46, 7  ;;  %vm449_vm5 = vcmp.lt.s32.totalorder %v435_v46, 256 }
  0x2e   : > { %377 = vmatpush1.msra.mxu0 %v306_v21  ;;  %v259_v59 = vcombine.low %v779_v51, %v787_v57  ;;  %v272_v60 = vmul.f32 4.0, %v270_v53  ;;  %v274_v61 = vsub.f32 1.0, %v270_v53  ;;  %v275_v62 = vmul.f32 %v273_v55, %v271_v54  ;;  %v341_v21 = vld [vmem:[%s904_s1 + $0x178] sm:$0xff] }
  0x2f   : > { %378 = vmatprep.subr.mxu0 %v305_v22 }
  0x30   : > { %379 = vmatpush1.msra.mxu0 %v304_v23  ;;  %v276_v1 = vmul.f32 %v274_v61, %v272_v60  ;;  %v277_v2 = vsel %vm244_vm0, %v275_v62, 0.0  ;;  %v340_v23 = vld [vmem:[%s904_s1 + $0x170] sm:$0xff]  ;;  %562 = vst.sshfl [vmem:[%s217_s30] sm:$0x33 pattern:$0x76325410] %v259_v59 }
  0x31   : > { %380 = vmatprep.subr.mxu0 %v303_v24  ;;  %v278_v6 = vrot.slane %v277_v2, 4  ;;  %v339_v24 = vld [vmem:[%s904_s1 + $0x168] sm:$0xff] }
  0x32   : > { %381 = vmatpush1.msra.mxu0 %v302_v25  ;;  %v284_v5 = vsel %vm244_vm0, %v276_v1, 0.0 }
  0x33   : > { %382 = vmatprep.subr.mxu0 %v301_v28  ;;  %v285_v8 = vrot.slane %v284_v5, 4  ;;  %v279_v13 = vadd.f32 %v278_v6, %v277_v2  ;;  %v337_v28 = vld [vmem:[%s904_s1 + $0x158] sm:$0xff] }
  0x34   : > { %383 = vmatpush1.msra.mxu0 %v300_v31  ;;  %v335_v31 = vld [vmem:[%s904_s1 + $0x148] sm:$0xff] }
  0x35   : > { %384 = vmatprep.subr.mxu0 %v299_v32  ;;  %v286_v11 = vadd.f32 %v285_v8, %v284_v5  ;;  %v280_v20 = vrot.slane %v279_v13, 2  ;;  %v334_v32 = vld [vmem:[%s904_s1 + $0x140] sm:$0xff] }
  0x36   : > { %385 = vmatpush1.msra.mxu0 %v298_v33 }
  0x37   : > { %386 = vmatprep.subr.mxu0 %v297_v37  ;;  %v287_v15 = vrot.slane %v286_v11, 2  ;;  %v281_v27 = vadd.f32 %v280_v20, %v279_v13  ;;  %v330_v37 = vld [vmem:[%s904_s1 + $0x120] sm:$0xff] }
  0x38   : > { %387 = vmatpush1.msra.mxu0 %v296_v42  ;;  %v326_v42 = vld [vmem:[%s904_s1 + $0x100] sm:$0xff] }
  0x39   : > { %388 = vmatprep.subr.mxu0 %v295_v44  ;;  %v288_v18 = vadd.f32 %v287_v15, %v286_v11  ;;  %v282_v33 = vrot.slane %v281_v27, 1  ;;  %v618_v44 = vmov 1966171168  }
  0x3a   : > { %389 = vmatpush1.msra.mxu0 %v294_v47  ;;  %v433_v45 = vunpack.c.l.s4 %v618_v44 }
  0x3b   : > { %390 = vmatprep.subr.mxu0 %v357_v50  ;;  %v289_v22 = vrot.slane %v288_v18, 1  ;;  %v283_v38 = vadd.f32 %v282_v33, %v281_v27 }
  0x3c   : > { %391 = vmatpush2.msra.mxu0 %v356_v52  ;;  %v434_v47 = vunpack.c.0.s8 %v433_v45 }
  0x3d   : > { %392 = vmatprep.subr.mxu0 %v355_v56  ;;  %v290_v25 = vadd.f32 %v289_v22, %v288_v18  ;;  %v292_v43 = vmul.f32 0.5, %v283_v38 }
  0x3e   : > { %393 = vmatpush2.msra.mxu0 %v354_v58  ;;  %v437_v50 = vsub.s32 %v434_v47, %v436_v48 }
  0x3f   : > { %394 = vmatprep.subr.mxu0 %v353_v63  ;;  %v293_v29 = vmul.f32 0.5, %v290_v25 }
  0x40   : > { %395 = vmatpush2.msra.mxu0 %v352_v0 }
  0x41   : > { %396 = vmatprep.subr.mxu0 %v351_v3  ;;  %422 = vmatprep.mubr.f32.mxu0 %v293_v29 }
  0x42   : > { %397 = vmatpush2.msra.mxu0 %v350_v4 }
  0x43   : > { %398 = vmatprep.subr.mxu0 %v349_v7 }
  0x44   : > { %399 = vmatpush2.msra.mxu0 %v348_v9 }
  0x45   : > { %400 = vmatprep.subr.mxu0 %v347_v10 }
  0x46   : > { %401 = vmatpush2.msra.mxu0 %v346_v12 }
  0x47   : > { %402 = vmatprep.subr.mxu0 %v345_v14 }
  0x48   : > { %403 = vmatpush2.msra.mxu0 %v344_v16 }
  0x49   : > { %404 = vmatprep.subr.mxu0 %v343_v17 }
  0x4a   : > { %405 = vmatpush2.msra.mxu0 %v342_v19 }
  0x4b   : > { %406 = vmatprep.subr.mxu0 %v341_v21 }
  0x4c   : > { %407 = vmatpush2.msra.mxu0 %v340_v23 }
  0x4d   : > { %408 = vmatprep.subr.mxu0 %v339_v24 }
  0x4e   : > { %409 = vmatpush2.msra.mxu0 %v338_v26 }
  0x4f   : > { %410 = vmatprep.subr.mxu0 %v337_v28 }
  0x50   : > { %411 = vmatpush2.msra.mxu0 %v336_v30 }
  0x51   : > { %412 = vmatprep.subr.mxu0 %v335_v31 }
  0x52   : > { %413 = vmatpush2.msra.mxu0 %v334_v32 }
  0x53   : > { %414 = vmatprep.subr.mxu0 %v333_v34 }
  0x54   : > { %415 = vmatpush2.msra.mxu0 %v332_v35 }
  0x55   : > { %416 = vmatprep.subr.mxu0 %v331_v36 }
  0x56   : > { %417 = vmatpush2.msra.mxu0 %v330_v37 }
  0x57   : > { %418 = vmatprep.subr.mxu0 %v329_v39 }
  0x58   : > { %419 = vmatpush2.msra.mxu0 %v328_v40 }
  0x59   : > { %420 = vmatprep.subr.mxu0 %v327_v41 }
  0x5a   : > { %421 = vmatpush2.msra.mxu0 %v326_v42 }
  0x5b   : > { %423 = vmatmul.mubr.f32.vlgmr.msra.gmra.mxu0 %v292_v43 }
 0x11b   : > { %v424_v49 = vpop.f32.mrf.mxu0 }
 0x11d   : > { %v426_v52 = vpop.f32.mrf.mxu0 }
 0x11e   : > { %v431_v53 = vcombine.low %v424_v49, %v426_v52 }
 0x120   : > { %v438_v54 = vrot.slane %v431_v53, %v437_v50 }
 0x122   : > { %v445_v55 = vrot.slane %v438_v54, %v437_v50 }
 0x124   : > { %451 = vst.msk [vmem:[%s221_s6] sm:$0x3] %vm449_vm5, %v445_v55 }
 0x125 PF: > { %p11_p9 = scmp.ge.s32.totalorder %s656_s16, 4   ;;  %s907_s12 = smov %s611_s13 }
 0x126   : > { %s908_s13 = smov %s665_s19  ;;  %s909_s14 = smov %s656_s16 }
 0x127   :  { %13 = sbr.rel (!%p11_p9) target bundleno = 2 (0x2), region = 113 }

// kernel: ensemble_forward.2
= control target key start
LH: loop header
LB: loop body
LE: loop exit
PB: predicated region body
PF: predicated region fallthrough
CT: control target
= control target key end

     0   :  { %s6202_s29 = smov 0   ;;  %s6204_s30 = smov 0   ;;  %s7813_s0 = inlined_call_operand.vmem [shape: f32[2,3,256], index: 0, kind: input, shape index: {}]   ;;  %s7814_s1 = inlined_call_operand.vmem [shape: f32[2,8,28], index: 1, kind: input, shape index: {}]   ;;  %s7815_s2 = inlined_call_operand.vmem [shape: f32[2,16,73], index: 2, kind: input, shape index: {}]   ;;  %s7816_s3 = inlined_call_operand.vmem [shape: f32[2,32,145], index: 3, kind: input, shape index: {}]   ;;  %s7817_s4 = inlined_call_operand.vmem [shape: f32[2,96,33], index: 4, kind: input, shape index: {}]   ;;  %s7818_s5 = inlined_call_operand.vmem [shape: f32[2,32,33], index: 5, kind: input, shape index: {}]   ;;  %s7819_s6 = inlined_call_operand.vmem [shape: f32[2,32,16], index: 6, kind: input, shape index: {}]   ;;  %s7820_s7 = inlined_call_operand.vmem [shape: f32[2,4,16,129], index: 7, kind: input, shape index: {}]   ;;  %s7821_s8 = inlined_call_operand.vmem [shape: f32[2,4,8,65], index: 8, kind: input, shape index: {}]   ;;  %s7822_s9 = inlined_call_operand.vmem [shape: f32[2,4,73], index: 9, kind: input, shape index: {}]   ;;  %s7823_s10 = inlined_call_operand.vmem [shape: f32[256,64], index: 10, kind: input, shape index: {}]   ;;  %s7824_s11 = inlined_call_operand.vmem [shape: f32[64,16], index: 11, kind: input, shape index: {}]   ;;  %s7825_s12 = inlined_call_operand.vmem [shape: f32[4,16,64], index: 12, kind: input, shape index: {}]   ;;  %s7826_s13 = inlined_call_operand.vmem [shape: f32[4,64,256], index: 13, kind: input, shape index: {}]   ;;  %s7827_s14 = inlined_call_operand.vmem [shape: f32[2,2,4,256], index: 14, kind: output, shape index: {}]  }
   0x1   :  { %7859 = sst [smem:[#allocation4_spill]] %s7813_s0  ;;  %s6206_s15 = smov 0  }
   0x2   :  { %7860 = sst [smem:[#allocation5_spill]] %s7814_s1  ;;  %s6208_s16 = smov 0  }
   0x3   :  { %7861 = sst [smem:[#allocation6_spill]] %s7815_s2  ;;  %s6210_s17 = smov 0  }
   0x4   :  { %7862 = sst [smem:[#allocation7_spill]] %s7816_s3 }
   0x5   :  { %7863 = sst [smem:[#allocation8_spill]] %s7817_s4 }
   0x6   :  { %7864 = sst [smem:[#allocation9_spill]] %s7818_s5 }
   0x7   :  { %7865 = sst [smem:[#allocation10_spill]] %s7823_s10 }
   0x8 LB: > { %s33_s18 = sadd.s32 1, %s6089_s15  ;;  %s36_s19 = sadd.s32 1, %s6093_s16  ;;  %s6097_s17 = sphi %s6210_s17, %s24_s17   ;;  %s6093_s16 = sphi %s6208_s16, %s7899_s16   ;;  %s6089_s15 = sphi %s6206_s15, %s7898_s15   ;;  %s6085_s30 = sphi %s6204_s30, %s7897_s30   ;;  %s6081_s29 = sphi %s6202_s29, %s7896_s29  }
   0x9   : > { %p34_p0 = scmp.ge.s32.totalorder %s33_s18, 2  ;;  %p5310_p1 = scmp.ge.s32.totalorder %s6097_s17, 1 }
   0xa   : > { %p514_p2 = scmp.lt.s32.totalorder %s6097_s17, 5 }
   0xb   : > { %s7901_s18 = smov (%p34_p0, %s33_s18), 0  ;;  %s7903_s19 = smov (!%p34_p0, %s36_s19), %s6093_s16 }
   0xc   : > { %7866 = sst [smem:[#allocation2_spill]] %s7901_s18  ;;  %p515_p3 = pnand %p5310_p1, %p514_p2 }
   0xd   : > { %p38_p4 = scmp.ge.s32.totalorder %s7903_s19, 2  ;;  %p607_p5 = scmp.lt.s32.totalorder (!%p515_p3), %s6081_s29, 1 }
   0xe   : > { %518 = sbr.rel (%p515_p3) target bundleno = 6545 (0x1991), region = 76  ;;  %s7868_s0 = sld [smem:[#allocation4_spill]] (!%p515_p3) }
   0xf   : > { %s7905_s19 = smov (%p38_p4, %s7903_s19), 0  ;;  %s7844_s24 = smov (!%p515_p3), 17  }
  0x10   : > { %7867 = sst [smem:[#allocation3_spill]] %s7905_s19  ;;  %s7828_s25 = smov (!%p515_p3), 18  }
  0x11   : > { %s7830_s26 = smov (!%p515_p3), 2   ;;  %s6103_s27 = smov (!%p515_p3), 32  }
  0x12   : > { %s6104_s28 = smov (!%p515_p3), 34   ;;  %s7842_s21 = smov (!%p515_p3), 95  }
  0x13   : > { %v679_v0 = vlaneseq  ;;  %v6099_v1 = vmov 0.0   ;;  %s7907_s29 = smov (!%p607_p5, %s6081_s29), 1  ;;  %vm672_vm4 = vcmask 138240   ;;  %s7840_s22 = smov 94   ;;  %vm776_vm5 = vcmask 277504  }
  0x14   : > { %1007 = vmatprep.mubr.f32.mxu0 %v6099_v1  ;;  %1216 = vmatprep.mubr.f32.mxu1 %v6099_v1  ;;  %s5499_s20 = sshll.u32 %s7907_s29, 3  ;;  %vm726_vm6 = vcmask 15360   ;;  %vm752_vm7 = vcmask 146432   ;;  %vm740_vm8 = vcmask 130048   ;;  %vm764_vm9 = vcmask 261120   ;;  %p612_p6 = scmp.lt.s32.totalorder %s6085_s30, 1 }
  0x15   : > { %v6238_v2 = vand.u32 127, %v679_v0  ;;  %s611_s23 = scalar_lea.vmem %s7868_s0, %s5499_s20  ;;  %s7829_s20 = smov 16   ;;  %vm905_vm10 = vcmask 769024   ;;  %vm910_vm11 = vcmask 1042432   ;;  %vm919_vm12 = vcmask 1043456  }
  0x16   : > { %v664_v5 = vld [vmem:[%s611_s23] sm:$0x77]  ;;  %s7846_s23 = smov 110   ;;  %vm829_vm13 = vcmask 916480   ;;  %vm812_vm14 = vcmask 1031168   ;;  %vm891_vm15 = vcmask 777216  }
  0x17   : > { %v681_v3 = vadd.s32 128, %v6238_v2  ;;  %v686_v4 = vand.u32 15, %v6238_v2  ;;  %668 = vrot.lane.b32.xlu0 %v664_v5, %s7844_s24  ;;  %v667_v7 = vcombine.high %v664_v5, %v664_v5  ;;  %s7909_s30 = smov (!%p612_p6, %s6085_s30), 1  ;;  %s7869_s1 = sld [smem:[#allocation5_spill]] }
  0x18   : > { %s7874_s2 = sld [smem:[#allocation6_spill]]  ;;  %s7852_s18 = smov 9  }
  0x19   : > { %v693_v6 = vand.u32 15, %v681_v3  ;;  %vm706_vm0 = vcmp.ne.s32.totalorder %v686_v4, 0  ;;  %vm712_vm1 = vcmp.ne.s32.totalorder %v686_v4, 15  ;;  %s7875_s10 = sld [smem:[#allocation10_spill]]  ;;  %s7854_s19 = smov 10  }
  0x1a   : > { %v5333_v8 = vsel %vm712_vm1, 1.0, %v6099_v1  ;;  %v6249_v9 = vsel %vm706_vm0, 1.0, %v6099_v1  ;;  %vm843_vm0 = vcmask 908288   ;;  %vm916_vm1 = vcmask 1040384   ;;  %s7878_s0 = smov 18   ;;  %s7880_s3 = sld [smem:[#allocation7_spill]] }
  0x1b   : > { %vm713_vm2 = vcmp.ne.s32.totalorder %v693_v6, 15  ;;  %vm707_vm3 = vcmp.ne.s32.totalorder %v693_v6, 0  ;;  %670 = vrot.lane.b32.xlu0 %v667_v7, %s7844_s24  ;;  %s7883_s4 = sld [smem:[#allocation8_spill]] }
  0x1c   : > { %v5334_v10 = vsel %vm713_vm2, 1.0, %v6099_v1  ;;  %v6253_v11 = vsel %vm707_vm3, 1.0, %v6099_v1  ;;  %vm860_vm2 = vcmask 900096   ;;  %vm877_vm3 = vcmask 785408   ;;  %s7884_s5 = sld [smem:[#allocation9_spill]] }
  0x1d   : > { %v5949_v12 = vpack.i.bf16 %v5334_v10, %v5333_v8  ;;  %v5954_v13 = vpack.i.bf16 %v6253_v11, %v6249_v9 }
  0x1f   : > { %5950 = vrot.lane.b32.xlu1 %v5949_v12, %s7828_s25  ;;  %5960 = vrot.lane.b32.xlu0 %v5949_v12, %s7830_s26  ;;  %s7834_s25 = smov 126   ;;  %s7832_s26 = smov 127  }
  0x23   : > { %5955 = vrot.lane.b32.xlu1 %v5954_v13, %s6103_s27  ;;  %5970 = vrot.lane.b32.xlu0 %v5949_v12, %s6104_s28  ;;  %s7848_s27 = smov 111   ;;  %s7838_s28 = smov 96  }
  0x27   : > { %5965 = vrot.lane.b32.xlu1 %v5954_v13, %s7829_s20  ;;  %s7836_s20 = smov 112  }
  0x89   : > { %v669_v14 = vpop.permute.xlu0 %668 }
  0x8a   : > { %v6262_v15 = vsel %vm672_vm4, 0.0, %v669_v14 }
  0x8b   : > { %v882_v16 = vrot.slane %v6262_v15, 3  ;;  %v834_v32 = vrot.slane %v6262_v15, 4  ;;  %v786_v13 = vrot.slane %v6262_v15, 5 }
  0x8d   : > { %885 = vrot.lane.b32.xlu0 %v882_v16, %s7842_s21  ;;  %v671_v17 = vpop.permute.xlu0 %670 }
  0x8e   : > { %v6273_v25 = vsel %vm672_vm4, %v671_v17, 0.0  ;;  %v6291_v34 = vsel %vm672_vm4, %v669_v14, %v671_v17 }
  0x8f   : > { %v883_v37 = vrot.slane %v6291_v34, 3  ;;  %v884_v40 = vrot.slane %v6273_v25, 3  ;;  %v835_v45 = vrot.slane %v6291_v34, 4  ;;  %v836_v49 = vrot.slane %v6273_v25, 4 }
  0x90   : > { %v787_v50 = vrot.slane %v6291_v34, 5  ;;  %v788_v14 = vrot.slane %v6273_v25, 5 }
  0x91   : > { %v5951_v18 = vpop.permute.xlu1 %5950  ;;  %v5961_v19 = vpop.permute.xlu0 %5960 }
  0x92   : > { %v6266_v20 = vunpack.i.l.bf16 %v5951_v18  ;;  %v6285_v30 = vunpack.i.l.bf16 %v5961_v19  ;;  %v6307_v43 = vunpack.i.h.bf16 %v5951_v18  ;;  %v6314_v47 = vunpack.i.h.bf16 %v5961_v19 }
  0x94   : > { %v757_v29 = vmul.f32 %v6266_v20, %v6262_v15  ;;  %v731_v39 = vmul.f32 %v6285_v30, %v6262_v15  ;;  %v759_v46 = vmul.f32 %v6307_v43, %v6273_v25  ;;  %v733_v55 = vmul.f32 %v6314_v47, %v6273_v25 }
  0x95   : > { %v5956_v21 = vpop.permute.xlu1 %5955  ;;  %v5971_v22 = vpop.permute.xlu0 %5970  ;;  %v6336_v57 = vsel %vm726_vm6, %v6285_v30, %v6314_v47  ;;  %v6346_v62 = vsel %vm752_vm7, %v6266_v20, %v6307_v43  ;;  %vm925_vm6 = vcmask 1041408   ;;  %vm922_vm7 = vcmask 1046528  }
  0x96   : > { %v6268_v23 = vunpack.i.h.bf16 %v5971_v22  ;;  %v6270_v24 = vunpack.i.l.bf16 %v5971_v22  ;;  %v6275_v26 = vunpack.i.l.bf16 %v5956_v21  ;;  %v851_v31 = vrot.slane %v757_v29, 1 }
  0x97   : > { %v803_v41 = vrot.slane %v731_v39, 2  ;;  %v6316_v48 = vunpack.i.h.bf16 %v5956_v21  ;;  %v853_v52 = vrot.slane %v759_v46, 1  ;;  %v805_v58 = vrot.slane %v733_v55, 2 }
  0x98   : > { %v783_v27 = vmul.f32 %v6268_v23, %v6273_v25  ;;  %v781_v28 = vmul.f32 %v6270_v24, %v6262_v15  ;;  %v769_v33 = vmul.f32 %v6275_v26, %v6262_v15  ;;  %v6322_v51 = vsel %vm776_vm5, %v6270_v24, %v6268_v23 }
  0x99   : > { %v5966_v35 = vpop.permute.xlu1 %5965  ;;  %v782_v54 = vmul.f32 %v6322_v51, %v6291_v34  ;;  %v771_v56 = vmul.f32 %v6316_v48, %v6273_v25  ;;  %v732_v61 = vmul.f32 %v6336_v57, %v6291_v34  ;;  %v758_v4 = vmul.f32 %v6346_v62, %v6291_v34 }
  0x9a   : > { %903 = vrot.lane.b32.xlu0 %v783_v27, %s7840_s22  ;;  %899 = vrot.lane.b32.xlu1 %v781_v28, %s7840_s22  ;;  %v6295_v36 = vunpack.i.l.bf16 %v5966_v35  ;;  %v868_v38 = vrot.slane %v769_v33, 6  ;;  %v6326_v53 = vunpack.i.h.bf16 %v5966_v35  ;;  %v6361_v6 = vsel %vm764_vm9, %v6275_v26, %v6316_v48 }
  0x9b   : > { %v870_v59 = vrot.slane %v771_v56, 6  ;;  %v804_v3 = vrot.slane %v732_v61, 2  ;;  %v852_v7 = vrot.slane %v758_v4, 1  ;;  %v770_v10 = vmul.f32 %v6361_v6, %v6291_v34 }
  0x9c   : > { %v745_v42 = vmul.f32 %v6295_v36, %v6262_v15  ;;  %v747_v60 = vmul.f32 %v6326_v53, %v6273_v25  ;;  %v6351_v63 = vsel %vm740_vm8, %v6295_v36, %v6326_v53  ;;  %vm7858_vm5 = vcmask 1039360  }
  0x9d   : > { %v746_v5 = vmul.f32 %v6351_v63, %v6291_v34  ;;  %v869_v12 = vrot.slane %v770_v10, 6  ;;  %vm928_vm9 = vcmask 1044480  }
  0x9e   : > { %854 = vrot.lane.b32.xlu0 %v851_v31, %s7846_s23  ;;  %837 = vrot.lane.b32.xlu1 %v834_v32, %s7848_s27  ;;  %v820_v44 = vrot.slane %v745_v42, 7  ;;  %v822_v0 = vrot.slane %v747_v60, 7 }
  0x9f   : > { %v821_v8 = vrot.slane %v746_v5, 7 }
  0xa2   : > { %887 = vrot.lane.b32.xlu0 %v883_v37, %s7842_s21  ;;  %871 = vrot.lane.b32.xlu1 %v868_v38, %s7838_s28 }
  0xa6   : > { %889 = vrot.lane.b32.xlu1 %v884_v40, %s7842_s21  ;;  %806 = vrot.lane.b32.xlu0 %v803_v41, %s7834_s25 }
  0xaa   : > { %823 = vrot.lane.b32.xlu1 %v820_v44, %s7836_s20  ;;  %839 = vrot.lane.b32.xlu0 %v835_v45, %s7848_s27 }
  0xae   : > { %841 = vrot.lane.b32.xlu1 %v836_v49, %s7848_s27  ;;  %791 = vrot.lane.b32.xlu0 %v787_v50, %s7832_s26 }
  0xb2   : > { %901 = vrot.lane.b32.xlu1 %v782_v54, %s7840_s22  ;;  %858 = vrot.lane.b32.xlu0 %v853_v52, %s7846_s23 }
  0xb6   : > { %810 = vrot.lane.b32.xlu1 %v805_v58, %s7834_s25  ;;  %875 = vrot.lane.b32.xlu0 %v870_v59, %s7838_s28 }
  0xba   : > { %827 = vrot.lane.b32.xlu1 %v822_v0, %s7836_s20  ;;  %808 = vrot.lane.b32.xlu0 %v804_v3, %s7834_s25  ;;  %s7870_s25 = smov 96  }
  0xbe   : > { %856 = vrot.lane.b32.xlu1 %v852_v7, %s7846_s23  ;;  %825 = vrot.lane.b32.xlu0 %v821_v8, %s7836_s20  ;;  %s7872_s20 = smov 126  }
  0xc2   : > { %873 = vrot.lane.b32.xlu1 %v869_v12, %s7838_s28  ;;  %789 = vrot.lane.b32.xlu0 %v786_v13, %s7832_s26 }
  0xc6   : > { %793 = vrot.lane.b32.xlu1 %v788_v14, %s7832_s26  ;;  %s5313_s26 = sshll.u32 %s7909_s30, 3 }
  0xc7   : > { %s615_s28 = scalar_lea.vmem %s7869_s1, %s5313_s26  ;;  %s7871_s26 = smov 112  }
  0xc8   : > { %s7879_s1 = smov 111  }
  0xff   : > { %v886_v16 = vpop.permute.xlu0 %885 }
 0x10c   : > { %v904_v17 = vpop.permute.xlu0 %903  ;;  %v900_v18 = vpop.permute.xlu1 %899 }
 0x110   : > { %v855_v19 = vpop.permute.xlu0 %854  ;;  %v838_v21 = vpop.permute.xlu1 %837 }
 0x114   : > { %v888_v22 = vpop.permute.xlu0 %887  ;;  %v872_v27 = vpop.permute.xlu1 %871 }
 0x115   : > { %v892_v56 = vsel %vm891_vm15, %v886_v16, %v888_v22 }
 0x118   : > { %v890_v28 = vpop.permute.xlu1 %889  ;;  %v807_v29 = vpop.permute.xlu0 %806 }
 0x119   : > { %v893_v60 = vsel %vm891_vm15, %v888_v22, %v890_v28  ;;  %v718_v22 = vmul.f32 %v6249_v9, %v6262_v15  ;;  %v719_v28 = vmul.f32 %v6253_v11, %v6291_v34  ;;  %v665_v34 = vld [vmem:[%s615_s28] sm:$0xff]  ;;  %s7873_s28 = smov 127  }
 0x11c   : > { %v824_v31 = vpop.permute.xlu1 %823  ;;  %v840_v32 = vpop.permute.xlu0 %839 }
 0x11d   : > { %v844_v61 = vsel %vm843_vm0, %v838_v21, %v840_v32 }
 0x120   : > { %v842_v33 = vpop.permute.xlu1 %841  ;;  %v792_v35 = vpop.permute.xlu0 %791 }
 0x121   : > { %v845_v0 = vsel %vm843_vm0, %v840_v32, %v842_v33 }
 0x124   : > { %v902_v37 = vpop.permute.xlu1 %901  ;;  %v859_v25 = vpop.permute.xlu0 %858 }
 0x125   : > { %v907_v38 = vsel %vm905_vm10, %v902_v37, %v904_v17  ;;  %v906_v39 = vsel %vm905_vm10, %v900_v18, %v902_v37 }
 0x126   : > { %v932_v40 = vsel %vm910_vm11, %v907_v38, 1.0  ;;  %v931_v41 = vsel %vm910_vm11, %v906_v39, 1.0 }
 0x127   : > { %5335 = vmatprep.subr.msk.mxu0 %vm919_vm12, %v932_v40 }
 0x128   : > { %5336 = vmatpush1.msk.msra.mxu0 %vm919_vm12, %v931_v41  ;;  %v811_v42 = vpop.permute.xlu1 %810  ;;  %v876_v44 = vpop.permute.xlu0 %875 }
 0x12c   : > { %v828_v45 = vpop.permute.xlu1 %827  ;;  %v809_v46 = vpop.permute.xlu0 %808 }
 0x12d   : > { %v814_v55 = vsel %vm812_vm14, %v809_v46, %v811_v42  ;;  %v813_v58 = vsel %vm812_vm14, %v807_v29, %v809_v46 }
 0x130   : > { %v857_v49 = vpop.permute.xlu1 %856  ;;  %v826_v50 = vpop.permute.xlu0 %825 }
 0x131   : > { %v830_v52 = vsel %vm829_vm13, %v824_v31, %v826_v50  ;;  %v831_v54 = vsel %vm829_vm13, %v826_v50, %v828_v45  ;;  %v861_v7 = vsel %vm860_vm2, %v855_v19, %v857_v49  ;;  %v862_v8 = vsel %vm860_vm2, %v857_v49, %v859_v25 }
 0x132   : > { %v918_v59 = vsel %vm916_vm1, %v814_v55, %v831_v54  ;;  %v917_v3 = vsel %vm916_vm1, %v813_v58, %v830_v52  ;;  %v6114_v49 = vmov 1.0  }
 0x133   : > { %v921_v17 = vsel %vm919_vm12, %v918_v59, %v845_v0  ;;  %v920_v19 = vsel %vm919_vm12, %v917_v3, %v844_v61  ;;  %vm933_vm12 = vcmask 228352   ;;  %5338 = vmatprep.subr.msk.mxu1 %vm916_vm1, %v6114_v49 }
 0x134   : > { %v874_v4 = vpop.permute.xlu1 %873  ;;  %v790_v5 = vpop.permute.xlu0 %789  ;;  %v924_v31 = vsel %vm922_vm7, %v921_v17, %v862_v8  ;;  %v923_v15 = vsel %vm922_vm7, %v920_v19, %v861_v7  ;;  %5339 = vmatpush1.msk.msra.mxu1 %vm916_vm1, %v6114_v49 }
 0x135   : > { %v878_v10 = vsel %vm877_vm3, %v872_v27, %v874_v4  ;;  %v879_v12 = vsel %vm877_vm3, %v874_v4, %v876_v44  ;;  %v796_v13 = vsel %vm7858_vm5, %v790_v5, %v792_v35 }
 0x136   : > { %v927_v14 = vsel %vm925_vm6, %v862_v8, %v879_v12  ;;  %v926_v16 = vsel %vm925_vm6, %v861_v7, %v878_v10  ;;  %vm913_vm6 = vcmask 1045504   ;;  %v911_v32 = vsel %vm910_vm11, %v718_v22, %v796_v13 }
 0x137   : > { %v930_v18 = vsel %vm928_vm9, %v927_v14, %v893_v60  ;;  %v929_v21 = vsel %vm928_vm9, %v926_v16, %v892_v56  ;;  %v914_v25 = vsel %vm913_vm6, %v911_v32, %v813_v58 }
 0x138   : > { %v794_v27 = vpop.permute.xlu1 %793  ;;  %969 = vmatprep.subr.mxu0 %v930_v18 }
 0x139   : > { %v797_v29 = vsel %vm7858_vm5, %v792_v35, %v794_v27  ;;  %970 = vmatpush1.msra.mxu0 %v929_v21 }
 0x13a   : > { %971 = vmatprep.subr.mxu0 %v924_v31  ;;  %v912_v33 = vsel %vm910_vm11, %v719_v28, %v797_v29  ;;  %vm1142_vm11 = vcmask 596992  }
 0x13b   : > { %972 = vmatpush1.msra.mxu0 %v923_v15  ;;  %v915_v37 = vsel %vm913_vm6, %v912_v33, %v814_v55  ;;  %vm1412_vm6 = vcmask 72704  }
 0x13c   : > { %973 = vmatprep.subr.mxu0 %v915_v37 }
 0x13d   : > { %974 = vmatpush1.msra.mxu0 %v914_v25 }
 0x13e   : > { %5337 = vmatmul.mubr.msk.f32.vlgmr.msra.gmra.mxu0 %vm933_vm12, %v665_v34  ;;  %vm1633_vm12 = vcmask 523264  }
 0x1fe   : > { %v1009_v35 = vpop.f32.mrf.mxu0 }
 0x1ff   : > { %1018 = vrot.lane.b32.xlu1 %v1009_v35, %s7844_s24 }
 0x200   : > { %v1011_v38 = vpop.f32.mrf.mxu0 }
 0x201   : > { %1020 = vrot.lane.b32.xlu0 %v1011_v38, %s7844_s24  ;;  %s7876_s24 = smov 2  }
 0x271   : > { %v1019_v39 = vpop.permute.xlu1 %1018 }
 0x272   : > { %v6421_v40 = vsel %vm672_vm4, 0.0, %v1019_v39 }
 0x273   : > { %1083 = vrot.lane.b32.xlu1 %v6421_v40, %s7848_s27  ;;  %1119 = vrot.lane.b32.xlu0 %v6421_v40, %s7842_s21  ;;  %v1021_v41 = vpop.permute.xlu0 %1020  ;;  %v1042_v42 = vmul.f32 %v6270_v24, %v6421_v40  ;;  %v1036_v45 = vmul.f32 %v6266_v20, %v6421_v40  ;;  %v1039_v50 = vmul.f32 %v6275_v26, %v6421_v40 }
 0x274   : > { %v6430_v44 = vsel %vm672_vm4, %v1019_v39, %v1021_v41  ;;  %v1027_v46 = vsel %vm672_vm4, %v1021_v41, 0.0  ;;  %v1033_v52 = vmul.f32 %v6295_v36, %v6421_v40  ;;  %v1030_v54 = vmul.f32 %v6285_v30, %v6421_v40 }
 0x275   : > { %v1044_v55 = vmul.f32 %v6268_v23, %v1027_v46  ;;  %v1043_v56 = vmul.f32 %v6430_v44, %v6322_v51  ;;  %v1041_v58 = vmul.f32 %v6316_v48, %v1027_v46  ;;  %v1040_v59 = vmul.f32 %v6430_v44, %v6361_v6 }
 0x276   : > { %v1038_v60 = vmul.f32 %v6307_v43, %v1027_v46  ;;  %v1037_v61 = vmul.f32 %v6430_v44, %v6346_v62  ;;  %v1035_v0 = vmul.f32 %v6326_v53, %v1027_v46  ;;  %v1034_v3 = vmul.f32 %v6430_v44, %v6351_v63 }
 0x277   : > { %1132 = vrot.lane.b32.xlu1 %v1042_v42, %s7840_s22  ;;  %1121 = vrot.lane.b32.xlu0 %v6430_v44, %s7842_s21  ;;  %v1032_v4 = vmul.f32 %v6314_v47, %v1027_v46  ;;  %v1031_v5 = vmul.f32 %v6430_v44, %v6336_v57 }
 0x27b   : > { %1123 = vrot.lane.b32.xlu1 %v1027_v46, %s7842_s21  ;;  %1096 = vrot.lane.b32.xlu0 %v1036_v45, %s7846_s23  ;;  %s7877_s21 = smov 16  }
 0x27f   : > { %1109 = vrot.lane.b32.xlu1 %v1039_v50, %s7870_s25  ;;  %1087 = vrot.lane.b32.xlu0 %v1027_v46, %s7848_s27 }
 0x283   : > { %1085 = vrot.lane.b32.xlu1 %v6430_v44, %s7848_s27  ;;  %1073 = vrot.lane.b32.xlu0 %v1033_v52, %s7871_s26  ;;  %s7850_s27 = smov 119  }
 0x287   : > { %1060 = vrot.lane.b32.xlu1 %v1030_v54, %s7872_s20  ;;  %1049 = vrot.lane.b32.xlu0 %v6430_v44, %s7873_s28 }
 0x28b   : > { %1136 = vrot.lane.b32.xlu0 %v1044_v55, %s7840_s22  ;;  %1134 = vrot.lane.b32.xlu1 %v1043_v56, %s7840_s22  ;;  %s5500_s22 = sshll.u32 %s7909_s30, 4 }
 0x28f   : > { %1113 = vrot.lane.b32.xlu0 %v1041_v58, %s7870_s25  ;;  %1111 = vrot.lane.b32.xlu1 %v1040_v59, %s7870_s25 }
 0x293   : > { %1100 = vrot.lane.b32.xlu1 %v1038_v60, %s7846_s23  ;;  %1098 = vrot.lane.b32.xlu0 %v1037_v61, %s7846_s23  ;;  %s620_s23 = scalar_lea.vmem %s7874_s2, %s5500_s22  ;;  %s7855_s22 = smov 8  }
 0x294   : > { %s6118_s2 = smov 118  }
 0x297   : > { %1077 = vrot.lane.b32.xlu1 %v1035_v0, %s7871_s26  ;;  %1075 = vrot.lane.b32.xlu0 %v1034_v3, %s7871_s26 }
 0x29b   : > { %1064 = vrot.lane.b32.xlu0 %v1032_v4, %s7872_s20  ;;  %1062 = vrot.lane.b32.xlu1 %v1031_v5, %s7872_s20  ;;  %v1029_v4 = vmul.f32 %v6253_v11, %v6430_v44  ;;  %v1028_v5 = vmul.f32 %v6249_v9, %v6421_v40 }
 0x29f   : > { %1047 = vrot.lane.b32.xlu0 %v6421_v40, %s7873_s28  ;;  %1051 = vrot.lane.b32.xlu1 %v1027_v46, %s7873_s28 }
 0x2e5   : > { %v1084_v7 = vpop.permute.xlu1 %1083  ;;  %v1120_v8 = vpop.permute.xlu0 %1119 }
 0x2e9   : > { %v1133_v10 = vpop.permute.xlu1 %1132  ;;  %v1122_v12 = vpop.permute.xlu0 %1121 }
 0x2ea   : > { %v1125_v37 = vsel %vm891_vm15, %v1120_v8, %v1122_v12  ;;  %v1015_v8 = vld [vmem:[%s620_s23 + $0x8] sm:$0xff] }
 0x2ed   : > { %v1124_v13 = vpop.permute.xlu1 %1123  ;;  %v1097_v14 = vpop.permute.xlu0 %1096 }
 0x2ee   : > { %v1126_v32 = vsel %vm891_vm15, %v1122_v12, %v1124_v13 }
 0x2f1   : > { %v1110_v16 = vpop.permute.xlu1 %1109  ;;  %v1088_v17 = vpop.permute.xlu0 %1087 }
 0x2f5   : > { %v1086_v18 = vpop.permute.xlu1 %1085  ;;  %v1074_v21 = vpop.permute.xlu0 %1073 }
 0x2f6   : > { %v1090_v42 = vsel %vm843_vm0, %v1086_v18, %v1088_v17  ;;  %v1089_v50 = vsel %vm843_vm0, %v1084_v7, %v1086_v18  ;;  %v1014_v7 = vld [vmem:[%s620_s23] sm:$0xff]  ;;  %v1264_v17 = vld [vmem:[%s7875_s10 + $0xf8] sm:$0xff]  ;;  %s7856_s23 = smov 120  }
 0x2f7   : > { %v1248_v18 = vld [vmem:[%s7875_s10 + $0x78] sm:$0xff]  ;;  %5506 = vmatprep.subr.mxu0 %v1264_v17 }
 0x2f8   : > { %5507 = vmatpush3.msra.mxu0 %v1248_v18 }
 0x2f9   : > { %v1061_v19 = vpop.permute.xlu1 %1060  ;;  %v1050_v22 = vpop.permute.xlu0 %1049 }
 0x2fd   : > { %v1135_v27 = vpop.permute.xlu1 %1134  ;;  %v1137_v28 = vpop.permute.xlu0 %1136 }
 0x2fe   : > { %v1139_v29 = vsel %vm905_vm10, %v1135_v27, %v1137_v28  ;;  %v1138_v31 = vsel %vm905_vm10, %v1133_v10, %v1135_v27  ;;  %v1262_v27 = vld [vmem:[%s7875_s10 + $0xe8] sm:$0xff] }
 0x2ff   : > { %1166 = vmatprep.subr.mxu1 %v1139_v29  ;;  %v1246_v29 = vld [vmem:[%s7875_s10 + $0x68] sm:$0xff] }
 0x300   : > { %1167 = vmatpush1.msra.mxu1 %v1138_v31 }
 0x301   : > { %v1112_v15 = vpop.permute.xlu1 %1111  ;;  %1168 = vmatprep.subr.mxu1 %v1126_v32  ;;  %v1114_v33 = vpop.permute.xlu0 %1113  ;;  %v1261_v32 = vld [vmem:[%s7875_s10 + $0xe0] sm:$0xff] }
 0x302   : > { %1169 = vmatpush1.msra.mxu1 %v1125_v37  ;;  %v1116_v34 = vsel %vm877_vm3, %v1112_v15, %v1114_v33  ;;  %v1115_v25 = vsel %vm877_vm3, %v1110_v16, %v1112_v15  ;;  %v1245_v15 = vld [vmem:[%s7875_s10 + $0x60] sm:$0xff]  ;;  %v1260_v33 = vld [vmem:[%s7875_s10 + $0xd8] sm:$0xff] }
 0x303   : > { %1170 = vmatprep.subr.mxu1 %v1116_v34  ;;  %v1244_v37 = vld [vmem:[%s7875_s10 + $0x58] sm:$0xff]  ;;  %v1259_v34 = vld [vmem:[%s7875_s10 + $0xd0] sm:$0xff] }
 0x304   : > { %1171 = vmatpush1.msra.mxu1 %v1115_v25  ;;  %v1243_v25 = vld [vmem:[%s7875_s10 + $0x50] sm:$0xff] }
 0x305   : > { %v1101_v35 = vpop.permute.xlu1 %1100  ;;  %v1099_v38 = vpop.permute.xlu0 %1098 }
 0x306   : > { %v1103_v39 = vsel %vm860_vm2, %v1099_v38, %v1101_v35  ;;  %v1102_v41 = vsel %vm860_vm2, %v1097_v14, %v1099_v38  ;;  %v1258_v35 = vld [vmem:[%s7875_s10 + $0xc8] sm:$0xff] }
 0x307   : > { %1172 = vmatprep.subr.mxu1 %v1103_v39  ;;  %v1242_v38 = vld [vmem:[%s7875_s10 + $0x48] sm:$0xff]  ;;  %v1257_v39 = vld [vmem:[%s7875_s10 + $0xc0] sm:$0xff] }
 0x308   : > { %1173 = vmatpush1.msra.mxu1 %v1102_v41  ;;  %v1241_v41 = vld [vmem:[%s7875_s10 + $0x40] sm:$0xff] }
 0x309   : > { %v1078_v45 = vpop.permute.xlu1 %1077  ;;  %1174 = vmatprep.subr.mxu1 %v1090_v42  ;;  %v1076_v46 = vpop.permute.xlu0 %1075  ;;  %v1256_v42 = vld [vmem:[%s7875_s10 + $0xb8] sm:$0xff] }
 0x30a   : > { %1175 = vmatpush1.msra.mxu1 %v1089_v50  ;;  %v1080_v52 = vsel %vm829_vm13, %v1076_v46, %v1078_v45  ;;  %v1079_v54 = vsel %vm829_vm13, %v1074_v21, %v1076_v46  ;;  %v1263_v21 = vld [vmem:[%s7875_s10 + $0xf0] sm:$0xff]  ;;  %v1240_v45 = vld [vmem:[%s7875_s10 + $0x38] sm:$0xff] }
 0x30b   : > { %1176 = vmatprep.subr.mxu1 %v1080_v52  ;;  %5508 = vmatprep.subr.mxu0 %v1263_v21  ;;  %v1255_v46 = vld [vmem:[%s7875_s10 + $0xb0] sm:$0xff]  ;;  %v1254_v52 = vld [vmem:[%s7875_s10 + $0xa8] sm:$0xff] }
 0x30c   : > { %1177 = vmatpush1.msra.mxu1 %v1079_v54  ;;  %v1239_v50 = vld [vmem:[%s7875_s10 + $0x30] sm:$0xff]  ;;  %v1238_v54 = vld [vmem:[%s7875_s10 + $0x28] sm:$0xff] }
 0x30d   : > { %v1063_v55 = vpop.permute.xlu1 %1062  ;;  %v1065_v56 = vpop.permute.xlu0 %1064 }
 0x30e   : > { %v1067_v58 = vsel %vm812_vm14, %v1063_v55, %v1065_v56  ;;  %v1066_v59 = vsel %vm812_vm14, %v1061_v19, %v1063_v55  ;;  %v1247_v19 = vld [vmem:[%s7875_s10 + $0x70] sm:$0xff]  ;;  %v1253_v55 = vld [vmem:[%s7875_s10 + $0xa0] sm:$0xff] }
 0x30f   : > { %1178 = vmatprep.subr.mxu1 %v1067_v58  ;;  %5509 = vmatpush3.msra.mxu0 %v1247_v19  ;;  %v1237_v56 = vld [vmem:[%s7875_s10 + $0x20] sm:$0xff]  ;;  %v1252_v58 = vld [vmem:[%s7875_s10 + $0x98] sm:$0xff] }
 0x310   : > { %1179 = vmatpush1.msra.mxu1 %v1066_v59  ;;  %5510 = vmatprep.subr.mxu0 %v1262_v27  ;;  %v1236_v59 = vld [vmem:[%s7875_s10 + $0x18] sm:$0xff] }
 0x311   : > { %v1052_v60 = vpop.permute.xlu1 %1051  ;;  %v1048_v61 = vpop.permute.xlu0 %1047  ;;  %5511 = vmatpush3.msra.mxu0 %v1246_v29 }
 0x312   : > { %v1054_v0 = vsel %vm7858_vm5, %v1050_v22, %v1052_v60  ;;  %v1053_v3 = vsel %vm7858_vm5, %v1048_v61, %v1050_v22  ;;  %5512 = vmatprep.subr.mxu0 %v1261_v32  ;;  %v1251_v60 = vld [vmem:[%s7875_s10 + $0x90] sm:$0xff] }
 0x313   : > { %1180 = vmatprep.subr.mxu1 %v1054_v0  ;;  %5513 = vmatpush3.msra.mxu0 %v1245_v15  ;;  %v1235_v61 = vld [vmem:[%s7875_s10 + $0x10] sm:$0xff]  ;;  %v1250_v0 = vld [vmem:[%s7875_s10 + $0x88] sm:$0xff] }
 0x314   : > { %1181 = vmatpush1.msra.mxu1 %v1053_v3  ;;  %5514 = vmatprep.subr.mxu0 %v1260_v33  ;;  %v1234_v3 = vld [vmem:[%s7875_s10 + $0x8] sm:$0xff] }
 0x315   : > { %1182 = vmatprep.subr.mxu1 %v1029_v4  ;;  %5515 = vmatpush3.msra.mxu0 %v1244_v37  ;;  %v1249_v4 = vld [vmem:[%s7875_s10 + $0x80] sm:$0xff] }
 0x316   : > { %1183 = vmatpush1.msra.mxu1 %v1028_v5  ;;  %5516 = vmatprep.subr.mxu0 %v1259_v34 }
 0x317   : > { %5340 = vmatmul.mubr.msk.f32.vlgmr.msra.gmra.mxu1 %vm1142_vm11, %v1014_v7  ;;  %1536 = vmatprep.subr.mxu1 %v6099_v1  ;;  %v1233_v7 = vld [vmem:[%s7875_s10] sm:$0xff] }
 0x318   : > { %1222 = vmatprep.mubr.f32.mxu1 %v6099_v1  ;;  %5517 = vmatpush3.msra.mxu0 %v1243_v25 }
 0x319   : > { %5518 = vmatprep.subr.mxu0 %v1258_v35 }
 0x31a   : > { %5519 = vmatpush3.msra.mxu0 %v1242_v38 }
 0x31b   : > { %5341 = vmatmul.mubr.msk.f32.gmra.mxu1 %vm1142_vm11, %v1015_v8  ;;  %5520 = vmatprep.subr.mxu0 %v1257_v39 }
 0x31c   : > { %5521 = vmatpush3.msra.mxu0 %v1241_v41 }
 0x31d   : > { %5522 = vmatprep.subr.mxu0 %v1256_v42 }
 0x31e   : > { %5523 = vmatpush3.msra.mxu0 %v1240_v45 }
 0x31f   : > { %5524 = vmatprep.subr.mxu0 %v1255_v46 }
 0x320   : > { %5525 = vmatpush3.msra.mxu0 %v1239_v50 }
 0x321   : > { %5526 = vmatprep.subr.mxu0 %v1254_v52 }
 0x322   : > { %5527 = vmatpush3.msra.mxu0 %v1238_v54  ;;  %v1421_v54 = vand.u32 7, %v6238_v2 }
 0x323   : > { %5528 = vmatprep.subr.mxu0 %v1253_v55 }
 0x324   : > { %5529 = vmatpush3.msra.mxu0 %v1237_v56  ;;  %vm1432_vm7 = vcmp.ne.s32.totalorder %v1421_v54, 7  ;;  %vm1429_vm9 = vcmp.ne.s32.totalorder %v1421_v54, 0 }
 0x325   : > { %5530 = vmatprep.subr.mxu0 %v1252_v58 }
 0x326   : > { %5531 = vmatpush3.msra.mxu0 %v1236_v59 }
 0x327   : > { %5532 = vmatprep.subr.mxu0 %v1251_v60 }
 0x328   : > { %5533 = vmatpush3.msra.mxu0 %v1235_v61  ;;  %v5343_v61 = vsel %vm1432_vm7, 1.0, %v6099_v1  ;;  %vm1799_vm7 = vcmask 269312  }
 0x329   : > { %5534 = vmatprep.subr.mxu0 %v1250_v0 }
 0x32a   : > { %5535 = vmatpush3.msra.mxu0 %v1234_v3  ;;  %v6653_v3 = vsel %vm1429_vm9, 1.0, %v6099_v1  ;;  %vm2089_vm9 = vcmask 64512  }
 0x32b   : > { %5536 = vmatprep.subr.mxu0 %v1249_v4 }
 0x32c   : > { %5537 = vmatpush3.msra.mxu0 %v1233_v7 }
 0x3d7   : > { %v1218_v10 = vpop.f32.mrf.mxu1 }
 0x3d8   : > { %5995 = vtanh.f32 %v1218_v10 }
 0x3d9   : > { %v1220_v44 = vpop.f32.mrf.mxu1 }
 0x3da   : > { %5997 = vtanh.f32 %v1220_v44 }
 0x3db   : > { %v1224_v12 = vpop.f32.mrf.mxu1 }
 0x3dc   : > { %5999 = vtanh.f32 %v1224_v12 }
 0x3dd   : > { %v1226_v40 = vpop.f32.mrf.mxu1 }
 0x3de   : > { %6001 = vtanh.f32 %v1226_v40 }
 0x3e5   : > { %v6514_v13 = vpop.eup %5995 }
 0x3e6   : > { %1270 = vrot.lane.b32.xlu0 %v6514_v13, %s7873_s28 }
 0x3e7   : > { %v6518_v14 = vpop.eup %5997 }
 0x3e8   : > { %v5974_v16 = vpack.i.bf16 %v6099_v1, %v6518_v14 }
 0x3e9   : > { %v6534_v22 = vpop.eup %5999 }
 0x3ea   : > { %5975 = vrot.lane.b32.xlu1 %v5974_v16, %s7873_s28 }
 0x3eb   : > { %v6540_v28 = vpop.eup %6001 }
 0x3ec   : > { %v5979_v31 = vpack.i.bf16 %v6534_v22, %v6540_v28 }
 0x3ee   : > { %5980 = vrot.lane.b32.xlu1 %v5979_v31, %s7873_s28 }
 0x458   : > { %v1271_v44 = vpop.permute.xlu0 %1270 }
 0x45c   : > { %v5976_v5 = vpop.permute.xlu1 %5975 }
 0x45d   : > { %v5978_v8 = vunpack.i.h.bf16 %v5976_v5  ;;  %v5977_v10 = vunpack.i.l.bf16 %v5976_v5 }
 0x45f   : > { %v1280_v12 = vsel %vm7858_vm5, %v1271_v44, %v5977_v10  ;;  %v1281_v40 = vsel %vm7858_vm5, %v5977_v10, %v5978_v8  ;;  %v1293_v16 = vmax.f32 %v5978_v8, 0.0 }
 0x460   : > { %v5981_v17 = vpop.permute.xlu1 %5980  ;;  %v1288_v18 = vmax.f32 %v6514_v13, %v1280_v12  ;;  %v1289_v21 = vmax.f32 %v6518_v14, %v1281_v40 }
 0x461   : > { %v5983_v19 = vunpack.i.h.bf16 %v5981_v17  ;;  %v5982_v27 = vunpack.i.l.bf16 %v5981_v17 }
 0x462   : > { %1299 = vrot.lane.b32.xlu1 %v1288_v18, %s7871_s26  ;;  %v5984_v29 = vpack.i.bf16 %v1293_v16, %v1289_v21 }
 0x463   : > { %v1282_v31 = vsel %vm7858_vm5, %v5983_v19, %v5982_v27  ;;  %v1283_v32 = vsel %vm7858_vm5, %v5982_v27, %v5978_v8  ;;  %vm3100_vm5 = vcmask 171008  }
 0x464   : > { %5985 = vrot.lane.b32.xlu0 %v5984_v29, %s7871_s26  ;;  %v1290_v15 = vmax.f32 %v6534_v22, %v1282_v31  ;;  %v1291_v33 = vmax.f32 %v6540_v28, %v1283_v32 }
 0x466   : > { %v5989_v37 = vpack.i.bf16 %v1290_v15, %v1291_v33 }
 0x468   : > { %5990 = vrot.lane.b32.xlu0 %v5989_v37, %s7871_s26 }
 0x4d4   : > { %v1300_v25 = vpop.permute.xlu1 %1299 }
 0x4d6   : > { %v5986_v13 = vpop.permute.xlu0 %5985 }
 0x4d7   : > { %v5988_v14 = vunpack.i.h.bf16 %v5986_v13  ;;  %v5987_v34 = vunpack.i.l.bf16 %v5986_v13 }
 0x4d9   : > { %v1309_v35 = vsel %vm829_vm13, %v1300_v25, %v5987_v34  ;;  %v1310_v38 = vsel %vm829_vm13, %v5987_v34, %v5988_v14 }
 0x4da   : > { %v5991_v39 = vpop.permute.xlu0 %5990  ;;  %v1318_v41 = vmax.f32 %v1289_v21, %v1310_v38  ;;  %v1317_v42 = vmax.f32 %v1288_v18, %v1309_v35 }
 0x4db   : > { %v5993_v45 = vunpack.i.h.bf16 %v5991_v39  ;;  %v5992_v46 = vunpack.i.l.bf16 %v5991_v39 }
 0x4dc   : > { %1385 = vmatprep.mubr.f32.mxu0 %v1318_v41 }
 0x4dd   : > { %1386 = vmatmul.mubr.f32.vlgmr.msra.gmra.mxu0 %v1317_v42  ;;  %v1312_v22 = vsel %vm829_vm13, %v5992_v46, %v5988_v14  ;;  %v1311_v28 = vsel %vm829_vm13, %v5993_v45, %v5992_v46 }
 0x4de   : > { %v1320_v50 = vmax.f32 %v1291_v33, %v1312_v22  ;;  %v1319_v52 = vmax.f32 %v1290_v15, %v1311_v28 }
 0x4e0   : > { %1390 = vmatprep.mubr.f32.mxu0 %v1320_v50 }
 0x4e1   : > { %1391 = vmatmul.mubr.f32.gmra.mxu0 %v1319_v52 }
 0x59d   : > { %v5538_v55 = vpop.f32.mrf.mxu0 }
 0x59f   : > { %v5539_v56 = vpop.f32.mrf.mxu0 }
 0x5a0   : > { %v6642_v58 = vadd.f32 %v5539_v56, %v5538_v55 }
 0x5a1   : > { %v5541_v59 = vpop.f32.mrf.mxu0 }
 0x5a2   : > { %1406 = vrot.lane.b32.xlu0 %v6642_v58, %s7852_s18 }
 0x5a3   : > { %v5542_v60 = vpop.f32.mrf.mxu0 }
 0x5a4   : > { %v6647_v0 = vadd.f32 %v5542_v60, %v5541_v59 }
 0x5a6   : > { %1449 = vrot.lane.b32.xlu0 %v5343_v61, %s7854_s19  ;;  %1408 = vrot.lane.b32.xlu1 %v6647_v0, %s7852_s18  ;;  %s7881_s18 = smov 110   ;;  %s5880_s19 = smul.u32 96, %s7909_s30 }
 0x5aa   : > { %1438 = vrot.lane.b32.xlu0 %v5343_v61, %s7876_s24  ;;  %1454 = vrot.lane.b32.xlu1 %v6653_v3, %s7877_s21  ;;  %s5501_s21 = sshll.u32 %s7909_s30, 6 }
 0x5ae   : > { %1444 = vrot.lane.b32.xlu1 %v6653_v3, %s7855_s22  ;;  %s6121_s22 = smov 5  }
 0x5b2   : > { %1459 = vrot.lane.b32.xlu1 %v5343_v61, %s7878_s0  ;;  %s7882_s0 = smov 120  }
 0x614   : > { %v1407_v4 = vpop.permute.xlu0 %1406 }
 0x615   : > { %v1413_v5 = vsel %vm1412_vm6, 0.0, %v1407_v4 }
 0x616   : > { %v6663_v7 = vsel %vm1142_vm11, %v1413_v5, 0.0 }
 0x617   : > { %1510 = vrot.lane.b32.xlu1 %v6663_v7, %s7879_s1  ;;  %v1435_v56 = vmul.f32 %v6653_v3, %v6663_v7 }
 0x618   : > { %v1409_v8 = vpop.permute.xlu1 %1408  ;;  %v6679_v17 = vpop.permute.xlu0 %1449 }
 0x619   : > { %v1414_v10 = vsel %vm1412_vm6, 0.0, %v1409_v8  ;;  %v1452_v21 = vmul.f32 %v6679_v17, %v6663_v7 }
 0x61a   : > { %v6669_v44 = vsel %vm1142_vm11, %v1414_v10, 0.0 }
 0x61b   : > { %1512 = vrot.lane.b32.xlu0 %v6669_v44, %s7879_s1  ;;  %v1453_v18 = vmul.f32 %v6679_v17, %v6669_v44  ;;  %v1436_v55 = vmul.f32 %v6653_v3, %v6669_v44 }
 0x61c   : > { %v6673_v12 = vpop.permute.xlu1 %1454  ;;  %v6697_v31 = vpop.permute.xlu0 %1438 }
 0x61d   : > { %v1458_v40 = vmul.f32 %v6673_v12, %v6669_v44  ;;  %v1457_v16 = vmul.f32 %v6673_v12, %v6663_v7  ;;  %v1442_v32 = vmul.f32 %v6697_v31, %v6669_v44  ;;  %v1441_v15 = vmul.f32 %v6697_v31, %v6663_v7 }
 0x61f   : > { %1506 = vrot.lane.b32.xlu0 %v1458_v40, %s7871_s26  ;;  %1504 = vrot.lane.b32.xlu1 %v1457_v16, %s7871_s26 }
 0x620   : > { %v6687_v19 = vpop.permute.xlu1 %1444 }
 0x621   : > { %v1448_v27 = vmul.f32 %v6687_v19, %v6669_v44  ;;  %v1447_v29 = vmul.f32 %v6687_v19, %v6663_v7 }
 0x623   : > { %1498 = vrot.lane.b32.xlu0 %v1453_v18, %s6118_s2  ;;  %1496 = vrot.lane.b32.xlu1 %v1452_v21, %s6118_s2  ;;  %s6809_s2 = scalar_lea.vmem %s7883_s4, %s5880_s19  ;;  %s7890_s4 = smov 95  }
 0x624   : > { %v6707_v33 = vpop.permute.xlu1 %1459 }
 0x625   : > { %v1463_v13 = vmul.f32 %v6707_v33, %v6669_v44  ;;  %v1462_v14 = vmul.f32 %v6707_v33, %v6663_v7 }
 0x627   : > { %1490 = vrot.lane.b32.xlu0 %v6669_v44, %s7850_s27  ;;  %1488 = vrot.lane.b32.xlu1 %v6663_v7, %s7850_s27  ;;  %s6717_s27 = scalar_lea.vmem %s7880_s3, %s5501_s21  ;;  %s6124_s21 = smov 124  }
 0x628   : > { %v1397_v37 = vld [vmem:[%s6717_s27 + $0x8] sm:$0xff]  ;;  %v1396_v60 = vld [vmem:[%s6717_s27] sm:$0xff]  ;;  %v1399_v4 = vld [vmem:[%s6717_s27 + $0x18] sm:$0xff]  ;;  %s6125_s3 = smov 4  }
 0x629   : > { %5345 = vmatprep.mubr.msk.f32.mxu1 %vm672_vm4, %v1397_v37  ;;  %v1398_v5 = vld [vmem:[%s6717_s27 + $0x10] sm:$0xff]  ;;  %v1400_v8 = vld [vmem:[%s6717_s27 + $0x20] sm:$0xff]  ;;  %v1403_v10 = vld [vmem:[%s6717_s27 + $0x38] sm:$0xff] }
 0x62b   : > { %1484 = vrot.lane.b32.xlu0 %v1448_v27, %s7856_s23  ;;  %1482 = vrot.lane.b32.xlu1 %v1447_v29, %s7856_s23  ;;  %s6122_s23 = smov 6  }
 0x62f   : > { %1476 = vrot.lane.b32.xlu0 %v1442_v32, %s7872_s20  ;;  %1474 = vrot.lane.b32.xlu1 %v1441_v15, %s7872_s20 }
 0x633   : > { %1468 = vrot.lane.b32.xlu0 %v6669_v44, %s7873_s28  ;;  %1466 = vrot.lane.b32.xlu1 %v6663_v7, %s7873_s28  ;;  %v1401_v7 = vld [vmem:[%s6717_s27 + $0x28] sm:$0xff]  ;;  %v1402_v44 = vld [vmem:[%s6717_s27 + $0x30] sm:$0xff]  ;;  %s6814_s27 = sshll.u32 %s7909_s30, 5 }
 0x634   : > { %s640_s10 = scalar_lea.vmem %s7819_s6, %s6814_s27  ;;  %s635_s19 = scalar_lea.vmem %s7884_s5, %s6814_s27 }
 0x635   : > { %s7891_s5 = smov 94  }
 0x637   : > { %1520 = vrot.lane.b32.xlu0 %v1463_v13, %s7881_s18  ;;  %1518 = vrot.lane.b32.xlu1 %v1462_v14, %s7881_s18  ;;  %v1632_v14 = vld [vmem:[%s7824_s11 + $0x38] sm:$0xff] }
 0x638   : > { %5662 = vmatprep.subr.mxu0 %v1632_v14 }
 0x639   : > { %5663 = vmatpush3.msra.mxu0 %v1632_v14 }
 0x689   : > { %v1511_v34 = vpop.permute.xlu1 %1510 }
 0x68d   : > { %v1513_v25 = vpop.permute.xlu0 %1512 }
 0x68e   : > { %1537 = vmatpush1.msra.mxu1 %v1513_v25 }
 0x68f   : > { %1538 = vmatprep.subr.mxu1 %v6099_v1 }
 0x690   : > { %1539 = vmatpush1.msra.mxu1 %v1511_v34  ;;  %v1631_v34 = vld [vmem:[%s7824_s11 + $0x30] sm:$0xff] }
 0x691   : > { %v1507_v35 = vpop.permute.xlu0 %1506  ;;  %1540 = vmatprep.subr.mxu1 %v6099_v1  ;;  %v1505_v38 = vpop.permute.xlu1 %1504  ;;  %5664 = vmatprep.subr.mxu0 %v1631_v34 }
 0x692   : > { %1541 = vmatpush1.msra.mxu1 %v1507_v35  ;;  %5665 = vmatpush3.msra.mxu0 %v1631_v34  ;;  %v1792_v34 = vld [vmem:[%s640_s10 + $0x8] sm:$0xff] }
 0x693   : > { %1542 = vmatprep.subr.mxu1 %v6099_v1 }
 0x694   : > { %1543 = vmatpush1.msra.mxu1 %v1505_v38  ;;  %v1630_v38 = vld [vmem:[%s7824_s11 + $0x28] sm:$0xff] }
 0x695   : > { %v1499_v39 = vpop.permute.xlu0 %1498  ;;  %1544 = vmatprep.subr.mxu1 %v6099_v1  ;;  %v1497_v41 = vpop.permute.xlu1 %1496  ;;  %5666 = vmatprep.subr.mxu0 %v1630_v38 }
 0x696   : > { %1545 = vmatpush1.msra.mxu1 %v1499_v39  ;;  %v1629_v39 = vld [vmem:[%s7824_s11 + $0x20] sm:$0xff]  ;;  %5667 = vmatpush3.msra.mxu0 %v1630_v38 }
 0x697   : > { %1546 = vmatprep.subr.mxu1 %v6099_v1  ;;  %5668 = vmatprep.subr.mxu0 %v1629_v39  ;;  %v1791_v38 = vld [vmem:[%s640_s10] sm:$0xff] }
 0x698   : > { %1547 = vmatpush1.msra.mxu1 %v1497_v41  ;;  %5669 = vmatpush3.msra.mxu0 %v1629_v39 }
 0x699   : > { %v1491_v42 = vpop.permute.xlu0 %1490  ;;  %1548 = vmatprep.subr.mxu1 %v6099_v1  ;;  %v1489_v45 = vpop.permute.xlu1 %1488 }
 0x69a   : > { %1549 = vmatpush1.msra.mxu1 %v1491_v42 }
 0x69b   : > { %1550 = vmatprep.subr.mxu1 %v6099_v1 }
 0x69c   : > { %1551 = vmatpush1.msra.mxu1 %v1489_v45  ;;  %v1628_v45 = vld [vmem:[%s7824_s11 + $0x18] sm:$0xff] }
 0x69d   : > { %v1485_v46 = vpop.permute.xlu0 %1484  ;;  %1552 = vmatprep.subr.mxu1 %v6099_v1  ;;  %v1483_v22 = vpop.permute.xlu1 %1482  ;;  %5670 = vmatprep.subr.mxu0 %v1628_v45 }
 0x69e   : > { %1553 = vmatpush1.msra.mxu1 %v1485_v46  ;;  %5671 = vmatpush3.msra.mxu0 %v1628_v45  ;;  %v1777_v45 = vld [vmem:[%s6809_s2 + $0x10] sm:$0xff] }
 0x69f   : > { %1554 = vmatprep.subr.mxu1 %v6099_v1 }
 0x6a0   : > { %1555 = vmatpush1.msra.mxu1 %v1483_v22 }
 0x6a1   : > { %v1477_v28 = vpop.permute.xlu0 %1476  ;;  %1556 = vmatprep.subr.mxu1 %v6099_v1  ;;  %v1475_v50 = vpop.permute.xlu1 %1474 }
 0x6a2   : > { %1557 = vmatpush1.msra.mxu1 %v1477_v28  ;;  %v1627_v28 = vld [vmem:[%s7824_s11 + $0x10] sm:$0xff] }
 0x6a3   : > { %1558 = vmatprep.subr.mxu1 %v6099_v1  ;;  %5672 = vmatprep.subr.mxu0 %v1627_v28 }
 0x6a4   : > { %1559 = vmatpush1.msra.mxu1 %v1475_v50  ;;  %v1626_v50 = vld [vmem:[%s7824_s11 + $0x8] sm:$0xff]  ;;  %5673 = vmatpush3.msra.mxu0 %v1627_v28 }
 0x6a5   : > { %v1469_v52 = vpop.permute.xlu0 %1468  ;;  %1560 = vmatprep.subr.mxu1 %v6099_v1  ;;  %v1467_v54 = vpop.permute.xlu1 %1466  ;;  %5674 = vmatprep.subr.mxu0 %v1626_v50  ;;  %v1780_v28 = vld [vmem:[%s6809_s2 + $0x28] sm:$0xff] }
 0x6a6   : > { %1561 = vmatpush1.msra.mxu1 %v1469_v52  ;;  %5675 = vmatpush3.msra.mxu0 %v1626_v50  ;;  %v1625_v52 = vld [vmem:[%s7824_s11] sm:$0xff]  ;;  %v1781_v50 = vld [vmem:[%s6809_s2 + $0x30] sm:$0xff] }
 0x6a7   : > { %1562 = vmatprep.subr.mxu1 %v6099_v1  ;;  %5676 = vmatprep.subr.mxu0 %v1625_v52 }
 0x6a8   : > { %1563 = vmatpush1.msra.mxu1 %v1467_v54  ;;  %5677 = vmatpush3.msra.mxu0 %v1625_v52  ;;  %v1782_v52 = vld [vmem:[%s6809_s2 + $0x38] sm:$0xff] }
 0x6a9   : > { %1564 = vmatprep.subr.mxu1 %v6099_v1  ;;  %v1521_v59 = vpop.permute.xlu0 %1520  ;;  %v1519_v61 = vpop.permute.xlu1 %1518  ;;  %5684 = vmatprep.subr.msk.mxu0 %vm916_vm1, %v6114_v49 }
 0x6aa   : > { %1565 = vmatpush1.msra.mxu1 %v1436_v55 }
 0x6ab   : > { %1566 = vmatprep.subr.mxu1 %v6099_v1 }
 0x6ac   : > { %1567 = vmatpush1.msra.mxu1 %v1435_v56 }
 0x6ad   : > { %1594 = vmatprep.subr.mxu1 %v6099_v1 }
 0x6ae   : > { %5344 = vmatpush2.msk.msra.mxu1 %vm916_vm1, %v6114_v49 }
 0x6af   : > { %1596 = vmatprep.subr.mxu1 %v6099_v1 }
 0x6b0   : > { %1597 = vmatpush2.msra.mxu1 %v1521_v59 }
 0x6b1   : > { %1598 = vmatprep.subr.mxu1 %v6099_v1 }
 0x6b2   : > { %1599 = vmatpush2.msra.mxu1 %v1519_v61 }
 0x6b3   : > { %1601 = vmatmul.mubr.f32.vlgmr.msra.gmra.mxu1 %v1396_v60 }
 0x6b4   : > { %5346 = vmatprep.mubr.msk.f32.mxu1 %vm672_vm4, %v1399_v4 }
 0x6b7   : > { %1606 = vmatmul.mubr.f32.gmra.mxu1 %v1398_v5 }
 0x6b8   : > { %5347 = vmatprep.mubr.msk.f32.mxu1 %vm672_vm4, %v1401_v7 }
 0x6bb   : > { %1611 = vmatmul.mubr.f32.gmra.mxu1 %v1400_v8 }
 0x6bc   : > { %5348 = vmatprep.mubr.msk.f32.mxu1 %vm672_vm4, %v1403_v10 }
 0x6bf   : > { %1616 = vmatmul.mubr.f32.gmra.mxu1 %v1402_v44 }
 0x773   : > { %v1602_v40 = vpop.f32.mrf.mxu1 }
 0x774   : > { %6003 = vtanh.f32 %v1602_v40 }
 0x775   : > { %v1604_v16 = vpop.f32.mrf.mxu1 }
 0x777   : > { %v1607_v18 = vpop.f32.mrf.mxu1 }
 0x778   : > { %6005 = vtanh.f32 %v1607_v18 }
 0x779   : > { %v1609_v21 = vpop.f32.mrf.mxu1 }
 0x77b   : > { %v1612_v27 = vpop.f32.mrf.mxu1 }
 0x77c   : > { %6007 = vtanh.f32 %v1612_v27  ;;  %v1775_v27 = vld [vmem:[%s6809_s2] sm:$0xff] }
 0x77d   : > { %v1614_v29 = vpop.f32.mrf.mxu1 }
 0x77f   : > { %v1617_v32 = vpop.f32.mrf.mxu1 }
 0x780   : > { %6009 = vtanh.f32 %v1617_v32 }
 0x781   : > { %v6004_v15 = vpop.eup %6003  ;;  %v1619_v37 = vpop.f32.mrf.mxu1 }
 0x782   : > { %v1634_v13 = vsel %vm1633_vm12, %v6004_v15, 0.0  ;;  %v1794_v15 = vld [vmem:[%s640_s10 + $0x18] sm:$0xff] }
 0x783   : > { %1642 = vrot.lane.b32.xlu0 %v1634_v13, %s7873_s28 }
 0x785   : > { %v6006_v25 = vpop.eup %6005 }
 0x786   : > { %v1635_v35 = vsel %vm1633_vm12, %v6006_v25, 0.0 }
 0x787   : > { %1644 = vrot.lane.b32.xlu1 %v1635_v35, %s7873_s28 }
 0x789   : > { %v6008_v41 = vpop.eup %6007 }
 0x78a   : > { %v1636_v42 = vsel %vm1633_vm12, %v6008_v41, 0.0 }
 0x78b   : > { %1646 = vrot.lane.b32.xlu0 %v1636_v42, %s7873_s28 }
 0x78d   : > { %v6010_v46 = vpop.eup %6009 }
 0x78e   : > { %v1637_v22 = vsel %vm1633_vm12, %v6010_v46, 0.0  ;;  %v1778_v46 = vld [vmem:[%s6809_s2 + $0x18] sm:$0xff] }
 0x78f   : > { %1648 = vrot.lane.b32.xlu1 %v1637_v22, %s7873_s28 }
 0x7f5   : > { %v1643_v54 = vpop.permute.xlu0 %1642 }
 0x7f6   : > { %v1654_v55 = vmax.f32 %v1634_v13, %v1643_v54  ;;  %v1793_v13 = vld [vmem:[%s640_s10 + $0x10] sm:$0xff]  ;;  %v1783_v54 = vld [vmem:[%s6809_s2 + $0x40] sm:$0xff]  ;;  %s5504_s10 = sshll.u32 %s7909_s30, 7 }
 0x7f8   : > { %1662 = vrot.lane.b32.xlu0 %v1654_v55, %s7882_s0 }
 0x7f9   : > { %v1645_v56 = vpop.permute.xlu1 %1644 }
 0x7fa   : > { %v1655_v59 = vmax.f32 %v1635_v35, %v1645_v56  ;;  %v1785_v56 = vld [vmem:[%s6809_s2 + $0x50] sm:$0xff] }
 0x7fc   : > { %1664 = vrot.lane.b32.xlu1 %v1655_v59, %s7882_s0 }
 0x7fd   : > { %v1647_v60 = vpop.permute.xlu0 %1646 }
 0x7fe   : > { %v1656_v61 = vmax.f32 %v1636_v42, %v1647_v60  ;;  %v1776_v42 = vld [vmem:[%s6809_s2 + $0x8] sm:$0xff] }
 0x800   : > { %1666 = vrot.lane.b32.xlu0 %v1656_v61, %s7882_s0 }
 0x801   : > { %v1649_v4 = vpop.permute.xlu1 %1648 }
 0x802   : > { %v1657_v5 = vmax.f32 %v1637_v22, %v1649_v4  ;;  %v1779_v22 = vld [vmem:[%s6809_s2 + $0x20] sm:$0xff] }
 0x804   : > { %1668 = vrot.lane.b32.xlu1 %v1657_v5, %s7882_s0 }
 0x86a   : > { %v1663_v7 = vpop.permute.xlu0 %1662 }
 0x86b   : > { %v1674_v8 = vmax.f32 %v1654_v55, %v1663_v7  ;;  %v1784_v55 = vld [vmem:[%s6809_s2 + $0x48] sm:$0xff] }
 0x86d   : > { %5678 = vmatprep.mubr.msk.f32.mxu0 %vm1633_vm12, %v1674_v8 }
 0x86e   : > { %v1665_v10 = vpop.permute.xlu1 %1664 }
 0x86f   : > { %v1675_v44 = vmax.f32 %v1655_v59, %v1665_v10  ;;  %v1786_v59 = vld [vmem:[%s6809_s2 + $0x58] sm:$0xff]  ;;  %s7885_s2 = smov 8  }
 0x871   : > { %5679 = vmatmul.mubr.msk.f32.vlgmr.msra.gmra.mxu0 %vm1633_vm12, %v1675_v44 }
 0x872   : > { %v1667_v40 = vpop.permute.xlu0 %1666  ;;  %5685 = vmatpush3.msk.msra.mxu0 %vm916_vm1, %v6114_v49 }
 0x873   : > { %v1676_v16 = vmax.f32 %v1656_v61, %v1667_v40 }
 0x875   : > { %5681 = vmatprep.mubr.msk.f32.mxu0 %vm1633_vm12, %v1676_v16 }
 0x876   : > { %v1669_v18 = vpop.permute.xlu1 %1668 }
 0x877   : > { %v1677_v21 = vmax.f32 %v1657_v5, %v1669_v18 }
 0x879   : > { %5682 = vmatmul.mubr.msk.f32.gmra.mxu0 %vm1633_vm12, %v1677_v21 }
 0x87a   : > { %5694 = vmatprep.mubr.msk.f32.mxu0 %vm1799_vm7, %v1775_v27 }
 0x931   : > { %v6816_v29 = vpop.f32.mrf.mxu0 }
 0x932   : > { %v6837_v39 = vadd.f32 %v6816_v29, %v1792_v34 }
 0x933   : > { %v6822_v32 = vpop.f32.mrf.mxu0 }
 0x934   : > { %v6842_v41 = vadd.f32 %v1791_v38, %v6822_v32 }
 0x939   : > { %v6824_v37 = vpop.f32.mrf.mxu0 }
 0x93a   : > { %v6827_v14 = vadd.f32 %v6824_v37, %v1794_v15 }
 0x93b   : > { %v6829_v25 = vpop.f32.mrf.mxu0 }
 0x93c   : > { %v6832_v35 = vadd.f32 %v1793_v13, %v6829_v25  ;;  %5686 = vmatprep.subr.mxu0 %v6827_v14 }
 0x93d   : > { %5687 = vmatpush3.msra.mxu0 %v6827_v14 }
 0x93e   : > { %5688 = vmatprep.subr.mxu0 %v6832_v35 }
 0x93f   : > { %5689 = vmatpush3.msra.mxu0 %v6832_v35 }
 0x940   : > { %5690 = vmatprep.subr.mxu0 %v6837_v39 }
 0x941   : > { %5691 = vmatpush3.msra.mxu0 %v6837_v39 }
 0x942   : > { %5692 = vmatprep.subr.mxu0 %v6842_v41 }
 0x943   : > { %5693 = vmatpush3.msra.mxu0 %v6842_v41 }
 0x944   : > { %5695 = vmatmul.mubr.msk.f32.vlgmr.msra.gmra.mxu0 %vm1799_vm7, %v1776_v42 }
 0x945   : > { %5697 = vmatprep.mubr.msk.f32.mxu0 %vm1799_vm7, %v1777_v45 }
 0x948   : > { %5698 = vmatmul.mubr.msk.f32.gmra.mxu0 %vm1799_vm7, %v1778_v46 }
 0x949   : > { %5700 = vmatprep.mubr.msk.f32.mxu0 %vm1799_vm7, %v1779_v22 }
 0x94c   : > { %5701 = vmatmul.mubr.msk.f32.gmra.mxu0 %vm1799_vm7, %v1780_v28 }
 0x94d   : > { %5703 = vmatprep.mubr.msk.f32.mxu0 %vm1799_vm7, %v1781_v50 }
 0x950   : > { %5704 = vmatmul.mubr.msk.f32.gmra.mxu0 %vm1799_vm7, %v1782_v52 }
 0x951   : > { %5706 = vmatprep.mubr.msk.f32.mxu0 %vm1799_vm7, %v1783_v54 }
 0x954   : > { %5707 = vmatmul.mubr.msk.f32.gmra.mxu0 %vm1799_vm7, %v1784_v55 }
 0x955   : > { %5709 = vmatprep.mubr.msk.f32.mxu0 %vm1799_vm7, %v1785_v56 }
 0x958   : > { %5710 = vmatmul.mubr.msk.f32.gmra.mxu0 %vm1799_vm7, %v1786_v59 }
 0xa04   : > { %v5696_v60 = vpop.f32.mrf.mxu0 }
 0xa05   : > { %1993 = vxpose.xlu1.b32.start.end [1/1] (short) (narrow) %v5696_v60, 16 }
 0xa06   : > { %v1902_v61 = vpop.f32.mrf.mxu0 }
 0xa07   : > { %1961 = vxpose.xlu0.b32.start.end [1/1] (short) (narrow) %v1902_v61, 16 }
 0xa08   : > { %v5699_v4 = vpop.f32.mrf.mxu0 }
 0xa0a   : > { %v1912_v5 = vpop.f32.mrf.mxu0 }
 0xa0c   : > { %2025 = vxpose.xlu0.b32.start.end [1/1] (short) (narrow) %v1912_v5, 16  ;;  %v5702_v7 = vpop.f32.mrf.mxu0 }
 0xa0e   : > { %v1922_v8 = vpop.f32.mrf.mxu0 }
 0xa0f   : > { %5712 = vmatprep.subr.mxu0 %v1922_v8 }
 0xa10   : > { %5713 = vmatpush3.msra.mxu0 %v1922_v8  ;;  %v5705_v10 = vpop.f32.mrf.mxu0 }
 0xa11   : > { %2057 = vxpose.xlu0.b32.start.end [1/1] (short) (narrow) %v5699_v4, 16  ;;  %5717 = vmatprep.subr.mxu0 %v5702_v7 }
 0xa12   : > { %v1932_v44 = vpop.f32.mrf.mxu0 }
 0xa13   : > { %5722 = vmatprep.subr.mxu1 %v1932_v44 }
 0xa14   : > { %5723 = vmatpush3.msra.mxu1 %v1932_v44  ;;  %v5708_v40 = vpop.f32.mrf.mxu0 }
 0xa15   : > { %5727 = vmatprep.subr.mxu1 %v5705_v10 }
 0xa16   : > { %v1942_v16 = vpop.f32.mrf.mxu0 }
 0xa18   : > { %v6871_v15 = vpop.f32.mrf.mxu0 }
 0xa1a   : > { %v6876_v38 = vpop.f32.mrf.mxu0 }
 0xa81   : > { %v2009_v21 = vpop.trf.xlu1 }
 0xa83   : > { %v1977_v18 = vpop.trf.xlu0 }
 0xa84   : > { %5714 = vmatprep.mubr.msk.f32.mxu0 %vm2089_vm9, %v1977_v18 }
 0xa85   : > { %v2010_v13 = vpop.trf.xlu1 }
 0xa87   : > { %v1978_v27 = vpop.trf.xlu0 }
 0xa88   : > { %5715 = vmatmul.mubr.msk.f32.vlgmr.msra.gmra.mxu0 %vm2089_vm9, %v1978_v27 }
 0xa89   : > { %5718 = vmatpush3.msra.mxu0 %v5702_v7  ;;  %5719 = vmatprep.mubr.msk.f32.mxu0 %vm2089_vm9, %v2009_v21 }
 0xa8a   : > { %5732 = vmatprep.subr.msk.mxu0 %vm740_vm8, %v1942_v16 }
 0xa8b   : > { %v2041_v34 = vpop.trf.xlu0 }
 0xa8c   : > { %5720 = vmatmul.mubr.msk.f32.vlgmr.msra.gmra.mxu0 %vm2089_vm9, %v2010_v13  ;;  %5724 = vmatprep.mubr.msk.f32.mxu1 %vm2089_vm9, %v2041_v34 }
 0xa8d   : > { %5733 = vmatpush3.xpose.msk.msra.mxu0 %vm740_vm8, %v1942_v16 }
 0xa8e   : > { %5742 = vmatprep.subr.msk.mxu0 %vm740_vm8, %v6876_v38 }
 0xa8f   : > { %v2042_v42 = vpop.trf.xlu0 }
 0xa90   : > { %5725 = vmatmul.mubr.msk.f32.vlgmr.msra.gmra.mxu1 %vm2089_vm9, %v2042_v42 }
 0xa91   : > { %5728 = vmatpush3.msra.mxu1 %v5705_v10 }
 0xa92   : > { %5737 = vmatprep.subr.msk.mxu1 %vm740_vm8, %v5708_v40 }
 0xa93   : > { %v2073_v45 = vpop.trf.xlu0 }
 0xa94   : > { %5729 = vmatprep.mubr.msk.f32.mxu1 %vm2089_vm9, %v2073_v45 }
 0xa97   : > { %v2074_v46 = vpop.trf.xlu0 }
 0xa98   : > { %5730 = vmatmul.mubr.msk.f32.vlgmr.msra.gmra.mxu1 %vm2089_vm9, %v2074_v46 }
 0xa99   : > { %5738 = vmatpush3.xpose.msk.msra.mxu1 %vm740_vm8, %v5708_v40 }
 0xa9a   : > { %5747 = vmatprep.subr.msk.mxu1 %vm740_vm8, %v6871_v15 }
 0xb48   : > { %v5716_v22 = vpop.f32.mrf.mxu0 }
 0xb49   : > { %v2415_v28 = vmul.f32 0.35355338, %v5716_v22 }
 0xb4a   : > { %v2162_v50 = vpop.f32.mrf.mxu0 }
 0xb4b   : > { %v2414_v52 = vmul.f32 0.35355338, %v2162_v50  ;;  %v2425_v54 = vsel %vm740_vm8, %v2415_v28, -inf }
 0xb4c   : > { %2426 = vmax.xlane.f32.xlu1 %v2425_v54  ;;  %v5721_v55 = vpop.f32.mrf.mxu0 }
 0xb4d   : > { %v2417_v56 = vmul.f32 0.35355338, %v5721_v55  ;;  %v2422_v61 = vsel %vm740_vm8, %v2414_v52, -inf }
 0xb4e   : > { %v2243_v59 = vpop.f32.mrf.mxu0 }
 0xb4f   : > { %v2416_v60 = vmul.f32 0.35355338, %v2243_v59  ;;  %v2431_v5 = vsel %vm740_vm8, %v2417_v56, -inf }
 0xb50   : > { %2423 = vmax.xlane.f32.xlu1 %v2422_v61  ;;  %v5726_v7 = vpop.f32.mrf.mxu1 }
 0xb51   : > { %v2428_v4 = vsel %vm740_vm8, %v2416_v60, -inf  ;;  %v2419_v16 = vmul.f32 0.35355338, %v5726_v7 }
 0xb52   : > { %2429 = vmax.xlane.f32.xlu0 %v2428_v4  ;;  %v2324_v8 = vpop.f32.mrf.mxu1 }
 0xb53   : > { %v2418_v27 = vmul.f32 0.35355338, %v2324_v8  ;;  %v2437_v34 = vsel %vm740_vm8, %v2419_v16, -inf }
 0xb54   : > { %2432 = vmax.xlane.f32.xlu1 %v2431_v5 }
 0xb55   : > { %v2434_v42 = vsel %vm740_vm8, %v2418_v27, -inf }
 0xb58   : > { %v5731_v10 = vpop.f32.mrf.mxu1 }
 0xb59   : > { %v2421_v44 = vmul.f32 0.35355338, %v5731_v10 }
 0xb5a   : > { %v2405_v40 = vpop.f32.mrf.mxu1 }
 0xb5b   : > { %v2420_v18 = vmul.f32 0.35355338, %v2405_v40  ;;  %v2443_v21 = vsel %vm740_vm8, %v2421_v44, -inf }
 0xb5c   : > { %2444 = vmax.xlane.f32.xlu1 %v2443_v21 }
 0xb5d   : > { %v2440_v13 = vsel %vm740_vm8, %v2420_v18, -inf }
 0xb5e   : > { %2441 = vmax.xlane.f32.xlu0 %v2440_v13 }
 0xb60   : > { %2438 = vmax.xlane.f32.xlu1 %v2437_v34 }
 0xb62   : > { %2435 = vmax.xlane.f32.xlu0 %v2434_v42 }
 0xbd5   : > { %v2427_v45 = vpop.xlane.xlu1 %2426 }
 0xbd6   : > { %v2447_v46 = vsub.f32 %v2415_v28, %v2427_v45 }
 0xbd8   : > { %v2456_v22 = vmul.f32 1.442695, %v2447_v46 }
 0xbd9   : > { %v2424_v50 = vpop.xlane.xlu1 %2423 }
 0xbda   : > { %6011 = vpow2.f32 %v2456_v22  ;;  %v2446_v54 = vsub.f32 %v2414_v52, %v2424_v50 }
 0xbdb   : > { %v2430_v55 = vpop.xlane.xlu0 %2429 }
 0xbdc   : > { %v2454_v59 = vmul.f32 1.442695, %v2446_v54  ;;  %v2448_v61 = vsub.f32 %v2416_v60, %v2430_v55 }
 0xbdd   : > { %v2433_v4 = vpop.xlane.xlu1 %2432 }
 0xbde   : > { %6013 = vpow2.f32 %v2454_v59  ;;  %v2458_v5 = vmul.f32 1.442695, %v2448_v61  ;;  %v2449_v7 = vsub.f32 %v2417_v56, %v2433_v4 }
 0xbe0   : > { %6015 = vpow2.f32 %v2458_v5  ;;  %v2460_v8 = vmul.f32 1.442695, %v2449_v7 }
 0xbe2   : > { %6017 = vpow2.f32 %v2460_v8 }
 0xbe5   : > { %v2445_v10 = vpop.xlane.xlu1 %2444 }
 0xbe6   : > { %v2453_v40 = vsub.f32 %v2421_v44, %v2445_v10 }
 0xbe7   : > { %v6012_v21 = vpop.eup %6011  ;;  %v2442_v13 = vpop.xlane.xlu0 %2441 }
 0xbe8   : > { %v2468_v34 = vmul.f32 1.442695, %v2453_v40  ;;  %v2452_v28 = vsub.f32 %v2420_v18, %v2442_v13  ;;  %v2473_v42 = vsel %vm740_vm8, %v6012_v21, 0.0 }
 0xbe9   : > { %2474 = vadd.xlane.f32.xlu1 %v2473_v42  ;;  %v2439_v52 = vpop.xlane.xlu1 %2438 }
 0xbea   : > { %6019 = vpow2.f32 %v2468_v34  ;;  %v2466_v45 = vmul.f32 1.442695, %v2452_v28  ;;  %v2451_v60 = vsub.f32 %v2419_v16, %v2439_v52 }
 0xbeb   : > { %v6014_v46 = vpop.eup %6013  ;;  %v2436_v22 = vpop.xlane.xlu0 %2435 }
 0xbec   : > { %6021 = vpow2.f32 %v2466_v45  ;;  %v2464_v56 = vmul.f32 1.442695, %v2451_v60  ;;  %v2450_v50 = vsub.f32 %v2418_v27, %v2436_v22  ;;  %v2470_v54 = vsel %vm740_vm8, %v6014_v46, 0.0 }
 0xbed   : > { %v6016_v55 = vpop.eup %6015  ;;  %2471 = vadd.xlane.f32.xlu0 %v2470_v54 }
 0xbee   : > { %6023 = vpow2.f32 %v2464_v56  ;;  %v2462_v44 = vmul.f32 1.442695, %v2450_v50  ;;  %v2476_v61 = vsel %vm740_vm8, %v6016_v55, 0.0 }
 0xbef   : > { %v6018_v59 = vpop.eup %6017 }
 0xbf0   : > { %6025 = vpow2.f32 %v2462_v44  ;;  %v2479_v18 = vsel %vm740_vm8, %v6018_v59, 0.0 }
 0xbf1   : > { %2480 = vadd.xlane.f32.xlu1 %v2479_v18  ;;  %2477 = vadd.xlane.f32.xlu0 %v2476_v61 }
 0xbf7   : > { %v6020_v16 = vpop.eup %6019 }
 0xbf8   : > { %v2491_v4 = vsel %vm740_vm8, %v6020_v16, 0.0 }
 0xbf9   : > { %v6022_v5 = vpop.eup %6021  ;;  %2492 = vadd.xlane.f32.xlu1 %v2491_v4 }
 0xbfa   : > { %v2488_v27 = vsel %vm740_vm8, %v6022_v5, 0.0 }
 0xbfb   : > { %v6024_v7 = vpop.eup %6023  ;;  %2489 = vadd.xlane.f32.xlu0 %v2488_v27 }
 0xbfc   : > { %v2485_v8 = vsel %vm740_vm8, %v6024_v7, 0.0 }
 0xbfd   : > { %v6026_v10 = vpop.eup %6025  ;;  %2486 = vadd.xlane.f32.xlu1 %v2485_v8 }
 0xbfe   : > { %v2482_v40 = vsel %vm740_vm8, %v6026_v10, 0.0 }
 0xbff   : > { %2483 = vadd.xlane.f32.xlu0 %v2482_v40 }
 0xc72   : > { %v2475_v13 = vpop.xlane.xlu1 %2474 }
 0xc73   : > { %6027 = vrcp.f32 %v2475_v13 }
 0xc76   : > { %v2472_v34 = vpop.xlane.xlu0 %2471 }
 0xc77   : > { %6029 = vrcp.f32 %v2472_v34 }
 0xc7a   : > { %v2481_v28 = vpop.xlane.xlu1 %2480  ;;  %v2478_v42 = vpop.xlane.xlu0 %2477 }
 0xc7b   : > { %6031 = vrcp.f32 %v2481_v28 }
 0xc7c   : > { %6033 = vrcp.f32 %v2478_v42 }
 0xc80   : > { %v6028_v45 = vpop.eup %6027 }
 0xc81   : > { %v2503_v54 = vmul.f32 %v6028_v45, %v6012_v21 }
 0xc82   : > { %v2493_v52 = vpop.xlane.xlu1 %2492 }
 0xc83   : > { %6035 = vrcp.f32 %v2493_v52 }
 0xc84   : > { %v6030_v60 = vpop.eup %6029  ;;  %v2490_v22 = vpop.xlane.xlu0 %2489 }
 0xc85   : > { %6037 = vrcp.f32 %v2490_v22  ;;  %v2502_v56 = vmul.f32 %v6030_v60, %v6014_v46 }
 0xc86   : > { %v2487_v50 = vpop.xlane.xlu1 %2486 }
 0xc87   : > { %5734 = vmatprep.mubr.msk.f32.mxu0 %vm740_vm8, %v2502_v56  ;;  %6039 = vrcp.f32 %v2487_v50  ;;  %v1788_v50 = vld [vmem:[%s635_s19 + $0x8] sm:$0xff] }
 0xc88   : > { %v6032_v44 = vpop.eup %6031  ;;  %5735 = vmatmul.mubr.msk.f32.vlgmr.msra.gmra.mxu0 %vm740_vm8, %v2503_v54  ;;  %v2484_v18 = vpop.xlane.xlu0 %2483  ;;  %v1789_v54 = vld [vmem:[%s635_s19 + $0x10] sm:$0xff] }
 0xc89   : > { %v6034_v61 = vpop.eup %6033  ;;  %5743 = vmatpush3.xpose.msk.msra.mxu0 %vm740_vm8, %v6876_v38  ;;  %6041 = vrcp.f32 %v2484_v18  ;;  %v2505_v4 = vmul.f32 %v6032_v44, %v6018_v59  ;;  %v1790_v44 = vld [vmem:[%s635_s19 + $0x18] sm:$0xff] }
 0xc8a   : > { %v2504_v27 = vmul.f32 %v6034_v61, %v6016_v55  ;;  %5752 = vmatprep.subr.msk.mxu0 %vm916_vm1, %v6114_v49 }
 0xc8c   : > { %5739 = vmatprep.mubr.msk.f32.mxu1 %vm740_vm8, %v2504_v27 }
 0xc8d   : > { %5740 = vmatmul.mubr.msk.f32.vlgmr.msra.gmra.mxu1 %vm740_vm8, %v2505_v4  ;;  %v3109_v4 = vand.u32 3, %v6238_v2 }
 0xc8e   : > { %5748 = vmatpush3.xpose.msk.msra.mxu1 %vm740_vm8, %v6871_v15 }
 0xc8f   : > { %3190 = vmatprep.subr.mxu1 %v6099_v1  ;;  %vm3120_vm9 = vcmp.ne.s32.totalorder %v3109_v4, 3 }
 0xc90   : > { %v6036_v21 = vpop.eup %6035 }
 0xc91   : > { %v2509_v40 = vmul.f32 %v6036_v21, %v6020_v16 }
 0xc92   : > { %v6038_v46 = vpop.eup %6037 }
 0xc93   : > { %v2508_v8 = vmul.f32 %v6038_v46, %v6022_v5 }
 0xc94   : > { %v6040_v38 = vpop.eup %6039 }
 0xc95   : > { %5749 = vmatprep.mubr.msk.f32.mxu1 %vm740_vm8, %v2508_v8  ;;  %v2507_v13 = vmul.f32 %v6040_v38, %v6024_v7  ;;  %v1787_v7 = vld [vmem:[%s635_s19] sm:$0xff]  ;;  %s7888_s19 = smov 119  }
 0xc96   : > { %v6042_v55 = vpop.eup %6041  ;;  %5750 = vmatmul.mubr.msk.f32.vlgmr.msra.gmra.mxu1 %vm740_vm8, %v2509_v40 }
 0xc97   : > { %v2506_v59 = vmul.f32 %v6042_v55, %v6026_v10  ;;  %v6938_v55 = vsel %vm3120_vm9, 1.0, %v6099_v1  ;;  %vm3095_vm9 = vcmask 39936  }
 0xc99   : > { %5744 = vmatprep.mubr.msk.f32.mxu0 %vm740_vm8, %v2506_v59 }
 0xc9a   : > { %5745 = vmatmul.mubr.msk.f32.vlgmr.msra.gmra.mxu0 %vm740_vm8, %v2507_v13 }
 0xc9b   : > { %5753 = vmatpush3.msk.msra.mxu0 %vm916_vm1, %v6114_v49  ;;  %5762 = vmatprep.mubr.msk.f32.mxu0 %vm1799_vm7, %v1787_v7 }
 0xd48   : > { %v5736_v16 = vpop.f32.mrf.mxu0 }
 0xd4a   : > { %v2585_v28 = vpop.f32.mrf.mxu0 }
 0xd4d   : > { %v5741_v15 = vpop.f32.mrf.mxu1 }
 0xd4f   : > { %v2669_v34 = vpop.f32.mrf.mxu1 }
 0xd50   : > { %2878 = vxpose.xlu0.b32.start [1/2] (short) (narrow) %v2669_v34, 8 }
 0xd54   : > { %2879 = vxpose.xlu0.b32.end [2/2] (short) (narrow) %v5741_v15, 8 }
 0xd56   : > { %v5751_v5 = vpop.f32.mrf.mxu1 }
 0xd58   : > { %v2837_v42 = vpop.f32.mrf.mxu1 }
 0xd59   : > { %2942 = vxpose.xlu0.b32.start [1/2] (short) (narrow) %v2837_v42, 8 }
 0xd5a   : > { %v5746_v52 = vpop.f32.mrf.mxu0 }
 0xd5c   : > { %v2753_v10 = vpop.f32.mrf.mxu0 }
 0xd5d   : > { %2943 = vxpose.xlu0.b32.end [2/2] (short) (narrow) %v5751_v5, 8  ;;  %2910 = vxpose.xlu1.b32.start [1/2] (short) (narrow) %v2753_v10, 8 }
 0xd61   : > { %2846 = vxpose.xlu0.b32.start [1/2] (short) (narrow) %v2585_v28, 8  ;;  %2911 = vxpose.xlu1.b32.end [2/2] (short) (narrow) %v5746_v52, 8 }
 0xd65   : > { %2847 = vxpose.xlu0.b32.end [2/2] (short) (narrow) %v5736_v16, 8 }
 0xdcc   : > { %v2894_v45 = vpop.trf.xlu0 }
 0xdd5   : > { %v2958_v60 = vpop.trf.xlu0 }
 0xdd6   : > { %5754 = vmatprep.subr.mxu0 %v2958_v60 }
 0xdd7   : > { %5755 = vmatpush3.msra.mxu0 %v2958_v60 }
 0xdd9   : > { %v2926_v22 = vpop.trf.xlu1 }
 0xdda   : > { %5756 = vmatprep.subr.mxu0 %v2926_v22 }
 0xddb   : > { %5757 = vmatpush3.msra.mxu0 %v2926_v22 }
 0xddc   : > { %5758 = vmatprep.subr.mxu0 %v2894_v45 }
 0xddd   : > { %5759 = vmatpush3.msra.mxu0 %v2894_v45  ;;  %v2862_v56 = vpop.trf.xlu0 }
 0xdde   : > { %5760 = vmatprep.subr.mxu0 %v2862_v56 }
 0xddf   : > { %5761 = vmatpush3.msra.mxu0 %v2862_v56 }
 0xde0   : > { %5763 = vmatmul.mubr.msk.f32.vlgmr.msra.gmra.mxu0 %vm1799_vm7, %v1788_v50  ;;  %3365 = vmatprep.subr.mxu0 %v6099_v1 }
 0xde1   : > { %5765 = vmatprep.mubr.msk.f32.mxu0 %vm1799_vm7, %v1789_v54 }
 0xde4   : > { %5766 = vmatmul.mubr.msk.f32.gmra.mxu0 %vm1799_vm7, %v1790_v44  ;;  %vm3117_vm7 = vcmp.ne.s32.totalorder %v3109_v4, 0 }
 0xea0   : > { %v5764_v18 = vpop.f32.mrf.mxu0 }
 0xea1   : > { %v3072_v59 = vadd.f32 %v5764_v18, %v6837_v39 }
 0xea2   : > { %v3052_v61 = vpop.f32.mrf.mxu0 }
 0xea3   : > { %v3076_v2 = vadd.f32 %v6816_v29, %v3072_v59 }
 0xea4   : > { %v5767_v27 = vpop.f32.mrf.mxu0 }
 0xea5   : > { %v3074_v21 = vadd.f32 %v5767_v27, %v6827_v14 }
 0xea6   : > { %v3062_v46 = vpop.f32.mrf.mxu0 }
 0xea7   : > { %v3078_v8 = vadd.f32 %v6824_v37, %v3074_v21  ;;  %v3073_v40 = vadd.f32 %v3062_v46, %v6832_v35  ;;  %v3071_v37 = vadd.f32 %v3052_v61, %v6842_v41 }
 0xea9   : > { %v3077_v38 = vadd.f32 %v3073_v40, %v6829_v25  ;;  %3089 = vrot.lane.b32.xlu1 %v3078_v8, %s6121_s22  ;;  %v3075_v14 = vadd.f32 %v3071_v37, %v6822_v32  ;;  %v6948_v25 = vsel %vm3117_vm7, 1.0, %v6099_v1 }
 0xeab   : > { %3087 = vrot.lane.b32.xlu0 %v3077_v38, %s6121_s22 }
 0xead   : > { %3275 = vrot.lane.b32.xlu1 %v6938_v55, %s6122_s23  ;;  %s7054_s23 = scalar_lea.vmem %s7820_s7, %s5504_s10 }
 0xeb1   : > { %3085 = vrot.lane.b32.xlu1 %v3076_v2, %s6121_s22 }
 0xeb5   : > { %3083 = vrot.lane.b32.xlu1 %v3075_v14, %s6121_s22 }
 0xeb9   : > { %3268 = vrot.lane.b32.xlu1 %v6938_v55, %s7876_s24  ;;  %s6123_s24 = smov 123  }
 0xebd   : > { %3605 = vrot.lane.b32.xlu1 %v6948_v25, %s7885_s2  ;;  %s7886_s2 = smov 10  }
 0xf1b   : > { %v3090_v35 = vpop.permute.xlu1 %3089 }
 0xf1c   : > { %v3099_v29 = vsel %vm3095_vm9, 0.0, %v3090_v35 }
 0xf1d   : > { %v3088_v39 = vpop.permute.xlu0 %3087  ;;  %v6955_v32 = vsel %vm3100_vm5, %v3099_v29, 0.0 }
 0xf1e   : > { %v3098_v41 = vsel %vm3095_vm9, 0.0, %v3088_v39 }
 0xf1f   : > { %v6958_v13 = vsel %vm3100_vm5, %v3098_v41, 0.0  ;;  %v3276_v15 = vpop.permute.xlu1 %3275  ;;  %v5397_v41 = vld [vmem:[%s7054_s23 + $0x28] sm:$0xff] }
 0xf20   : > { %v6961_v34 = vmul.f32 %v3276_v15, %v6955_v32  ;;  %v6964_v16 = vmul.f32 %v3276_v15, %v6958_v13 }
 0xf22   : > { %3312 = vrot.lane.b32.xlu0 %v6961_v34, %s6123_s24  ;;  %3310 = vrot.lane.b32.xlu1 %v6964_v16, %s6123_s24 }
 0xf23   : > { %v3086_v5 = vpop.permute.xlu1 %3085 }
 0xf24   : > { %v3097_v28 = vsel %vm3095_vm9, 0.0, %v3086_v5 }
 0xf25   : > { %v6972_v42 = vsel %vm3100_vm5, %v3097_v28, 0.0 }
 0xf26   : > { %v6975_v52 = vmul.f32 %v3276_v15, %v6972_v42 }
 0xf27   : > { %v3084_v10 = vpop.permute.xlu1 %3083 }
 0xf28   : > { %v3096_v7 = vsel %vm3095_vm9, 0.0, %v3084_v10  ;;  %3308 = vrot.lane.b32.xlu0 %v6975_v52, %s6123_s24 }
 0xf29   : > { %v6981_v45 = vsel %vm3100_vm5, %v3096_v7, 0.0  ;;  %vm3183_vm5 = vcmask 7168  }
 0xf2a   : > { %v6984_v60 = vmul.f32 %v3276_v15, %v6981_v45  ;;  %5401 = vmatprep.mubr.msk.f32.mxu0 %vm3183_vm5, %v5397_v41 }
 0xf2b   : > { %v3269_v22 = vpop.permute.xlu1 %3268 }
 0xf2c   : > { %3300 = vrot.lane.b32.xlu0 %v6955_v32, %s6124_s21  ;;  %3306 = vrot.lane.b32.xlu1 %v6984_v60, %s6123_s24  ;;  %v3274_v56 = vmul.f32 %v3269_v22, %v6955_v32  ;;  %v3272_v50 = vmul.f32 %v3269_v22, %v6972_v42  ;;  %v3273_v54 = vmul.f32 %v3269_v22, %v6958_v13 }
 0xf2d   : > { %v3271_v44 = vmul.f32 %v3269_v22, %v6981_v45 }
 0xf2f   : > { %v3606_v18 = vpop.permute.xlu1 %3605 }
 0xf30   : > { %3296 = vrot.lane.b32.xlu0 %v6972_v42, %s6124_s21  ;;  %3298 = vrot.lane.b32.xlu1 %v6958_v13, %s6124_s21  ;;  %v3610_v61 = vmul.f32 %v3606_v18, %v6958_v13  ;;  %v3611_v4 = vmul.f32 %v3606_v18, %v6955_v32  ;;  %v3608_v27 = vmul.f32 %v3606_v18, %v6981_v45 }
 0xf31   : > { %v3609_v21 = vmul.f32 %v3606_v18, %v6972_v42 }
 0xf34   : > { %3292 = vrot.lane.b32.xlu0 %v3274_v56, %s7873_s28  ;;  %3294 = vrot.lane.b32.xlu1 %v6981_v45, %s6124_s21 }
 0xf38   : > { %3288 = vrot.lane.b32.xlu0 %v3272_v50, %s7873_s28  ;;  %3290 = vrot.lane.b32.xlu1 %v3273_v54, %s7873_s28 }
 0xf3c   : > { %3173 = vrot.lane.b32.xlu0 %v6955_v32, %s6123_s24  ;;  %3286 = vrot.lane.b32.xlu1 %v3271_v44, %s7873_s28 }
 0xf40   : > { %3171 = vrot.lane.b32.xlu0 %v6958_v13, %s6123_s24  ;;  %3128 = vrot.lane.b32.xlu1 %v6948_v25, %s6125_s3  ;;  %s7889_s3 = smov 17  }
 0xf44   : > { %3167 = vrot.lane.b32.xlu0 %v6981_v45, %s6123_s24  ;;  %3169 = vrot.lane.b32.xlu1 %v6972_v42, %s6123_s24 }
 0xf48   : > { %3620 = vrot.lane.b32.xlu0 %v3610_v61, %s6124_s21  ;;  %3622 = vrot.lane.b32.xlu1 %v3611_v4, %s6124_s21 }
 0xf4c   : > { %3616 = vrot.lane.b32.xlu0 %v3608_v27, %s6124_s21  ;;  %3618 = vrot.lane.b32.xlu1 %v3609_v21, %s6124_s21 }
 0xf50   : > { %3143 = vrot.lane.b32.xlu0 %v6958_v13, %s7873_s28  ;;  %3145 = vrot.lane.b32.xlu1 %v6955_v32, %s7873_s28 }
 0xf54   : > { %3139 = vrot.lane.b32.xlu0 %v6981_v45, %s7873_s28  ;;  %3141 = vrot.lane.b32.xlu1 %v6972_v42, %s7873_s28 }
 0xf94   : > { %v3311_v46 = vpop.permute.xlu1 %3310  ;;  %v3313_v8 = vpop.permute.xlu0 %3312 }
 0xf95   : > { %3339 = vrot.lane.b32.xlu0 %v3311_v46, %s7873_s28  ;;  %3341 = vrot.lane.b32.xlu1 %v3313_v8, %s7873_s28 }
 0xf9a   : > { %v3309_v40 = vpop.permute.xlu0 %3308 }
 0xf9b   : > { %3337 = vrot.lane.b32.xlu1 %v3309_v40, %s7873_s28 }
 0xf9e   : > { %v3307_v38 = vpop.permute.xlu1 %3306  ;;  %v7032_v59 = vpop.permute.xlu0 %3300 }
 0xf9f   : > { %3335 = vrot.lane.b32.xlu0 %v3307_v38, %s7873_s28  ;;  %3333 = vrot.lane.b32.xlu1 %v7032_v59, %s7873_s28  ;;  %v3180_v38 = vld [vmem:[%s7054_s23 + $0x8] sm:$0xff] }
 0xfa0   : > { %5394 = vmatprep.mubr.msk.f32.mxu1 %vm3183_vm5, %v3180_v38 }
 0xfa2   : > { %v7037_v2 = vpop.permute.xlu1 %3298  ;;  %v7039_v37 = vpop.permute.xlu0 %3296 }
 0xfa3   : > { %3331 = vrot.lane.b32.xlu0 %v7037_v2, %s7873_s28  ;;  %3329 = vrot.lane.b32.xlu1 %v7039_v37, %s7873_s28 }
 0xfa6   : > { %v7046_v14 = vpop.permute.xlu1 %3294  ;;  %v3293_v35 = vpop.permute.xlu0 %3292 }
 0xfa7   : > { %3327 = vrot.lane.b32.xlu0 %v7046_v14, %s7873_s28  ;;  %3325 = vrot.lane.b32.xlu1 %v3293_v35, %s7873_s28 }
 0xfaa   : > { %v3291_v29 = vpop.permute.xlu1 %3290  ;;  %v3289_v39 = vpop.permute.xlu0 %3288 }
 0xfab   : > { %3323 = vrot.lane.b32.xlu0 %v3291_v29, %s7873_s28  ;;  %3321 = vrot.lane.b32.xlu1 %v3289_v39, %s7873_s28 }
 0xfae   : > { %v3287_v15 = vpop.permute.xlu1 %3286  ;;  %v7060_v5 = vpop.permute.xlu0 %3173 }
 0xfaf   : > { %3319 = vrot.lane.b32.xlu0 %v3287_v15, %s7873_s28  ;;  %3343 = vrot.lane.b32.xlu1 %v6114_v49, %s7873_s28 }
 0xfb0   : > { %3191 = vmatpush1.msra.mxu1 %v7060_v5 }
 0xfb1   : > { %3192 = vmatprep.subr.mxu1 %v6099_v1 }
 0xfb2   : > { %v3129_v28 = vpop.permute.xlu1 %3128  ;;  %v7067_v10 = vpop.permute.xlu0 %3171 }
 0xfb3   : > { %3651 = vrot.lane.b32.xlu0 %v7060_v5, %s6124_s21  ;;  %3193 = vmatpush1.msra.mxu1 %v7067_v10  ;;  %v3134_v7 = vmul.f32 %v3129_v28, %v6955_v32  ;;  %v3133_v50 = vmul.f32 %v3129_v28, %v6958_v13  ;;  %v3132_v18 = vmul.f32 %v3129_v28, %v6972_v42 }
 0xfb4   : > { %3649 = vrot.lane.b32.xlu1 %v7067_v10, %s6124_s21  ;;  %3194 = vmatprep.subr.mxu1 %v6099_v1  ;;  %v3131_v61 = vmul.f32 %v3129_v28, %v6981_v45 }
 0xfb6   : > { %v7076_v22 = vpop.permute.xlu1 %3169  ;;  %v7078_v56 = vpop.permute.xlu0 %3167 }
 0xfb7   : > { %3161 = vrot.lane.b32.xlu0 %v3134_v7, %s6124_s21  ;;  %3195 = vmatpush1.msra.mxu1 %v7076_v22 }
 0xfb8   : > { %3647 = vrot.lane.b32.xlu1 %v7076_v22, %s6124_s21  ;;  %3196 = vmatprep.subr.mxu1 %v6099_v1 }
 0xfb9   : > { %3197 = vmatpush1.msra.mxu1 %v7078_v56 }
 0xfba   : > { %3198 = vmatprep.subr.mxu1 %v6099_v1  ;;  %v3623_v54 = vpop.permute.xlu1 %3622  ;;  %v3621_v44 = vpop.permute.xlu0 %3620 }
 0xfbb   : > { %3159 = vrot.lane.b32.xlu0 %v3133_v50, %s6124_s21 }
 0xfbc   : > { %3645 = vrot.lane.b32.xlu1 %v7078_v56, %s6124_s21 }
 0xfbe   : > { %v3619_v4 = vpop.permute.xlu1 %3618  ;;  %v3617_v27 = vpop.permute.xlu0 %3616 }
 0xfbf   : > { %3157 = vrot.lane.b32.xlu0 %v3132_v18, %s6124_s21 }
 0xfc0   : > { %3643 = vrot.lane.b32.xlu1 %v3623_v54, %s6124_s21 }
 0xfc2   : > { %v7098_v21 = vpop.permute.xlu1 %3145  ;;  %v7101_v46 = vpop.permute.xlu0 %3143 }
 0xfc3   : > { %3155 = vrot.lane.b32.xlu0 %v3131_v61, %s6124_s21 }
 0xfc4   : > { %3641 = vrot.lane.b32.xlu1 %v3621_v44, %s6124_s21 }
 0xfc6   : > { %v7107_v8 = vpop.permute.xlu1 %3141  ;;  %v7109_v40 = vpop.permute.xlu0 %3139 }
 0xfc7   : > { %3639 = vrot.lane.b32.xlu0 %v3619_v4, %s6124_s21 }
 0xfc8   : > { %3637 = vrot.lane.b32.xlu1 %v3617_v27, %s6124_s21 }
 0xfcb   : > { %3635 = vrot.lane.b32.xlu0 %v7098_v21, %s6124_s21 }
 0xfcc   : > { %3633 = vrot.lane.b32.xlu1 %v7101_v46, %s6124_s21 }
 0xfcf   : > { %3631 = vrot.lane.b32.xlu0 %v7107_v8, %s6124_s21 }
 0xfd0   : > { %3629 = vrot.lane.b32.xlu1 %v7109_v40, %s6124_s21 }
 0xfd3   : > { %3653 = vrot.lane.b32.xlu0 %v6114_v49, %s6124_s21 }
 0xfd4   : > { %3836 = vrot.lane.b32.xlu1 %v6938_v55, %s7886_s2  ;;  %s7402_s2 = scalar_lea.vmem %s7821_s8, %s6814_s27 }
0x1007   : > { %v3342_v35 = vpop.permute.xlu1 %3341  ;;  %v3340_v29 = vpop.permute.xlu0 %3339 }
0x1008   : > { %3366 = vmatpush1.msra.mxu0 %v3342_v35 }
0x1009   : > { %3367 = vmatprep.subr.mxu0 %v6099_v1 }
0x100a   : > { %3368 = vmatpush1.msra.mxu0 %v3340_v29  ;;  %v5396_v29 = vld [vmem:[%s7054_s23 + $0x20] sm:$0xff] }
0x100b   : > { %3369 = vmatprep.subr.mxu0 %v6099_v1 }
0x100d   : > { %v3338_v39 = vpop.permute.xlu1 %3337 }
0x100e   : > { %3370 = vmatpush1.msra.mxu0 %v3338_v39 }
0x100f   : > { %3371 = vmatprep.subr.mxu0 %v6099_v1 }
0x1011   : > { %v3334_v41 = vpop.permute.xlu1 %3333  ;;  %v3336_v15 = vpop.permute.xlu0 %3335 }
0x1012   : > { %3372 = vmatpush1.msra.mxu0 %v3336_v15 }
0x1013   : > { %3373 = vmatprep.subr.mxu0 %v6099_v1 }
0x1014   : > { %3374 = vmatpush1.msra.mxu0 %v3334_v41  ;;  %v5399_v41 = vld [vmem:[%s7054_s23 + $0x38] sm:$0xff] }
0x1015   : > { %v3330_v55 = vpop.permute.xlu1 %3329  ;;  %3375 = vmatprep.subr.mxu0 %v6099_v1  ;;  %v3332_v28 = vpop.permute.xlu0 %3331 }
0x1016   : > { %3376 = vmatpush1.msra.mxu0 %v3332_v28 }
0x1017   : > { %3377 = vmatprep.subr.mxu0 %v6099_v1 }
0x1018   : > { %3378 = vmatpush1.msra.mxu0 %v3330_v55  ;;  %v5398_v55 = vld [vmem:[%s7054_s23 + $0x30] sm:$0xff] }
0x1019   : > { %v3326_v7 = vpop.permute.xlu1 %3325  ;;  %3379 = vmatprep.subr.mxu0 %v6099_v1  ;;  %v3328_v50 = vpop.permute.xlu0 %3327 }
0x101a   : > { %3380 = vmatpush1.msra.mxu0 %v3328_v50 }
0x101b   : > { %3381 = vmatprep.subr.mxu0 %v6099_v1 }
0x101c   : > { %3382 = vmatpush1.msra.mxu0 %v3326_v7  ;;  %v5410_v7 = vld [vmem:[%s7054_s23 + $0x48] sm:$0xff] }
0x101d   : > { %v3322_v54 = vpop.permute.xlu1 %3321  ;;  %3383 = vmatprep.subr.mxu0 %v6099_v1  ;;  %v3324_v44 = vpop.permute.xlu0 %3323 }
0x101e   : > { %3384 = vmatpush1.msra.mxu0 %v3324_v44 }
0x101f   : > { %3385 = vmatprep.subr.mxu0 %v6099_v1 }
0x1020   : > { %3386 = vmatpush1.msra.mxu0 %v3322_v54 }
0x1021   : > { %v7131_v18 = vpop.permute.xlu1 %3343  ;;  %3387 = vmatprep.subr.mxu0 %v6099_v1  ;;  %v3320_v61 = vpop.permute.xlu0 %3319 }
0x1022   : > { %3388 = vmatpush1.msra.mxu0 %v3320_v61 }
0x1023   : > { %3389 = vmatprep.subr.mxu0 %v6099_v1 }
0x1024   : > { %3390 = vmatpush1.msra.mxu0 %v7098_v21 }
0x1025   : > { %3391 = vmatprep.subr.mxu0 %v6099_v1  ;;  %v3652_v4 = vpop.permute.xlu0 %3651 }
0x1026   : > { %v3650_v27 = vpop.permute.xlu1 %3649  ;;  %3392 = vmatpush1.msra.mxu0 %v7101_v46 }
0x1027   : > { %3393 = vmatprep.subr.mxu0 %v6099_v1 }
0x1028   : > { %3394 = vmatpush1.msra.mxu0 %v7107_v8 }
0x1029   : > { %3395 = vmatprep.subr.mxu0 %v6099_v1  ;;  %v7141_v38 = vpop.permute.xlu0 %3161 }
0x102a   : > { %v3648_v35 = vpop.permute.xlu1 %3647  ;;  %3199 = vmatpush1.msra.mxu1 %v7141_v38  ;;  %3396 = vmatpush1.msra.mxu0 %v7109_v40 }
0x102b   : > { %3427 = vmatprep.subr.mxu0 %v6099_v1  ;;  %3200 = vmatprep.subr.mxu1 %v6099_v1 }
0x102c   : > { %5400 = vmatpush2.msk.msra.mxu0 %vm916_vm1, %v7131_v18 }
0x102d   : > { %3675 = vmatprep.subr.mxu0 %v6099_v1  ;;  %v7151_v39 = vpop.permute.xlu0 %3159  ;;  %3430 = vmatmul.mubr.f32.vlgmr.msra.gmra.mxu0 %v5396_v29 }
0x102e   : > { %v3646_v15 = vpop.permute.xlu1 %3645  ;;  %3201 = vmatpush1.msra.mxu1 %v7151_v39  ;;  %3676 = vmatpush1.msra.mxu0 %v3652_v4 }
0x102f   : > { %3677 = vmatprep.subr.mxu0 %v6099_v1  ;;  %3202 = vmatprep.subr.mxu1 %v6099_v1 }
0x1030   : > { %3678 = vmatpush1.msra.mxu0 %v3650_v27  ;;  %5402 = vmatprep.mubr.msk.f32.mxu0 %vm3183_vm5, %v5399_v41  ;;  %v3123_v41 = vmul.f32 %v6948_v25, %v6981_v45 }
0x1031   : > { %3679 = vmatprep.subr.mxu0 %v6099_v1  ;;  %v7160_v28 = vpop.permute.xlu0 %3157  ;;  %3435 = vmatmul.mubr.f32.gmra.mxu0 %v5398_v55 }
0x1032   : > { %v3644_v50 = vpop.permute.xlu1 %3643  ;;  %3203 = vmatpush1.msra.mxu1 %v7160_v28  ;;  %3680 = vmatpush1.msra.mxu0 %v3648_v35 }
0x1033   : > { %3681 = vmatprep.subr.mxu0 %v6099_v1  ;;  %3204 = vmatprep.subr.mxu1 %v6099_v1 }
0x1034   : > { %3682 = vmatpush1.msra.mxu0 %v3646_v15  ;;  %5414 = vmatprep.mubr.msk.f32.mxu0 %vm3183_vm5, %v5410_v7 }
0x1035   : > { %3683 = vmatprep.subr.mxu0 %v6099_v1  ;;  %v7168_v54 = vpop.permute.xlu0 %3155 }
0x1036   : > { %v3642_v44 = vpop.permute.xlu1 %3641  ;;  %3205 = vmatpush1.msra.mxu1 %v7168_v54  ;;  %3684 = vmatpush1.msra.mxu0 %v3644_v50  ;;  %v3182_v50 = vld [vmem:[%s7054_s23 + $0x18] sm:$0xff] }
0x1037   : > { %3206 = vmatprep.subr.mxu1 %v6099_v1  ;;  %3685 = vmatprep.subr.mxu0 %v6099_v1 }
0x1038   : > { %3207 = vmatpush1.msra.mxu1 %v7098_v21  ;;  %3686 = vmatpush1.msra.mxu0 %v3642_v44 }
0x1039   : > { %3208 = vmatprep.subr.mxu1 %v6099_v1  ;;  %3687 = vmatprep.subr.mxu0 %v6099_v1  ;;  %v3640_v61 = vpop.permute.xlu0 %3639 }
0x103a   : > { %v3638_v4 = vpop.permute.xlu1 %3637  ;;  %3209 = vmatpush1.msra.mxu1 %v7101_v46  ;;  %3688 = vmatpush1.msra.mxu0 %v3640_v61  ;;  %v3126_v46 = vmul.f32 %v6948_v25, %v6955_v32 }
0x103b   : > { %3210 = vmatprep.subr.mxu1 %v6099_v1  ;;  %3689 = vmatprep.subr.mxu0 %v6099_v1 }
0x103c   : > { %3211 = vmatpush1.msra.mxu1 %v7107_v8  ;;  %3690 = vmatpush1.msra.mxu0 %v3638_v4  ;;  %v3125_v8 = vmul.f32 %v6948_v25, %v6958_v13 }
0x103d   : > { %3212 = vmatprep.subr.mxu1 %v6099_v1  ;;  %3691 = vmatprep.subr.mxu0 %v6099_v1  ;;  %v3636_v21 = vpop.permute.xlu0 %3635 }
0x103e   : > { %v3634_v27 = vpop.permute.xlu1 %3633  ;;  %3213 = vmatpush1.msra.mxu1 %v7109_v40  ;;  %3692 = vmatpush1.msra.mxu0 %v3636_v21  ;;  %v3124_v40 = vmul.f32 %v6948_v25, %v6972_v42  ;;  %v3179_v25 = vld [vmem:[%s7054_s23] sm:$0xff] }
0x103f   : > { %3214 = vmatprep.subr.mxu1 %v6099_v1  ;;  %3693 = vmatprep.subr.mxu0 %v6099_v1 }
0x1040   : > { %3215 = vmatpush1.msra.mxu1 %v3126_v46  ;;  %3694 = vmatpush1.msra.mxu0 %v3634_v27 }
0x1041   : > { %3216 = vmatprep.subr.mxu1 %v6099_v1  ;;  %3695 = vmatprep.subr.mxu0 %v6099_v1  ;;  %v3632_v35 = vpop.permute.xlu0 %3631 }
0x1042   : > { %v3630_v29 = vpop.permute.xlu1 %3629  ;;  %3217 = vmatpush1.msra.mxu1 %v3125_v8  ;;  %3696 = vmatpush1.msra.mxu0 %v3632_v35  ;;  %v5417_v35 = vld [vmem:[%s7825_s12 + $0x28] sm:$0xff] }
0x1043   : > { %3218 = vmatprep.subr.mxu1 %v6099_v1  ;;  %3697 = vmatprep.subr.mxu0 %v6099_v1 }
0x1044   : > { %3219 = vmatpush1.msra.mxu1 %v3124_v40  ;;  %3698 = vmatpush1.msra.mxu0 %v3630_v29 }
0x1045   : > { %3220 = vmatprep.subr.mxu1 %v6099_v1  ;;  %3699 = vmatprep.subr.mxu0 %v6099_v1 }
0x1046   : > { %v3837_v15 = vpop.permute.xlu1 %3836  ;;  %3221 = vmatpush1.msra.mxu1 %v3123_v41  ;;  %3700 = vmatpush1.msra.mxu0 %v7141_v38  ;;  %v3181_v38 = vld [vmem:[%s7054_s23 + $0x10] sm:$0xff] }
0x1047   : > { %v3841_v55 = vmul.f32 %v3837_v15, %v6958_v13  ;;  %v3842_v7 = vmul.f32 %v3837_v15, %v6955_v32  ;;  %3701 = vmatprep.subr.mxu0 %v6099_v1  ;;  %3252 = vmatprep.subr.mxu1 %v6099_v1  ;;  %v3839_v32 = vmul.f32 %v3837_v15, %v6981_v45  ;;  %v5412_v45 = vld [vmem:[%s7054_s23 + $0x58] sm:$0xff] }
0x1048   : > { %3702 = vmatpush1.msra.mxu0 %v7151_v39  ;;  %5393 = vmatpush2.msk.msra.mxu1 %vm916_vm1, %v6114_v49  ;;  %v3840_v13 = vmul.f32 %v3837_v15, %v6972_v42  ;;  %v3654_v39 = vpop.permute.xlu0 %3653  ;;  %v5409_v42 = vld [vmem:[%s7054_s23 + $0x40] sm:$0xff] }
0x1049   : > { %3861 = vrot.lane.b32.xlu0 %v3842_v7, %s6123_s24  ;;  %3859 = vrot.lane.b32.xlu1 %v3841_v55, %s6123_s24  ;;  %v5416_v15 = vld [vmem:[%s7825_s12 + $0x20] sm:$0xff] }
0x104a   : > { %3703 = vmatprep.subr.mxu0 %v6099_v1  ;;  %3255 = vmatmul.mubr.f32.vlgmr.msra.gmra.mxu1 %v3179_v25 }
0x104b   : > { %3704 = vmatpush1.msra.mxu0 %v7160_v28  ;;  %5395 = vmatprep.mubr.msk.f32.mxu1 %vm3183_vm5, %v3182_v50  ;;  %v5411_v28 = vld [vmem:[%s7054_s23 + $0x50] sm:$0xff]  ;;  %v5421_v50 = vld [vmem:[%s7054_s23 + $0x68] sm:$0xff] }
0x104c   : > { %3705 = vmatprep.subr.mxu0 %v6099_v1 }
0x104d   : > { %3857 = vrot.lane.b32.xlu0 %v3840_v13, %s6123_s24  ;;  %3855 = vrot.lane.b32.xlu1 %v3839_v32, %s6123_s24 }
0x104e   : > { %3706 = vmatpush1.msra.mxu0 %v7168_v54  ;;  %3260 = vmatmul.mubr.f32.gmra.mxu1 %v3181_v38  ;;  %v5404_v54 = vld [vmem:[%s7825_s12 + $0x18] sm:$0xff] }
0x104f   : > { %3737 = vmatprep.subr.mxu0 %v6099_v1  ;;  %5768 = vmatprep.subr.mxu1 %v5404_v54 }
0x1050   : > { %5413 = vmatpush2.msk.msra.mxu0 %vm916_vm1, %v3654_v39  ;;  %5769 = vmatpush3.msra.mxu1 %v5404_v54 }
0x1051   : > { %3849 = vrot.lane.b32.xlu0 %v6961_v34, %s7873_s28  ;;  %3847 = vrot.lane.b32.xlu1 %v6964_v16, %s7873_s28  ;;  %v5403_v34 = vld [vmem:[%s7825_s12 + $0x10] sm:$0xff]  ;;  %v3266_v16 = vld [vmem:[%s7825_s12 + $0x8] sm:$0xff] }
0x1052   : > { %3740 = vmatmul.mubr.f32.vlgmr.msra.gmra.mxu0 %v5409_v42  ;;  %5770 = vmatprep.subr.mxu1 %v5403_v34 }
0x1053   : > { %5415 = vmatprep.mubr.msk.f32.mxu0 %vm3183_vm5, %v5412_v45  ;;  %5771 = vmatpush3.msra.mxu1 %v5403_v34 }
0x1054   : > { %5775 = vmatprep.subr.mxu1 %v3266_v16 }
0x1055   : > { %3845 = vrot.lane.b32.xlu0 %v6975_v52, %s7873_s28  ;;  %3843 = vrot.lane.b32.xlu1 %v6984_v60, %s7873_s28 }
0x1056   : > { %3745 = vmatmul.mubr.f32.gmra.mxu0 %v5411_v28 }
0x10bb   : > { %v3860_v52 = vpop.permute.xlu1 %3859  ;;  %v3862_v60 = vpop.permute.xlu0 %3861 }
0x10bc   : > { %3888 = vrot.lane.b32.xlu1 %v3860_v52, %s6123_s24  ;;  %3890 = vrot.lane.b32.xlu0 %v3862_v60, %s6123_s24 }
0x10bf   : > { %v3856_v44 = vpop.permute.xlu1 %3855  ;;  %v3858_v61 = vpop.permute.xlu0 %3857 }
0x10c0   : > { %3884 = vrot.lane.b32.xlu1 %v3856_v44, %s6123_s24  ;;  %3886 = vrot.lane.b32.xlu0 %v3858_v61, %s6123_s24 }
0x10c3   : > { %v3848_v4 = vpop.permute.xlu1 %3847  ;;  %v3850_v21 = vpop.permute.xlu0 %3849 }
0x10c4   : > { %3880 = vrot.lane.b32.xlu1 %v7037_v2, %s6123_s24  ;;  %3882 = vrot.lane.b32.xlu0 %v7032_v59, %s6123_s24 }
0x10c7   : > { %v3844_v27 = vpop.permute.xlu1 %3843  ;;  %v3846_v46 = vpop.permute.xlu0 %3845 }
0x10c8   : > { %3876 = vrot.lane.b32.xlu1 %v7046_v14, %s6123_s24  ;;  %3878 = vrot.lane.b32.xlu0 %v7039_v37, %s6123_s24  ;;  %v3265_v14 = vld [vmem:[%s7825_s12] sm:$0xff] }
0x10cc   : > { %3872 = vrot.lane.b32.xlu1 %v3848_v4, %s6123_s24  ;;  %3874 = vrot.lane.b32.xlu0 %v3850_v21, %s6123_s24  ;;  %v5420_v21 = vld [vmem:[%s7054_s23 + $0x60] sm:$0xff] }
0x10d0   : > { %3868 = vrot.lane.b32.xlu1 %v3844_v27, %s6123_s24  ;;  %3870 = vrot.lane.b32.xlu0 %v3846_v46, %s6123_s24  ;;  %v5423_v27 = vld [vmem:[%s7054_s23 + $0x78] sm:$0xff] }
0x10d4   : > { %3892 = vrot.lane.b32.xlu0 %v6114_v49, %s6123_s24 }
0x10ed   : > { %v3431_v59 = vpop.f32.mrf.mxu0 }
0x10ee   : > { %5772 = vmatprep.mubr.msk.f32.mxu1 %vm740_vm8, %v3431_v59 }
0x10ef   : > { %v3433_v2 = vpop.f32.mrf.mxu0 }
0x10f1   : > { %v3436_v37 = vpop.f32.mrf.mxu0 }
0x10f2   : > { %5773 = vmatmul.mubr.msk.f32.vlgmr.msra.gmra.mxu1 %vm740_vm8, %v3436_v37 }
0x10f3   : > { %v3438_v8 = vpop.f32.mrf.mxu0  ;;  %5776 = vmatpush3.msra.mxu1 %v3266_v16 }
0x10f4   : > { %5777 = vmatprep.subr.mxu1 %v3265_v14 }
0x10f5   : > { %5778 = vmatpush3.msra.mxu1 %v3265_v14 }
0x10f6   : > { %5782 = vmatprep.subr.mxu1 %v5417_v35 }
0x110a   : > { %v3256_v29 = vpop.f32.mrf.mxu1 }
0x110b   : > { %5779 = vmatprep.mubr.msk.f32.mxu1 %vm740_vm8, %v3256_v29 }
0x110c   : > { %v3258_v40 = vpop.f32.mrf.mxu1 }
0x110e   : > { %v3261_v41 = vpop.f32.mrf.mxu1 }
0x110f   : > { %5780 = vmatmul.mubr.msk.f32.vlgmr.msra.gmra.mxu1 %vm740_vm8, %v3261_v41 }
0x1110   : > { %5783 = vmatpush3.msra.mxu1 %v5417_v35  ;;  %v3263_v55 = vpop.f32.mrf.mxu1 }
0x1111   : > { %5784 = vmatprep.subr.mxu1 %v5416_v15 }
0x1112   : > { %v3741_v7 = vpop.f32.mrf.mxu0  ;;  %5785 = vmatpush3.msra.mxu1 %v5416_v15 }
0x1113   : > { %5786 = vmatprep.mubr.msk.f32.mxu1 %vm740_vm8, %v3741_v7  ;;  %3914 = vmatprep.subr.mxu1 %v6099_v1 }
0x1114   : > { %v3743_v25 = vpop.f32.mrf.mxu0 }
0x1116   : > { %v3746_v32 = vpop.f32.mrf.mxu0 }
0x1117   : > { %5787 = vmatmul.mubr.msk.f32.vlgmr.msra.gmra.mxu1 %vm740_vm8, %v3746_v32 }
0x1118   : > { %v3748_v13 = vpop.f32.mrf.mxu0  ;;  %5425 = vmatprep.mubr.msk.f32.mxu1 %vm3183_vm5, %v5421_v50 }
0x112e   : > { %v3889_v38 = vpop.permute.xlu1 %3888  ;;  %v3891_v39 = vpop.permute.xlu0 %3890 }
0x112f   : > { %3915 = vmatpush1.msra.mxu1 %v3891_v39 }
0x1130   : > { %3916 = vmatprep.subr.mxu1 %v6099_v1 }
0x1131   : > { %3917 = vmatpush1.msra.mxu1 %v3889_v38 }
0x1132   : > { %v3885_v42 = vpop.permute.xlu1 %3884  ;;  %3918 = vmatprep.subr.mxu1 %v6099_v1  ;;  %v3887_v45 = vpop.permute.xlu0 %3886 }
0x1133   : > { %3919 = vmatpush1.msra.mxu1 %v3887_v45 }
0x1134   : > { %3920 = vmatprep.subr.mxu1 %v6099_v1 }
0x1135   : > { %3921 = vmatpush1.msra.mxu1 %v3885_v42 }
0x1136   : > { %v3881_v28 = vpop.permute.xlu1 %3880  ;;  %3922 = vmatprep.subr.mxu1 %v6099_v1  ;;  %v3883_v54 = vpop.permute.xlu0 %3882 }
0x1137   : > { %3923 = vmatpush1.msra.mxu1 %v3883_v54 }
0x1138   : > { %3924 = vmatprep.subr.mxu1 %v6099_v1 }
0x1139   : > { %3925 = vmatpush1.msra.mxu1 %v3881_v28 }
0x113a   : > { %v3877_v34 = vpop.permute.xlu1 %3876  ;;  %3926 = vmatprep.subr.mxu1 %v6099_v1  ;;  %v3879_v16 = vpop.permute.xlu0 %3878 }
0x113b   : > { %3927 = vmatpush1.msra.mxu1 %v3879_v16 }
0x113c   : > { %3928 = vmatprep.subr.mxu1 %v6099_v1 }
0x113d   : > { %3929 = vmatpush1.msra.mxu1 %v3877_v34 }
0x113e   : > { %v3873_v52 = vpop.permute.xlu1 %3872  ;;  %3930 = vmatprep.subr.mxu1 %v6099_v1  ;;  %v3875_v60 = vpop.permute.xlu0 %3874 }
0x113f   : > { %3931 = vmatpush1.msra.mxu1 %v3875_v60 }
0x1140   : > { %3932 = vmatprep.subr.mxu1 %v6099_v1 }
0x1141   : > { %3933 = vmatpush1.msra.mxu1 %v3873_v52 }
0x1142   : > { %3934 = vmatprep.subr.mxu1 %v6099_v1  ;;  %v3871_v44 = vpop.permute.xlu0 %3870  ;;  %v3869_v61 = vpop.permute.xlu1 %3868 }
0x1143   : > { %3935 = vmatpush1.msra.mxu1 %v3871_v44 }
0x1144   : > { %3936 = vmatprep.subr.mxu1 %v6099_v1 }
0x1145   : > { %3937 = vmatpush1.msra.mxu1 %v3869_v61 }
0x1146   : > { %3938 = vmatprep.subr.mxu1 %v6099_v1  ;;  %v3893_v4 = vpop.permute.xlu0 %3892 }
0x1147   : > { %3939 = vmatpush1.msra.mxu1 %v7060_v5  ;;  %v5422_v5 = vld [vmem:[%s7054_s23 + $0x70] sm:$0xff]  ;;  %s7887_s23 = smov 9  }
0x1148   : > { %3940 = vmatprep.subr.mxu1 %v6099_v1 }
0x1149   : > { %3941 = vmatpush1.msra.mxu1 %v7067_v10  ;;  %v5428_v10 = vld [vmem:[%s7825_s12 + $0x38] sm:$0xff] }
0x114a   : > { %3942 = vmatprep.subr.mxu1 %v6099_v1  ;;  %5789 = vmatprep.subr.mxu0 %v5428_v10 }
0x114b   : > { %3943 = vmatpush1.msra.mxu1 %v7076_v22  ;;  %5790 = vmatpush3.msra.mxu0 %v5428_v10  ;;  %v5427_v22 = vld [vmem:[%s7825_s12 + $0x30] sm:$0xff] }
0x114c   : > { %3944 = vmatprep.subr.mxu1 %v6099_v1  ;;  %5791 = vmatprep.subr.mxu0 %v5427_v22 }
0x114d   : > { %3945 = vmatpush1.msra.mxu1 %v7078_v56  ;;  %5792 = vmatpush3.msra.mxu0 %v5427_v22 }
0x114e   : > { %3976 = vmatprep.subr.mxu1 %v6099_v1  ;;  %5817 = vmatprep.subr.mxu0 %v6099_v1 }
0x114f   : > { %5424 = vmatpush2.msk.msra.mxu1 %vm916_vm1, %v3893_v4 }
0x1150   : > { %3979 = vmatmul.mubr.f32.vlgmr.msra.gmra.mxu1 %v5420_v21  ;;  %5796 = vmatprep.subr.mxu1 %v6099_v1 }
0x1151   : > { %5426 = vmatprep.mubr.msk.f32.mxu1 %vm3183_vm5, %v5423_v27  ;;  %5797 = vmatpush3.msk.msra.mxu1 %vm916_vm1, %v6114_v49 }
0x1152   : > { %5798 = vmatprep.subr.mxu1 %v6099_v1 }
0x1154   : > { %3984 = vmatmul.mubr.f32.gmra.mxu1 %v5422_v5 }
0x11b2   : > { %v5774_v56 = vpop.f32.mrf.mxu1 }
0x11b4   : > { %v3515_v46 = vpop.f32.mrf.mxu1 }
0x11cf   : > { %v5781_v59 = vpop.f32.mrf.mxu1 }
0x11d0   : > { %v3602_v2 = vadd.f32 %v5781_v59, %v5774_v56 }
0x11d1   : > { %v3596_v37 = vpop.f32.mrf.mxu1 }
0x11d2   : > { %v3597_v14 = vadd.f32 %v3596_v37, %v3515_v46 }
0x11d7   : > { %v5788_v8 = vpop.f32.mrf.mxu1 }
0x11d8   : > { %v3835_v35 = vadd.f32 %v5788_v8, %v3602_v2  ;;  %v5433_v8 = vld [vmem:[%s7402_s2 + $0x8] sm:$0xff] }
0x11d9   : > { %v3825_v29 = vpop.f32.mrf.mxu1 }
0x11da   : > { %v3834_v40 = vadd.f32 %v3825_v29, %v3597_v14 }
0x1210   : > { %v3980_v41 = vpop.f32.mrf.mxu1 }
0x1211   : > { %5793 = vmatprep.mubr.msk.f32.mxu0 %vm740_vm8, %v3980_v41 }
0x1212   : > { %v3982_v15 = vpop.f32.mrf.mxu1 }
0x1214   : > { %v3985_v55 = vpop.f32.mrf.mxu1 }
0x1215   : > { %5794 = vmatmul.mubr.msk.f32.vlgmr.msra.gmra.mxu0 %vm740_vm8, %v3985_v55  ;;  %vm6126_vm8 = vmmov 0  }
0x1216   : > { %5818 = vmatpush3.msk.msra.mxu0 %vm916_vm1, %v7131_v18  ;;  %v3987_v7 = vpop.f32.mrf.mxu1  ;;  %5835 = vmatprep.mubr.msk.f32.mxu0 %vm6126_vm8, %v6099_v1 }
0x1217   : > { %5819 = vmatprep.subr.mxu0 %v6099_v1  ;;  %5814 = vmatprep.mubr.msk.f32.mxu1 %vm6126_vm8, %v6099_v1 }
0x12d5   : > { %v5795_v25 = vpop.f32.mrf.mxu0 }
0x12d6   : > { %v4074_v50 = vadd.f32 %v5795_v25, %v3835_v35 }
0x12d7   : > { %v4064_v32 = vpop.f32.mrf.mxu0 }
0x12d8   : > { %6043 = vtanh.f32 %v4074_v50  ;;  %v4073_v13 = vadd.f32 %v4064_v32, %v3834_v40 }
0x12da   : > { %6045 = vtanh.f32 %v4073_v13 }
0x12e5   : > { %v6044_v38 = vpop.eup %6043 }
0x12e6   : > { %v4078_v39 = vadd.f32 %v6044_v38, %v6647_v0  ;;  %v4117_v38 = vld [vmem:[%s7402_s2] sm:$0xff] }
0x12e7   : > { %v6046_v42 = vpop.eup %6045 }
0x12e8   : > { %4083 = vrot.lane.b32.xlu1 %v4078_v39, %s7887_s23  ;;  %v4077_v45 = vadd.f32 %v6046_v42, %v6642_v58  ;;  %v5450_v39 = vld [vmem:[%s7826_s13 + $0xf0] sm:$0xff]  ;;  %v5449_v42 = vld [vmem:[%s7826_s13 + $0xe8] sm:$0xff] }
0x12ea   : > { %4081 = vrot.lane.b32.xlu0 %v4077_v45, %s7887_s23  ;;  %v5447_v45 = vld [vmem:[%s7826_s13 + $0xd8] sm:$0xff] }
0x135a   : > { %v4084_v18 = vpop.permute.xlu1 %4083 }
0x135b   : > { %v4088_v28 = vsel %vm1412_vm6, 0.0, %v4084_v18  ;;  %v5446_v18 = vld [vmem:[%s7826_s13 + $0xd0] sm:$0xff] }
0x135c   : > { %v7327_v54 = vsel %vm1142_vm11, %v4088_v28, 0.0  ;;  %v4082_v34 = vpop.permute.xlu0 %4081  ;;  %v5445_v28 = vld [vmem:[%s7826_s13 + $0xc8] sm:$0xff] }
0x135d   : > { %v4087_v16 = vsel %vm1412_vm6, 0.0, %v4082_v34  ;;  %v7332_v52 = vmul.f32 %v7327_v54, %v6679_v17  ;;  %v4209_v60 = vmul.f32 %v7327_v54, %v6697_v31  ;;  %v4487_v5 = vmul.f32 %v7327_v54, %v6673_v12  ;;  %v5443_v34 = vld [vmem:[%s7826_s13 + $0xb8] sm:$0xff] }
0x135e   : > { %v7335_v0 = vsel %vm1142_vm11, %v4087_v16, 0.0  ;;  %v4094_v22 = vmul.f32 %v7327_v54, %v6687_v19  ;;  %vm4118_vm6 = vcmask 531456   ;;  %v4685_v25 = vmul.f32 %v7327_v54, %v6707_v33  ;;  %v5442_v16 = vld [vmem:[%s7826_s13 + $0xb0] sm:$0xff] }
0x135f   : > { %4226 = vrot.lane.b32.xlu1 %v7332_v52, %s7888_s19  ;;  %v7341_v58 = vmul.f32 %v7335_v0, %v6679_v17  ;;  %v4208_v44 = vmul.f32 %v7335_v0, %v6697_v31  ;;  %v4486_v10 = vmul.f32 %v7335_v0, %v6673_v12  ;;  %v4093_v56 = vmul.f32 %v7335_v0, %v6687_v19 }
0x1360   : > { %v4684_v50 = vmul.f32 %v7335_v0, %v6707_v33  ;;  %v4092_v32 = vmul.f32 %v6653_v3, %v7327_v54  ;;  %v4091_v13 = vmul.f32 %v6653_v3, %v7335_v0  ;;  %v5451_v33 = vld [vmem:[%s7826_s13 + $0xf8] sm:$0xff]  ;;  %v5448_v3 = vld [vmem:[%s7826_s13 + $0xe0] sm:$0xff] }
0x1361   : > { %4224 = vrot.lane.b32.xlu0 %v7341_v58, %s7888_s19 }
0x1363   : > { %4220 = vrot.lane.b32.xlu1 %v7327_v54, %s7882_s0 }
0x1365   : > { %4218 = vrot.lane.b32.xlu0 %v7335_v0, %s7882_s0 }
0x1367   : > { %4216 = vrot.lane.b32.xlu1 %v4209_v60, %s7873_s28  ;;  %v5438_v60 = vld [vmem:[%s7826_s13 + $0x90] sm:$0xff] }
0x1369   : > { %4214 = vrot.lane.b32.xlu0 %v4208_v44, %s7873_s28  ;;  %v5437_v44 = vld [vmem:[%s7826_s13 + $0x88] sm:$0xff] }
0x13d1   : > { %v4227_v17 = vpop.permute.xlu1 %4226 }
0x13d2   : > { %4240 = vrot.lane.b32.xlu1 %v4227_v17, %s7873_s28  ;;  %v5436_v17 = vld [vmem:[%s7826_s13 + $0x80] sm:$0xff] }
0x13d3   : > { %v4225_v61 = vpop.permute.xlu0 %4224 }
0x13d4   : > { %4238 = vrot.lane.b32.xlu0 %v4225_v61, %s7873_s28  ;;  %v4207_v61 = vld [vmem:[%s7826_s13 + $0x78] sm:$0xff] }
0x13d5   : > { %v7361_v4 = vpop.permute.xlu1 %4220 }
0x13d6   : > { %4236 = vrot.lane.b32.xlu1 %v7361_v4, %s7873_s28 }
0x13d7   : > { %v7365_v31 = vpop.permute.xlu0 %4218 }
0x13d8   : > { %4234 = vrot.lane.b32.xlu0 %v7365_v31, %s7873_s28 }
0x13d9   : > { %v4217_v21 = vpop.permute.xlu1 %4216 }
0x13da   : > { %4232 = vrot.lane.b32.xlu1 %v4217_v21, %s7873_s28  ;;  %v4206_v21 = vld [vmem:[%s7826_s13 + $0x70] sm:$0xff] }
0x13db   : > { %v4215_v27 = vpop.permute.xlu0 %4214 }
0x13dc   : > { %4230 = vrot.lane.b32.xlu0 %v4215_v27, %s7873_s28  ;;  %v4205_v27 = vld [vmem:[%s7826_s13 + $0x68] sm:$0xff] }
0x13de   : > { %4099 = vrot.lane.b32.xlu1 %v7327_v54, %s7873_s28 }
0x13e0   : > { %4097 = vrot.lane.b32.xlu0 %v7335_v0, %s7873_s28 }
0x13e2   : > { %4113 = vrot.lane.b32.xlu1 %v7327_v54, %s7888_s19  ;;  %v5444_v54 = vld [vmem:[%s7826_s13 + $0xc0] sm:$0xff] }
0x13e4   : > { %4111 = vrot.lane.b32.xlu0 %v7335_v0, %s7888_s19  ;;  %v5440_v0 = vld [vmem:[%s7826_s13 + $0xa0] sm:$0xff] }
0x13e6   : > { %4492 = vrot.lane.b32.xlu1 %v4487_v5, %s7882_s0  ;;  %v4204_v5 = vld [vmem:[%s7826_s13 + $0x60] sm:$0xff] }
0x13e8   : > { %4490 = vrot.lane.b32.xlu0 %v4486_v10, %s7882_s0  ;;  %v4203_v10 = vld [vmem:[%s7826_s13 + $0x58] sm:$0xff] }
0x13ea   : > { %4107 = vrot.lane.b32.xlu1 %v4094_v22, %s7882_s0  ;;  %v4202_v22 = vld [vmem:[%s7826_s13 + $0x50] sm:$0xff] }
0x13ec   : > { %4105 = vrot.lane.b32.xlu0 %v4093_v56, %s7882_s0  ;;  %v4201_v56 = vld [vmem:[%s7826_s13 + $0x48] sm:$0xff] }
0x13ee   : > { %4508 = vrot.lane.b32.xlu1 %v6114_v49, %s7882_s0 }
0x1444   : > { %v4241_v46 = vpop.permute.xlu1 %4240 }
0x1445   : > { %5820 = vmatpush3.msra.mxu0 %v4241_v46  ;;  %v4200_v46 = vld [vmem:[%s7826_s13 + $0x40] sm:$0xff] }
0x1446   : > { %5821 = vmatprep.subr.mxu0 %v6099_v1  ;;  %v4239_v12 = vpop.permute.xlu0 %4238 }
0x1447   : > { %5822 = vmatpush3.msra.mxu0 %v4239_v12  ;;  %v4199_v12 = vld [vmem:[%s7826_s13 + $0x38] sm:$0xff] }
0x1448   : > { %v4237_v59 = vpop.permute.xlu1 %4236  ;;  %5823 = vmatprep.subr.mxu0 %v6099_v1 }
0x1449   : > { %5824 = vmatpush3.msra.mxu0 %v4237_v59  ;;  %v4198_v59 = vld [vmem:[%s7826_s13 + $0x30] sm:$0xff] }
0x144a   : > { %5825 = vmatprep.subr.mxu0 %v6099_v1  ;;  %v4235_v2 = vpop.permute.xlu0 %4234 }
0x144b   : > { %5826 = vmatpush3.msra.mxu0 %v4235_v2  ;;  %v4197_v2 = vld [vmem:[%s7826_s13 + $0x28] sm:$0xff] }
0x144c   : > { %v4233_v19 = vpop.permute.xlu1 %4232  ;;  %5827 = vmatprep.subr.mxu0 %v6099_v1 }
0x144d   : > { %5828 = vmatpush3.msra.mxu0 %v4233_v19  ;;  %v4196_v19 = vld [vmem:[%s7826_s13 + $0x20] sm:$0xff] }
0x144e   : > { %5829 = vmatprep.subr.mxu0 %v6099_v1  ;;  %v4231_v37 = vpop.permute.xlu0 %4230 }
0x144f   : > { %5830 = vmatpush3.msra.mxu0 %v4231_v37  ;;  %v4195_v37 = vld [vmem:[%s7826_s13 + $0x18] sm:$0xff] }
0x1450   : > { %v4100_v14 = vpop.permute.xlu1 %4099  ;;  %5831 = vmatprep.subr.mxu0 %v6099_v1 }
0x1451   : > { %5832 = vmatpush3.msra.mxu0 %v4100_v14 }
0x1452   : > { %5833 = vmatprep.subr.mxu0 %v6099_v1  ;;  %v4098_v35 = vpop.permute.xlu0 %4097 }
0x1453   : > { %5834 = vmatpush3.msra.mxu0 %v4098_v35 }
0x1454   : > { %v7407_v29 = vpop.permute.xlu1 %4113  ;;  %5836 = vmatmul.mubr.msk.f32.vlgmr.msra.gmra.mxu0 %vm4118_vm6, %v5433_v8  ;;  %4431 = vmatprep.subr.mxu0 %v4207_v61  ;;  %v4193_v8 = vld [vmem:[%s7826_s13 + $0x8] sm:$0xff]  ;;  %v5461_v61 = vld [vmem:[%s7826_s13 + $0x120] sm:$0xff] }
0x1455   : > { %5799 = vmatpush3.msra.mxu1 %v7407_v29  ;;  %4506 = vrot.lane.b32.xlu0 %v7407_v29, %s7882_s0 }
0x1456   : > { %5800 = vmatprep.subr.mxu1 %v6099_v1  ;;  %v7414_v40 = vpop.permute.xlu0 %4111  ;;  %4479 = vmatprep.mubr.f32.mxu0 %v6099_v1 }
0x1457   : > { %5801 = vmatpush3.msra.mxu1 %v7414_v40  ;;  %4504 = vrot.lane.b32.xlu1 %v7414_v40, %s7882_s0 }
0x1458   : > { %v4493_v41 = vpop.permute.xlu1 %4492  ;;  %5802 = vmatprep.subr.mxu1 %v6099_v1  ;;  %4432 = vmatpush1.msra.mxu0 %v4206_v21  ;;  %v5460_v21 = vld [vmem:[%s7826_s13 + $0x118] sm:$0xff] }
0x1459   : > { %4502 = vrot.lane.b32.xlu0 %v4493_v41, %s7882_s0  ;;  %4433 = vmatprep.subr.mxu0 %v4205_v27  ;;  %v5459_v27 = vld [vmem:[%s7826_s13 + $0x110] sm:$0xff] }
0x145a   : > { %v4491_v15 = vpop.permute.xlu0 %4490  ;;  %4434 = vmatpush1.msra.mxu0 %v4204_v5  ;;  %v5458_v5 = vld [vmem:[%s7826_s13 + $0x108] sm:$0xff] }
0x145b   : > { %4500 = vrot.lane.b32.xlu1 %v4491_v15, %s7882_s0  ;;  %4435 = vmatprep.subr.mxu0 %v4203_v10  ;;  %v5457_v10 = vld [vmem:[%s7826_s13 + $0x100] sm:$0xff] }
0x145c   : > { %v7423_v55 = vpop.permute.xlu1 %4107  ;;  %4436 = vmatpush1.msra.mxu0 %v4202_v22 }
0x145d   : > { %5803 = vmatpush3.msra.mxu1 %v7423_v55  ;;  %4498 = vrot.lane.b32.xlu0 %v4100_v14, %s7882_s0 }
0x145e   : > { %5804 = vmatprep.subr.mxu1 %v6099_v1  ;;  %v7428_v7 = vpop.permute.xlu0 %4105  ;;  %4437 = vmatprep.subr.mxu0 %v4201_v56 }
0x145f   : > { %4496 = vrot.lane.b32.xlu1 %v4098_v35, %s7882_s0  ;;  %5805 = vmatpush3.msra.mxu1 %v7428_v7 }
0x1460   : > { %5806 = vmatprep.subr.mxu1 %v6099_v1  ;;  %4438 = vmatpush1.msra.mxu0 %v4200_v46  ;;  %v4509_v41 = vpop.permute.xlu1 %4508 }
0x1461   : > { %4694 = vrot.lane.b32.xlu0 %v4685_v25, %s7888_s19  ;;  %5807 = vmatpush3.msra.mxu1 %v4100_v14  ;;  %v4194_v14 = vld [vmem:[%s7826_s13 + $0x10] sm:$0xff] }
0x1462   : > { %5808 = vmatprep.subr.mxu1 %v6099_v1  ;;  %4439 = vmatprep.subr.mxu0 %v4199_v12 }
0x1463   : > { %4692 = vrot.lane.b32.xlu1 %v4684_v50, %s7888_s19  ;;  %5809 = vmatpush3.msra.mxu1 %v4098_v35  ;;  %v4192_v35 = vld [vmem:[%s7826_s13] sm:$0xff] }
0x1464   : > { %5810 = vmatprep.subr.mxu1 %v6099_v1  ;;  %4440 = vmatpush1.msra.mxu0 %v4198_v59 }
0x1465   : > { %4688 = vrot.lane.b32.xlu0 %v7332_v52, %s7873_s28  ;;  %5811 = vmatpush3.msra.mxu1 %v4092_v32  ;;  %v5441_v52 = vld [vmem:[%s7826_s13 + $0xa8] sm:$0xff] }
0x1466   : > { %5812 = vmatprep.subr.mxu1 %v6099_v1  ;;  %4441 = vmatprep.subr.mxu0 %v4197_v2 }
0x1467   : > { %4686 = vrot.lane.b32.xlu1 %v7341_v58, %s7873_s28  ;;  %5813 = vmatpush3.msra.mxu1 %v4091_v13  ;;  %v5439_v58 = vld [vmem:[%s7826_s13 + $0x98] sm:$0xff] }
0x1468   : > { %5815 = vmatmul.mubr.msk.f32.vlgmr.msra.gmra.mxu1 %vm4118_vm6, %v4117_v38  ;;  %4357 = vmatprep.subr.mxu1 %v5451_v33 }
0x1469   : > { %4710 = vrot.lane.b32.xlu0 %v6114_v49, %s7888_s19  ;;  %4358 = vmatpush1.msra.mxu1 %v5450_v39 }
0x146a   : > { %4359 = vmatprep.subr.mxu1 %v5449_v42  ;;  %4405 = vmatprep.mubr.f32.mxu1 %v6099_v1 }
0x146b   : > { %4360 = vmatpush1.msra.mxu1 %v5448_v3  ;;  %4442 = vmatpush1.msra.mxu0 %v4196_v19 }
0x146c   : > { %4361 = vmatprep.subr.mxu1 %v5447_v45  ;;  %4443 = vmatprep.subr.mxu0 %v4195_v37 }
0x146d   : > { %4362 = vmatpush1.msra.mxu1 %v5446_v18  ;;  %4444 = vmatpush1.msra.mxu0 %v4194_v14 }
0x146e   : > { %4363 = vmatprep.subr.mxu1 %v5445_v28  ;;  %4445 = vmatprep.subr.mxu0 %v4193_v8 }
0x146f   : > { %4364 = vmatpush1.msra.mxu1 %v5444_v54  ;;  %4446 = vmatpush1.msra.mxu0 %v4192_v35  ;;  %v5472_v54 = vld [vmem:[%s7826_s13 + $0x178] sm:$0xff] }
0x1470   : > { %4365 = vmatprep.subr.mxu1 %v5443_v34  ;;  %4627 = vmatprep.subr.mxu0 %v5472_v54  ;;  %v5469_v34 = vld [vmem:[%s7826_s13 + $0x160] sm:$0xff] }
0x1471   : > { %4366 = vmatpush1.msra.mxu1 %v5442_v16  ;;  %v5468_v16 = vld [vmem:[%s7826_s13 + $0x158] sm:$0xff]  ;;  %v5477_v54 = vld [vmem:[%s7826_s13 + $0x180] sm:$0xff] }
0x1472   : > { %4367 = vmatprep.subr.mxu1 %v5441_v52  ;;  %v5467_v52 = vld [vmem:[%s7826_s13 + $0x150] sm:$0xff] }
0x1473   : > { %4368 = vmatpush1.msra.mxu1 %v5440_v0  ;;  %v5466_v0 = vld [vmem:[%s7826_s13 + $0x148] sm:$0xff] }
0x1474   : > { %4369 = vmatprep.subr.mxu1 %v5439_v58  ;;  %v5465_v58 = vld [vmem:[%s7826_s13 + $0x140] sm:$0xff] }
0x1475   : > { %4370 = vmatpush1.msra.mxu1 %v5438_v60  ;;  %v5464_v60 = vld [vmem:[%s7826_s13 + $0x138] sm:$0xff] }
0x1476   : > { %4371 = vmatprep.subr.mxu1 %v5437_v44  ;;  %v5463_v44 = vld [vmem:[%s7826_s13 + $0x130] sm:$0xff] }
0x1477   : > { %4372 = vmatpush1.msra.mxu1 %v5436_v17  ;;  %v5462_v17 = vld [vmem:[%s7826_s13 + $0x128] sm:$0xff] }
0x1478   : > { %5838 = vmatprep.subr.mxu1 %v6099_v1 }
0x14c7   : > { %v4507_v15 = vpop.permute.xlu0 %4506 }
0x14c9   : > { %v4505_v25 = vpop.permute.xlu1 %4504 }
0x14cb   : > { %v4503_v50 = vpop.permute.xlu0 %4502 }
0x14cd   : > { %v4501_v32 = vpop.permute.xlu1 %4500 }
0x14cf   : > { %v4499_v13 = vpop.permute.xlu0 %4498 }
0x14d1   : > { %v4497_v38 = vpop.permute.xlu1 %4496 }
0x14d3   : > { %v4695_v33 = vpop.permute.xlu0 %4694 }
0x14d4   : > { %4708 = vrot.lane.b32.xlu1 %v4695_v33, %s7888_s19  ;;  %v5486_v33 = vld [vmem:[%s7826_s13 + $0x1c8] sm:$0xff] }
0x14d5   : > { %v4693_v39 = vpop.permute.xlu1 %4692 }
0x14d6   : > { %4706 = vrot.lane.b32.xlu0 %v4693_v39, %s7888_s19  ;;  %v5485_v39 = vld [vmem:[%s7826_s13 + $0x1c0] sm:$0xff] }
0x14d7   : > { %v4689_v42 = vpop.permute.xlu0 %4688 }
0x14d8   : > { %4704 = vrot.lane.b32.xlu1 %v7361_v4, %s7888_s19  ;;  %v5454_v4 = vld [vmem:[%s7402_s2 + $0x10] sm:$0xff] }
0x14d9   : > { %v4687_v3 = vpop.permute.xlu1 %4686 }
0x14da   : > { %4702 = vrot.lane.b32.xlu0 %v7365_v31, %s7888_s19 }
0x14db   : > { %v4711_v56 = vpop.permute.xlu0 %4710 }
0x14dc   : > { %4700 = vrot.lane.b32.xlu1 %v4689_v42, %s7888_s19  ;;  %v5484_v42 = vld [vmem:[%s7826_s13 + $0x1b8] sm:$0xff] }
0x14de   : > { %4698 = vrot.lane.b32.xlu0 %v4687_v3, %s7888_s19  ;;  %v5483_v3 = vld [vmem:[%s7826_s13 + $0x1b0] sm:$0xff] }
0x1514   : > { %v4317_v45 = vpop.f32.mrf.mxu0 }
0x1515   : > { %5452 = vmatmul.mubr.msk.f32.vlgmr.msra.gmra.mxu1 %vm1633_vm12, %v4317_v45  ;;  %v5482_v45 = vld [vmem:[%s7826_s13 + $0x1a8] sm:$0xff] }
0x1516   : > { %5839 = vmatpush3.msk.msra.mxu1 %vm916_vm1, %v4509_v41  ;;  %v5837_v18 = vpop.f32.mrf.mxu0  ;;  %5856 = vmatprep.mubr.msk.f32.mxu1 %vm6126_vm8, %v6099_v1 }
0x1517   : > { %5840 = vmatprep.subr.mxu1 %v6099_v1  ;;  %v5481_v18 = vld [vmem:[%s7826_s13 + $0x1a0] sm:$0xff] }
0x1518   : > { %5841 = vmatpush3.msra.mxu1 %v4507_v15 }
0x1519   : > { %5842 = vmatprep.subr.mxu1 %v6099_v1 }
0x151a   : > { %5843 = vmatpush3.msra.mxu1 %v4505_v25  ;;  %v5474_v25 = vld [vmem:[%s7402_s2 + $0x18] sm:$0xff] }
0x151b   : > { %5844 = vmatprep.subr.mxu1 %v6099_v1 }
0x151c   : > { %5845 = vmatpush3.msra.mxu1 %v4503_v50  ;;  %v5492_v50 = vld [vmem:[%s7826_s13 + $0x1f8] sm:$0xff] }
0x151d   : > { %5846 = vmatprep.subr.mxu1 %v6099_v1 }
0x151e   : > { %5847 = vmatpush3.msra.mxu1 %v4501_v32  ;;  %v5491_v32 = vld [vmem:[%s7826_s13 + $0x1f0] sm:$0xff] }
0x151f   : > { %5848 = vmatprep.subr.mxu1 %v6099_v1 }
0x1520   : > { %5849 = vmatpush3.msra.mxu1 %v4499_v13  ;;  %v5490_v13 = vld [vmem:[%s7826_s13 + $0x1e8] sm:$0xff] }
0x1521   : > { %5850 = vmatprep.subr.mxu1 %v6099_v1 }
0x1522   : > { %5851 = vmatpush3.msra.mxu1 %v4497_v38  ;;  %v5487_v38 = vld [vmem:[%s7826_s13 + $0x1d0] sm:$0xff] }
0x1523   : > { %5852 = vmatprep.subr.mxu1 %v6099_v1 }
0x1524   : > { %5853 = vmatpush3.msra.mxu1 %v7423_v55  ;;  %v5471_v55 = vld [vmem:[%s7826_s13 + $0x170] sm:$0xff] }
0x1525   : > { %5854 = vmatprep.subr.mxu1 %v6099_v1 }
0x1526   : > { %5855 = vmatpush3.msra.mxu1 %v7428_v7  ;;  %v5470_v7 = vld [vmem:[%s7826_s13 + $0x168] sm:$0xff] }
0x1527   : > { %5857 = vmatmul.mubr.msk.f32.vlgmr.msra.gmra.mxu1 %vm4118_vm6, %v5454_v4  ;;  %4829 = vmatprep.subr.mxu1 %v5492_v50  ;;  %v5480_v4 = vld [vmem:[%s7826_s13 + $0x198] sm:$0xff] }
0x1528   : > { %v4188_v31 = vpop.f32.mrf.mxu1  ;;  %4877 = vmatprep.mubr.f32.mxu1 %v6099_v1  ;;  %4830 = vmatpush1.msra.mxu1 %v5491_v32 }
0x1529   : > { %5453 = vmatmul.mubr.msk.f32.vlgmr.msra.gmra.mxu0 %vm1633_vm12, %v4188_v31  ;;  %4831 = vmatprep.subr.mxu1 %v5490_v13  ;;  %v5479_v31 = vld [vmem:[%s7826_s13 + $0x190] sm:$0xff] }
0x152a   : > { %v5816_v28 = vpop.f32.mrf.mxu1  ;;  %4675 = vmatprep.mubr.f32.mxu0 %v6099_v1  ;;  %4628 = vmatpush1.msra.mxu0 %v5471_v55 }
0x152b   : > { %4629 = vmatprep.subr.mxu0 %v5470_v7  ;;  %v5478_v28 = vld [vmem:[%s7826_s13 + $0x188] sm:$0xff] }
0x152c   : > { %4630 = vmatpush1.msra.mxu0 %v5469_v34 }
0x152d   : > { %4631 = vmatprep.subr.mxu0 %v5468_v16 }
0x152e   : > { %4632 = vmatpush1.msra.mxu0 %v5467_v52 }
0x152f   : > { %4633 = vmatprep.subr.mxu0 %v5466_v0 }
0x1530   : > { %4634 = vmatpush1.msra.mxu0 %v5465_v58 }
0x1531   : > { %4635 = vmatprep.subr.mxu0 %v5464_v60 }
0x1532   : > { %4636 = vmatpush1.msra.mxu0 %v5463_v44 }
0x1533   : > { %4637 = vmatprep.subr.mxu0 %v5462_v17 }
0x1534   : > { %4638 = vmatpush1.msra.mxu0 %v5461_v61 }
0x1535   : > { %4639 = vmatprep.subr.mxu0 %v5460_v21 }
0x1536   : > { %4640 = vmatpush1.msra.mxu0 %v5459_v27 }
0x1537   : > { %4641 = vmatprep.subr.mxu0 %v5458_v5 }
0x1538   : > { %4642 = vmatpush1.msra.mxu0 %v5457_v10 }
0x1539   : > { %5859 = vmatprep.subr.mxu0 %v6099_v1 }
0x1546   : > { %v4709_v12 = vpop.permute.xlu1 %4708 }
0x1548   : > { %v4707_v2 = vpop.permute.xlu0 %4706 }
0x154a   : > { %v4705_v8 = vpop.permute.xlu1 %4704 }
0x154c   : > { %v4703_v35 = vpop.permute.xlu0 %4702 }
0x154e   : > { %v4701_v41 = vpop.permute.xlu1 %4700 }
0x1550   : > { %v4699_v15 = vpop.permute.xlu0 %4698 }
0x15d5   : > { %v4407_v22 = vpop.f32.mrf.mxu1 }
0x15d7   : > { %v7628_v46 = vpop.f32.mrf.mxu1 }
0x15e7   : > { %v4587_v59 = vpop.f32.mrf.mxu1 }
0x15e8   : > { %5473 = vmatmul.mubr.msk.f32.vlgmr.msra.gmra.mxu0 %vm1633_vm12, %v4587_v59 }
0x15e9   : > { %5860 = vmatpush3.msk.msra.mxu0 %vm916_vm1, %v4711_v56  ;;  %v5858_v19 = vpop.f32.mrf.mxu1  ;;  %v4481_v37 = vpop.f32.mrf.mxu0  ;;  %5877 = vmatprep.mubr.msk.f32.mxu0 %vm6126_vm8, %v6099_v1 }
0x15ea   : > { %5861 = vmatprep.subr.mxu0 %v6099_v1  ;;  %v4482_v14 = vadd.f32 %v4481_v37, %v4407_v22 }
0x15eb   : > { %5862 = vmatpush3.msra.mxu0 %v4709_v12  ;;  %v4483_v55 = vpop.f32.mrf.mxu0 }
0x15ec   : > { %5863 = vmatprep.subr.mxu0 %v6099_v1  ;;  %v4484_v34 = vadd.f32 %v4483_v55, %v7628_v46 }
0x15ed   : > { %5864 = vmatpush3.msra.mxu0 %v4707_v2 }
0x15ee   : > { %5865 = vmatprep.subr.mxu0 %v6099_v1 }
0x15ef   : > { %5866 = vmatpush3.msra.mxu0 %v4705_v8 }
0x15f0   : > { %5867 = vmatprep.subr.mxu0 %v6099_v1 }
0x15f1   : > { %5868 = vmatpush3.msra.mxu0 %v4703_v35 }
0x15f2   : > { %5869 = vmatprep.subr.mxu0 %v6099_v1 }
0x15f3   : > { %5870 = vmatpush3.msra.mxu0 %v4701_v41 }
0x15f4   : > { %5871 = vmatprep.subr.mxu0 %v6099_v1 }
0x15f5   : > { %5872 = vmatpush3.msra.mxu0 %v4699_v15 }
0x15f6   : > { %5873 = vmatprep.subr.mxu0 %v6099_v1 }
0x15f7   : > { %5874 = vmatpush3.msra.mxu0 %v7407_v29  ;;  %v5489_v29 = vld [vmem:[%s7826_s13 + $0x1e0] sm:$0xff] }
0x15f8   : > { %5875 = vmatprep.subr.mxu0 %v6099_v1  ;;  %4832 = vmatpush1.msra.mxu1 %v5489_v29 }
0x15f9   : > { %5876 = vmatpush3.msra.mxu0 %v7414_v40  ;;  %v5488_v40 = vld [vmem:[%s7826_s13 + $0x1d8] sm:$0xff] }
0x15fa   : > { %5878 = vmatmul.mubr.msk.f32.vlgmr.msra.gmra.mxu0 %vm4118_vm6, %v5474_v25  ;;  %4833 = vmatprep.subr.mxu1 %v5488_v40 }
0x15fb   : > { %4834 = vmatpush1.msra.mxu1 %v5487_v38 }
0x15fc   : > { %4835 = vmatprep.subr.mxu1 %v5486_v33 }
0x15fd   : > { %4836 = vmatpush1.msra.mxu1 %v5485_v39 }
0x15fe   : > { %4837 = vmatprep.subr.mxu1 %v5484_v42 }
0x15ff   : > { %4838 = vmatpush1.msra.mxu1 %v5483_v3 }
0x1600   : > { %4839 = vmatprep.subr.mxu1 %v5482_v45 }
0x1601   : > { %4840 = vmatpush1.msra.mxu1 %v5481_v18 }
0x1602   : > { %4841 = vmatprep.subr.mxu1 %v5480_v4 }
0x1603   : > { %4842 = vmatpush1.msra.mxu1 %v5479_v31 }
0x1604   : > { %4843 = vmatprep.subr.mxu1 %v5478_v28 }
0x1605   : > { %4844 = vmatpush1.msra.mxu1 %v5477_v54 }
0x1606   : > { %5494 = vmatprep.subr.msk.mxu1 %vm916_vm1, %v6114_v49 }
0x16a8   : > { %v4677_v7 = vpop.f32.mrf.mxu0 }
0x16a9   : > { %v4682_v16 = vadd.f32 %v4677_v7, %v4482_v14 }
0x16aa   : > { %v4679_v52 = vpop.f32.mrf.mxu0 }
0x16ab   : > { %v4683_v0 = vadd.f32 %v4679_v52, %v4484_v34 }
0x16ba   : > { %v4789_v58 = vpop.f32.mrf.mxu0 }
0x16bb   : > { %5493 = vmatmul.mubr.msk.f32.vlgmr.msra.gmra.mxu1 %vm1633_vm12, %v4789_v58 }
0x16bc   : > { %v5879_v60 = vpop.f32.mrf.mxu0  ;;  %5495 = vmatpush1.msk.msra.mxu1 %vm916_vm1, %v6114_v49  ;;  %5082 = vmatprep.mubr.f32.mxu1 %v6099_v1 }
0x177b   : > { %v4879_v44 = vpop.f32.mrf.mxu1 }
0x177c   : > { %v4884_v17 = vadd.f32 %v4879_v44, %v4682_v16 }
0x177d   : > { %v4881_v61 = vpop.f32.mrf.mxu1 }
0x177e   : > { %6047 = vtanh.f32 %v4884_v17  ;;  %v4885_v21 = vadd.f32 %v4881_v61, %v4683_v0 }
0x1780   : > { %6049 = vtanh.f32 %v4885_v21 }
0x178b   : > { %v6048_v27 = vpop.eup %6047 }
0x178c   : > { %4891 = vrot.lane.b32.xlu1 %v6048_v27, %s7889_s3 }
0x178d   : > { %v6050_v5 = vpop.eup %6049 }
0x178e   : > { %4893 = vrot.lane.b32.xlu0 %v6050_v5, %s7889_s3 }
0x17fe   : > { %v4892_v10 = vpop.permute.xlu1 %4891 }
0x17ff   : > { %v7704_v22 = vsel %vm672_vm4, 0.0, %v4892_v10 }
0x1800   : > { %4956 = vrot.lane.b32.xlu1 %v7704_v22, %s7879_s1  ;;  %4992 = vrot.lane.b32.xlu0 %v7704_v22, %s7890_s4  ;;  %v4894_v1 = vpop.permute.xlu0 %4893  ;;  %v4915_v49 = vmul.f32 %v6270_v24, %v7704_v22  ;;  %v4909_v46 = vmul.f32 %v6266_v20, %v7704_v22  ;;  %v4912_v24 = vmul.f32 %v6275_v26, %v7704_v22 }
0x1801   : > { %v7713_v56 = vsel %vm672_vm4, %v4892_v10, %v4894_v1  ;;  %v4900_v12 = vsel %vm672_vm4, %v4894_v1, 0.0  ;;  %v4906_v59 = vmul.f32 %v6295_v36, %v7704_v22  ;;  %v4903_v20 = vmul.f32 %v6285_v30, %v7704_v22 }
0x1802   : > { %v4917_v26 = vmul.f32 %v6268_v23, %v4900_v12  ;;  %v4916_v2 = vmul.f32 %v7713_v56, %v6322_v51  ;;  %v4914_v36 = vmul.f32 %v6316_v48, %v4900_v12  ;;  %v4913_v19 = vmul.f32 %v7713_v56, %v6361_v6 }
0x1803   : > { %v4911_v30 = vmul.f32 %v6307_v43, %v4900_v12  ;;  %v4910_v23 = vmul.f32 %v7713_v56, %v6346_v62  ;;  %v4908_v51 = vmul.f32 %v6326_v53, %v4900_v12  ;;  %v4907_v48 = vmul.f32 %v7713_v56, %v6351_v63 }
0x1804   : > { %5005 = vrot.lane.b32.xlu1 %v4915_v49, %s7891_s5  ;;  %4994 = vrot.lane.b32.xlu0 %v7713_v56, %s7890_s4  ;;  %v4905_v6 = vmul.f32 %v6314_v47, %v4900_v12  ;;  %v4904_v43 = vmul.f32 %v7713_v56, %v6336_v57  ;;  %vm7892_vm4 = vcmask 1039360   ;;  %v4902_v27 = vmul.f32 %v6253_v11, %v7713_v56 }
0x1805   : > { %v4901_v5 = vmul.f32 %v6249_v9, %v7704_v22 }
0x1808   : > { %4996 = vrot.lane.b32.xlu1 %v4900_v12, %s7890_s4  ;;  %4969 = vrot.lane.b32.xlu0 %v4909_v46, %s7881_s18 }
0x180c   : > { %4982 = vrot.lane.b32.xlu1 %v4912_v24, %s7870_s25  ;;  %4960 = vrot.lane.b32.xlu0 %v4900_v12, %s7879_s1 }
0x1810   : > { %4958 = vrot.lane.b32.xlu1 %v7713_v56, %s7879_s1  ;;  %4946 = vrot.lane.b32.xlu0 %v4906_v59, %s7871_s26 }
0x1814   : > { %4933 = vrot.lane.b32.xlu1 %v4903_v20, %s7872_s20  ;;  %4922 = vrot.lane.b32.xlu0 %v7713_v56, %s7873_s28 }
0x1818   : > { %5009 = vrot.lane.b32.xlu0 %v4917_v26, %s7891_s5  ;;  %5007 = vrot.lane.b32.xlu1 %v4916_v2, %s7891_s5 }
0x181c   : > { %4986 = vrot.lane.b32.xlu0 %v4914_v36, %s7870_s25  ;;  %4984 = vrot.lane.b32.xlu1 %v4913_v19, %s7870_s25  ;;  %s5327_s25 = sshll.u32 %s7909_s30, 2 }
0x1820   : > { %4973 = vrot.lane.b32.xlu1 %v4911_v30, %s7881_s18  ;;  %4971 = vrot.lane.b32.xlu0 %v4910_v23, %s7881_s18  ;;  %s5328_s18 = sshll.u32 %s7907_s29, 1 }
0x1821   : > { %s661_s1 = sadd.s32 %s5328_s18, %s5327_s25 }
0x1822   : > { %s5330_s10 = sshll.u32 %s661_s1, 2 }
0x1823   : > { %s663_s24 = scalar_lea.vmem %s7827_s14, %s5330_s10 }
0x1824   : > { %4950 = vrot.lane.b32.xlu1 %v4908_v51, %s7871_s26  ;;  %4948 = vrot.lane.b32.xlu0 %v4907_v48, %s7871_s26 }
0x1828   : > { %4937 = vrot.lane.b32.xlu0 %v4905_v6, %s7872_s20  ;;  %4935 = vrot.lane.b32.xlu1 %v4904_v43, %s7872_s20 }
0x182c   : > { %4920 = vrot.lane.b32.xlu0 %v7704_v22, %s7873_s28  ;;  %4924 = vrot.lane.b32.xlu1 %v4900_v12, %s7873_s28  ;;  %s654_s28 = scalar_lea.vmem %s7822_s9, %s5327_s25 }
0x182d   : > { %v4888_v10 = vld [vmem:[%s654_s28] sm:$0xf] }
0x1872   : > { %v4957_v53 = vpop.permute.xlu1 %4956  ;;  %v4993_v62 = vpop.permute.xlu0 %4992 }
0x1876   : > { %v5006_v63 = vpop.permute.xlu1 %5005  ;;  %v4995_v37 = vpop.permute.xlu0 %4994 }
0x1877   : > { %v4998_v38 = vsel %vm891_vm15, %v4993_v62, %v4995_v37 }
0x187a   : > { %v4997_v14 = vpop.permute.xlu1 %4996  ;;  %v4970_v8 = vpop.permute.xlu0 %4969 }
0x187b   : > { %v4999_v40 = vsel %vm891_vm15, %v4995_v37, %v4997_v14 }
0x187e   : > { %v4983_v35 = vpop.permute.xlu1 %4982  ;;  %v4961_v47 = vpop.permute.xlu0 %4960 }
0x1882   : > { %v4959_v41 = vpop.permute.xlu1 %4958  ;;  %v4947_v15 = vpop.permute.xlu0 %4946 }
0x1883   : > { %v4963_v28 = vsel %vm843_vm0, %v4959_v41, %v4961_v47  ;;  %v4962_v54 = vsel %vm843_vm0, %v4957_v53, %v4959_v41 }
0x1886   : > { %v4934_v57 = vpop.permute.xlu1 %4933  ;;  %v4923_v25 = vpop.permute.xlu0 %4922 }
0x188a   : > { %v5008_v50 = vpop.permute.xlu1 %5007  ;;  %v5010_v32 = vpop.permute.xlu0 %5009 }
0x188b   : > { %v5011_v13 = vsel %vm905_vm10, %v5006_v63, %v5008_v50  ;;  %v5012_v29 = vsel %vm905_vm10, %v5008_v50, %v5010_v32  ;;  %vm7893_vm10 = vmmov %vm7892_vm4 }
0x188c   : > { %5032 = vmatprep.subr.mxu1 %v5012_v29 }
0x188d   : > { %5033 = vmatpush1.msra.mxu1 %v5011_v13 }
0x188e   : > { %v4985_v33 = vpop.permute.xlu1 %4984  ;;  %5034 = vmatprep.subr.mxu1 %v4999_v40  ;;  %v4987_v39 = vpop.permute.xlu0 %4986 }
0x188f   : > { %v4988_v42 = vsel %vm877_vm3, %v4983_v35, %v4985_v33  ;;  %5035 = vmatpush1.msra.mxu1 %v4998_v38  ;;  %v4989_v3 = vsel %vm877_vm3, %v4985_v33, %v4987_v39 }
0x1890   : > { %5036 = vmatprep.subr.mxu1 %v4989_v3 }
0x1891   : > { %5037 = vmatpush1.msra.mxu1 %v4988_v42 }
0x1892   : > { %v4974_v45 = vpop.permute.xlu1 %4973  ;;  %v4972_v18 = vpop.permute.xlu0 %4971 }
0x1893   : > { %v4975_v4 = vsel %vm860_vm2, %v4970_v8, %v4972_v18  ;;  %v4976_v31 = vsel %vm860_vm2, %v4972_v18, %v4974_v45 }
0x1894   : > { %5038 = vmatprep.subr.mxu1 %v4976_v31 }
0x1895   : > { %5039 = vmatpush1.msra.mxu1 %v4975_v4 }
0x1896   : > { %v4951_v55 = vpop.permute.xlu1 %4950  ;;  %5040 = vmatprep.subr.mxu1 %v4963_v28  ;;  %v4949_v7 = vpop.permute.xlu0 %4948 }
0x1897   : > { %v4952_v34 = vsel %vm829_vm13, %v4947_v15, %v4949_v7  ;;  %5041 = vmatpush1.msra.mxu1 %v4962_v54  ;;  %v4953_v16 = vsel %vm829_vm13, %v4949_v7, %v4951_v55 }
0x1898   : > { %5042 = vmatprep.subr.mxu1 %v4953_v16 }
0x1899   : > { %5043 = vmatpush1.msra.mxu1 %v4952_v34 }
0x189a   : > { %v4936_v52 = vpop.permute.xlu1 %4935  ;;  %v4938_v0 = vpop.permute.xlu0 %4937 }
0x189b   : > { %v4939_v58 = vsel %vm812_vm14, %v4934_v57, %v4936_v52  ;;  %v4940_v60 = vsel %vm812_vm14, %v4936_v52, %v4938_v0 }
0x189c   : > { %5044 = vmatprep.subr.mxu1 %v4940_v60 }
0x189d   : > { %5045 = vmatpush1.msra.mxu1 %v4939_v58 }
0x189e   : > { %v4925_v44 = vpop.permute.xlu1 %4924  ;;  %v4921_v17 = vpop.permute.xlu0 %4920 }
0x189f   : > { %v4926_v61 = vsel %vm7892_vm4, %v4921_v17, %v4923_v25  ;;  %v4927_v21 = vsel %vm7893_vm10, %v4923_v25, %v4925_v44 }
0x18a0   : > { %5046 = vmatprep.subr.mxu1 %v4927_v21 }
0x18a1   : > { %5047 = vmatpush1.msra.mxu1 %v4926_v61 }
0x18a2   : > { %5048 = vmatprep.subr.mxu1 %v4902_v27 }
0x18a3   : > { %5049 = vmatpush1.msra.mxu1 %v4901_v5 }
0x18a4   : > { %5496 = vmatmul.mubr.msk.f32.vlgmr.msra.gmra.mxu1 %vm1142_vm11, %v4888_v10 }
0x1964   : > { %v5084_v1 = vpop.f32.mrf.mxu1 }
0x1965   : > { %v5089_v49 = vmin.f32 %v5084_v1, 20.0  ;;  %vm5095_vm13 = vcmp.gt.f32.partialorder %v5084_v1, 20.0 }
0x1966   : > { %v5086_v46 = vpop.f32.mrf.mxu1 }
0x1967   : > { %v5091_v12 = vmul.f32 1.442695, %v5089_v49  ;;  %v5090_v24 = vmin.f32 %v5086_v46, 20.0  ;;  %vm5096_vm14 = vcmp.gt.f32.partialorder %v5086_v46, 20.0 }
0x1969   : > { %6051 = vpow2.f32 %v5091_v12  ;;  %v5093_v59 = vmul.f32 1.442695, %v5090_v24 }
0x196b   : > { %6053 = vpow2.f32 %v5093_v59 }
0x1976   : > { %v6052_v11 = vpop.eup %6051 }
0x1977   : > { %v5097_v56 = vadd.f32 1.0, %v6052_v11 }
0x1978   : > { %v6054_v20 = vpop.eup %6053 }
0x1979   : > { %6055 = vlog2.f32 %v5097_v56  ;;  %v5098_v9 = vadd.f32 1.0, %v6054_v20 }
0x197b   : > { %6057 = vlog2.f32 %v5098_v9 }
0x1986   : > { %v6056_v22 = vpop.eup %6055 }
0x1987   : > { %v5100_v26 = vmul.f32 0.6931472, %v6056_v22 }
0x1988   : > { %v6058_v2 = vpop.eup %6057 }
0x1989   : > { %v5103_v36 = vsel %vm5095_vm13, %v5084_v1, %v5100_v26  ;;  %v5102_v19 = vmul.f32 0.6931472, %v6058_v2 }
0x198a   : > { %v5105_v23 = vadd.f32 1.0, %v5103_v36 }
0x198b   : > { %v5104_v30 = vsel %vm5096_vm14, %v5086_v46, %v5102_v19 }
0x198c   : > { %v5106_v51 = vadd.f32 1.0, %v5104_v30 }
0x198e   : > { %v5109_v48 = vcombine.low %v5105_v23, %v5106_v51 }
0x1990   : > { %5111 = vst [vmem:[%s663_s24] sm:$0xff] %v5109_v48 }
0x1991 PF: > { %s24_s17 = sadd.s32 1, %s6097_s17   ;;  %s7894_s22 = sld [smem:[#allocation2_spill]] }
0x1992   : > { %p21_p7 = scmp.ge.s32.totalorder %s24_s17, 6   ;;  %s7895_s0 = sld [smem:[#allocation3_spill]] }
0x1993   : > { %s7896_s29 = smov %s6089_s15  ;;  %s7897_s30 = smov %s6093_s16 }
0x1994   :  { %23 = sbr.rel (!%p21_p7) target bundleno = 8 (0x8), region = 145 }
0x1997   : > { %s7898_s15 = smov %s7894_s22 }
0x1998   : > { %s7899_s16 = smov %s7895_s0 }

</bundles_post_ra>
